<compile_context>
chip_gen: v7x
topology: tpu7x:2x2x1
jax: 0.10.0
libtpu: 0.0.40
codegen_flags: <defaults>
</compile_context>

<pallas_src>
import functools

import jax
import jax.numpy as jnp
from jax.experimental import pallas as pl
from jax.experimental.pallas import tpu as pltpu

STEM_C = 32       # EfficientNet-B0 stem channels
HEAD_C = 1280     # EfficientNet-B0 head channels
EMBED = 512       # embedding_features of replaced classifier[1]
K_RAW = 27        # 3x3 kernel * 3 input channels (im2col K)
K_PAD = 32        # lane-aligned K for the stem GEMM


# ------------------------------ fused kernel ------------------------------- #

def _fused_kernel(a_ref, ws_ref, bs_ref, wh_ref, bh_ref,
                  wf_ref, bf_ref, wc_ref, bc_ref,
                  emb_ref, cls_ref):
    """One batch image per grid step: backbone + both linear heads, all in VMEM."""
    a = a_ref[0]                                                    # (HW, K_PAD) bf16

    # stem conv (BN folded into weights) + SiLU — stays in vregs, never hits HBM
    h = jnp.dot(a, ws_ref[...], preferred_element_type=jnp.float32) + bs_ref[...]
    h = h * jax.nn.sigmoid(h)                                       # (HW, 32) f32

    # head 1x1 conv (BN folded) + SiLU
    h = jnp.dot(h.astype(jnp.bfloat16), wh_ref[...],
                preferred_element_type=jnp.float32) + bh_ref[...]
    h = h * jax.nn.sigmoid(h)                                       # (HW, 1280) f32

    # adaptive avg pool to 1x1 + flatten
    pooled = jnp.mean(h, axis=0, keepdims=True)                     # (1, 1280) f32

    # backbone classifier[1]: Linear(1280, 512)  (Dropout = identity in eval)
    emb = jnp.dot(pooled.astype(jnp.bfloat16), wf_ref[...],
                  preferred_element_type=jnp.float32) + bf_ref[...]
    emb_ref[0] = emb.astype(emb_ref.dtype)                          # (1, 512)

    # model classifier: Linear(512, num_class)  (zero-padded to lane width 128)
    cls = jnp.dot(emb.astype(jnp.bfloat16), wc_ref[...],
                  preferred_element_type=jnp.float32) + bc_ref[...]
    cls_ref[0] = cls.astype(cls_ref.dtype)                          # (1, C_pad)


# ------------------------------- parameters -------------------------------- #

def init_params(num_class, key):
    ks = jax.random.split(key, 12)
    p = {}
    # stem conv (out, in, kh, kw) + BN
    p["stem_w"] = 0.1 * jax.random.normal(ks[0], (STEM_C, 3, 3, 3), jnp.float32)
    p["stem_bn_g"] = 1.0 + 0.05 * jax.random.normal(ks[1], (STEM_C,), jnp.float32)
    p["stem_bn_b"] = 0.05 * jax.random.normal(ks[2], (STEM_C,), jnp.float32)
    p["stem_bn_m"] = 0.05 * jax.random.normal(ks[3], (STEM_C,), jnp.float32)
    p["stem_bn_v"] = jax.random.uniform(ks[4], (STEM_C,), jnp.float32, 0.5, 1.5)
    # head 1x1 conv (out, in, 1, 1) + BN
    p["head_w"] = 0.1 * jax.random.normal(ks[5], (HEAD_C, STEM_C, 1, 1), jnp.float32)
    p["head_bn_g"] = 1.0 + 0.05 * jax.random.normal(ks[6], (HEAD_C,), jnp.float32)
    p["head_bn_b"] = 0.05 * jax.random.normal(ks[7], (HEAD_C,), jnp.float32)
    p["head_bn_m"] = 0.05 * jax.random.normal(ks[8], (HEAD_C,), jnp.float32)
    p["head_bn_v"] = jax.random.uniform(ks[9], (HEAD_C,), jnp.float32, 0.5, 1.5)
    # backbone classifier[1]: Linear(1280, 512)
    p["fc_w"] = 0.02 * jax.random.normal(ks[10], (EMBED, HEAD_C), jnp.float32)
    p["fc_b"] = jnp.zeros((EMBED,), jnp.float32)
    # model classifier: Linear(512, num_class)
    p["cls_w"] = 0.05 * jax.random.normal(ks[11], (num_class, EMBED), jnp.float32)
    p["cls_b"] = jnp.zeros((num_class,), jnp.float32)
    return p


def prepare_params(p, num_class):
    """One-time prep: fold BN into conv weights, transpose to (K, N), pad to
    lane-friendly widths, cast MXU operands to bf16. Runs once, not per forward."""
    eps = 1e-5
    # stem 3x3 conv + BN  -> (K_PAD, 32) bf16, shift (1, 32) f32
    w_stem = jnp.transpose(p["stem_w"], (2, 3, 1, 0)).reshape(K_RAW, STEM_C)
    s = p["stem_bn_g"] * jax.lax.rsqrt(p["stem_bn_v"] + eps)
    stem_shift = (p["stem_bn_b"] - p["stem_bn_m"] * s).reshape(1, STEM_C)
    w_stem = jnp.pad(w_stem * s[None, :], ((0, K_PAD - K_RAW), (0, 0)))
    # head 1x1 conv + BN  -> (32, 1280) bf16, shift (1, 1280) f32
    w_head = jnp.transpose(p["head_w"].reshape(HEAD_C, STEM_C))
    sh = p["head_bn_g"] * jax.lax.rsqrt(p["head_bn_v"] + eps)
    head_shift = (p["head_bn_b"] - p["head_bn_m"] * sh).reshape(1, HEAD_C)
    w_head = w_head * sh[None, :]
    # classifier[1]: Linear(1280, 512)
    w_fc = jnp.transpose(p["fc_w"])
    b_fc = p["fc_b"].reshape(1, EMBED)
    # model classifier: Linear(512, num_class), padded to a lane-dense width
    c_pad = ((num_class + 127) // 128) * 128
    w_cls = jnp.zeros((EMBED, c_pad), jnp.float32).at[:, :num_class].set(
        jnp.transpose(p["cls_w"]))
    b_cls = jnp.zeros((1, c_pad), jnp.float32).at[0, :num_class].set(p["cls_b"])
    return {
        "w_stem": w_stem.astype(jnp.bfloat16), "stem_shift": stem_shift,
        "w_head": w_head.astype(jnp.bfloat16), "head_shift": head_shift,
        "w_fc": w_fc.astype(jnp.bfloat16), "b_fc": b_fc,
        "w_cls": w_cls.astype(jnp.bfloat16), "b_cls": b_cls,
        "num_class": num_class, "c_pad": c_pad,
    }


# -------------------------------- forward ---------------------------------- #

def forward(prepped, x_nchw, label=None):
    """Matches EfficientNet_Normal.forward(x, label): returns (embedding, logits)."""
    del label  # unused by the reference forward
    x = jnp.transpose(x_nchw, (0, 2, 3, 1)).astype(jnp.float32)     # NHWC
    B, H, W, Cin = x.shape
    Ho, Wo = H // 2, W // 2
    HW = Ho * Wo

    # im2col for the stride-2 3x3 stem conv (pad=1). K zero-padded 27 -> 32 for lane
    # alignment; cast to bf16 to halve the A-operand bytes.
    xp = jnp.pad(x, ((0, 0), (1, 1), (1, 1), (0, 0)))
    patches = [xp[:, dy:dy + 2 * Ho - 1:2, dx:dx + 2 * Wo - 1:2, :]
               for dy in range(3) for dx in range(3)]
    a = jnp.stack(patches, axis=3).reshape(B, HW, 9 * Cin)
    a = jnp.pad(a, ((0, 0), (0, 0), (0, K_PAD - 9 * Cin))).astype(jnp.bfloat16)

    c_pad = prepped["c_pad"]
    num_class = prepped["num_class"]
    weight_args = (prepped["w_stem"], prepped["stem_shift"],
                   prepped["w_head"], prepped["head_shift"],
                   prepped["w_fc"], prepped["b_fc"],
                   prepped["w_cls"], prepped["b_cls"])

    def full_spec(arr):
        nd = arr.ndim
        return pl.BlockSpec(arr.shape, lambda b, _nd=nd: (0,) * _nd)

    flops = 2 * B * (HW * K_PAD * STEM_C + HW * STEM_C * HEAD_C
                     + HEAD_C * EMBED + EMBED * c_pad)
    transcendentals = B * HW * (STEM_C + HEAD_C)
    bytes_accessed = (a.size * 2
                      + sum(w.size * w.dtype.itemsize for w in weight_args)
                      + B * (EMBED + c_pad) * 4)

    emb3, cls3 = pl.pallas_call(
        _fused_kernel,
        grid=(B,),
        out_shape=(jax.ShapeDtypeStruct((B, 1, EMBED), jnp.float32),
                   jax.ShapeDtypeStruct((B, 1, c_pad), jnp.float32)),
        in_specs=[pl.BlockSpec((1, HW, K_PAD), lambda b: (b, 0, 0))]
                 + [full_spec(w) for w in weight_args],
        out_specs=(pl.BlockSpec((1, 1, EMBED), lambda b: (b, 0, 0)),
                   pl.BlockSpec((1, 1, c_pad), lambda b: (b, 0, 0))),
        compiler_params=pltpu.CompilerParams(
            dimension_semantics=("parallel",),
            vmem_limit_bytes=32 * 1024 * 1024),
        cost_estimate=pl.CostEstimate(flops=flops,
                                      transcendentals=transcendentals,
                                      bytes_accessed=bytes_accessed),
    )(a, *weight_args)

    x_embed = emb3.reshape(B, EMBED)                  # torch.flatten(x, 1) equivalent
    classify = cls3.reshape(B, c_pad)[:, :num_class]  # drop lane padding
    return x_embed, classify


# ---------------------------------- main ------------------------------------ #

if __name__ == "__main__":
    num_class = 10
    key = jax.random.PRNGKey(0)
    kx, kl, kp = jax.random.split(key, 3)

    x = jax.random.normal(kx, (2, 3, 16, 16), jnp.float32)        # NCHW, like PyTorch
    label = jax.random.randint(kl, (2,), 0, num_class, jnp.int32) # unused by forward
    params = init_params(num_class, kp)
    prepped = prepare_params(params, num_class)

    fwd = jax.jit(functools.partial(forward, prepped))
    x_embed, classify = fwd(x, label)
    jax.block_until_ready((x_embed, classify))

    assert x_embed.shape == (2, EMBED), x_embed.shape
    assert classify.shape == (2, num_class), classify.shape
    assert jnp.all(jnp.isfinite(x_embed)) and jnp.all(jnp.isfinite(classify))
    print("KERNEL_OK")
</pallas_src>

<mosaic_0001>
module attributes {stable_mosaic.version = 11 : i64} {
  func.func @_fused_kernel(%arg0: i32, %arg1: memref<1x64x32xbf16, #tpu.memory_space<vmem>>, %arg2: memref<32x32xbf16, #tpu.memory_space<vmem>>, %arg3: memref<1x32xf32, #tpu.memory_space<vmem>>, %arg4: memref<32x1280xbf16, #tpu.memory_space<vmem>>, %arg5: memref<1x1280xf32, #tpu.memory_space<vmem>>, %arg6: memref<1280x512xbf16, #tpu.memory_space<vmem>>, %arg7: memref<1x512xf32, #tpu.memory_space<vmem>>, %arg8: memref<512x128xbf16, #tpu.memory_space<vmem>>, %arg9: memref<1x128xf32, #tpu.memory_space<vmem>>, %arg10: memref<1x1x512xf32, #tpu.memory_space<vmem>>, %arg11: memref<1x1x128xf32, #tpu.memory_space<vmem>>) attributes {dimension_semantics = [#tpu.dimension_semantics<parallel>], iteration_bounds = array<i64: 2>, scalar_prefetch = 0 : i64, scratch_operands = 0 : i64, tpu.core_type = #tpu.core_type<tc>, window_params = [{transform_indices = @transform_0, window_bounds = array<i64: 1, 64, 32>}, {pipeline_mode = #tpu.pipeline_mode<synchronous>, transform_indices = @transform_1, window_bounds = array<i64: 32, 32>}, {pipeline_mode = #tpu.pipeline_mode<synchronous>, transform_indices = @transform_2, window_bounds = array<i64: 1, 32>}, {pipeline_mode = #tpu.pipeline_mode<synchronous>, transform_indices = @transform_3, window_bounds = array<i64: 32, 1280>}, {pipeline_mode = #tpu.pipeline_mode<synchronous>, transform_indices = @transform_4, window_bounds = array<i64: 1, 1280>}, {pipeline_mode = #tpu.pipeline_mode<synchronous>, transform_indices = @transform_5, window_bounds = array<i64: 1280, 512>}, {pipeline_mode = #tpu.pipeline_mode<synchronous>, transform_indices = @transform_6, window_bounds = array<i64: 1, 512>}, {pipeline_mode = #tpu.pipeline_mode<synchronous>, transform_indices = @transform_7, window_bounds = array<i64: 512, 128>}, {pipeline_mode = #tpu.pipeline_mode<synchronous>, transform_indices = @transform_8, window_bounds = array<i64: 1, 128>}, {transform_indices = @transform_9, window_bounds = array<i64: 1, 1, 512>}, {transform_indices = @transform_10, window_bounds = array<i64: 1, 1, 128>}]} {
    %c0 = arith.constant 0 : index
    %c0_0 = arith.constant 0 : index
    %c0_1 = arith.constant 0 : index
    %0 = vector.load %arg1[%c0, %c0_0, %c0_1] : memref<1x64x32xbf16, #tpu.memory_space<vmem>>, vector<1x64x32xbf16>
    %1 = vector.shape_cast %0 : vector<1x64x32xbf16> to vector<64x32xbf16>
    %c0_2 = arith.constant 0 : index
    %c0_3 = arith.constant 0 : index
    %2 = vector.load %arg2[%c0_2, %c0_3] : memref<32x32xbf16, #tpu.memory_space<vmem>>, vector<32x32xbf16>
    %cst = arith.constant dense<0.000000e+00> : vector<64x32xf32>
    %3 = tpu.matmul %1, %2, %cst {dimension_numbers = #tpu.dot_dimension_numbers<[1], [0], [0], [1], [0, 0, 1, 1], [], []>} : vector<64x32xbf16>, vector<32x32xbf16>, vector<64x32xf32> -> vector<64x32xf32>
    %c0_4 = arith.constant 0 : index
    %c0_5 = arith.constant 0 : index
    %4 = vector.load %arg3[%c0_4, %c0_5] : memref<1x32xf32, #tpu.memory_space<vmem>>, vector<1x32xf32>
    %5 = vector.broadcast %4 : vector<1x32xf32> to vector<64x32xf32>
    %6 = arith.addf %3, %5 : vector<64x32xf32>
    %7 = arith.negf %6 : vector<64x32xf32>
    %8 = math.exp %7 : vector<64x32xf32>
    %cst_6 = arith.constant 1.000000e+00 : f32
    %9 = vector.broadcast %cst_6 : f32 to vector<64x32xf32>
    %10 = arith.addf %9, %8 : vector<64x32xf32>
    %11 = arith.divf %9, %10 : vector<64x32xf32>
    %12 = arith.mulf %6, %11 : vector<64x32xf32>
    %13 = arith.truncf %12 : vector<64x32xf32> to vector<64x32xbf16>
    %c0_7 = arith.constant 0 : index
    %c0_8 = arith.constant 0 : index
    %14 = vector.load %arg4[%c0_7, %c0_8] : memref<32x1280xbf16, #tpu.memory_space<vmem>>, vector<32x1280xbf16>
    %cst_9 = arith.constant dense<0.000000e+00> : vector<64x1280xf32>
    %15 = tpu.matmul %13, %14, %cst_9 {dimension_numbers = #tpu.dot_dimension_numbers<[1], [0], [0], [1], [0, 0, 1, 1], [], []>} : vector<64x32xbf16>, vector<32x1280xbf16>, vector<64x1280xf32> -> vector<64x1280xf32>
    %c0_10 = arith.constant 0 : index
    %c0_11 = arith.constant 0 : index
    %16 = vector.load %arg5[%c0_10, %c0_11] : memref<1x1280xf32, #tpu.memory_space<vmem>>, vector<1x1280xf32>
    %17 = vector.broadcast %16 : vector<1x1280xf32> to vector<64x1280xf32>
    %18 = arith.addf %15, %17 : vector<64x1280xf32>
    %19 = arith.negf %18 : vector<64x1280xf32>
    %20 = math.exp %19 : vector<64x1280xf32>
    %cst_12 = arith.constant 1.000000e+00 : f32
    %21 = vector.broadcast %cst_12 : f32 to vector<64x1280xf32>
    %22 = arith.addf %21, %20 : vector<64x1280xf32>
    %23 = arith.divf %21, %22 : vector<64x1280xf32>
    %24 = arith.mulf %18, %23 : vector<64x1280xf32>
    %cst_13 = arith.constant dense<0.000000e+00> : vector<1280xf32>
    %25 = vector.multi_reduction <add>, %24, %cst_13 [0] : vector<64x1280xf32> to vector<1280xf32>
    %26 = vector.shape_cast %25 : vector<1280xf32> to vector<1x1280xf32>
    %cst_14 = arith.constant 6.400000e+01 : f32
    %27 = vector.broadcast %cst_14 : f32 to vector<1x1280xf32>
    %28 = arith.divf %26, %27 : vector<1x1280xf32>
    %29 = arith.truncf %28 : vector<1x1280xf32> to vector<1x1280xbf16>
    %c0_15 = arith.constant 0 : index
    %c0_16 = arith.constant 0 : index
    %30 = vector.load %arg6[%c0_15, %c0_16] : memref<1280x512xbf16, #tpu.memory_space<vmem>>, vector<1280x512xbf16>
    %cst_17 = arith.constant dense<0.000000e+00> : vector<1x512xf32>
    %31 = tpu.matmul %29, %30, %cst_17 {dimension_numbers = #tpu.dot_dimension_numbers<[1], [0], [0], [1], [0, 0, 1, 1], [], []>} : vector<1x1280xbf16>, vector<1280x512xbf16>, vector<1x512xf32> -> vector<1x512xf32>
    %c0_18 = arith.constant 0 : index
    %c0_19 = arith.constant 0 : index
    %32 = vector.load %arg7[%c0_18, %c0_19] : memref<1x512xf32, #tpu.memory_space<vmem>>, vector<1x512xf32>
    %33 = arith.addf %31, %32 : vector<1x512xf32>
    %c0_20 = arith.constant 0 : index
    %c0_21 = arith.constant 0 : index
    %c0_22 = arith.constant 0 : index
    %34 = vector.load %arg10[%c0_20, %c0_21, %c0_22] : memref<1x1x512xf32, #tpu.memory_space<vmem>>, vector<1x1x512xf32>
    %35 = vector.shape_cast %34 : vector<1x1x512xf32> to vector<1x512xf32>
    %36 = vector.shape_cast %33 : vector<1x512xf32> to vector<1x1x512xf32>
    tpu.vector_store %arg10[%c0_20, %c0_21, %c0_22], %36 {strides = array<i32>} : memref<1x1x512xf32, #tpu.memory_space<vmem>>, vector<1x1x512xf32>,
    %37 = arith.truncf %33 : vector<1x512xf32> to vector<1x512xbf16>
    %c0_23 = arith.constant 0 : index
    %c0_24 = arith.constant 0 : index
    %38 = vector.load %arg8[%c0_23, %c0_24] : memref<512x128xbf16, #tpu.memory_space<vmem>>, vector<512x128xbf16>
    %cst_25 = arith.constant dense<0.000000e+00> : vector<1x128xf32>
    %39 = tpu.matmul %37, %38, %cst_25 {dimension_numbers = #tpu.dot_dimension_numbers<[1], [0], [0], [1], [0, 0, 1, 1], [], []>} : vector<1x512xbf16>, vector<512x128xbf16>, vector<1x128xf32> -> vector<1x128xf32>
    %c0_26 = arith.constant 0 : index
    %c0_27 = arith.constant 0 : index
    %40 = vector.load %arg9[%c0_26, %c0_27] : memref<1x128xf32, #tpu.memory_space<vmem>>, vector<1x128xf32>
    %41 = arith.addf %39, %40 : vector<1x128xf32>
    %c0_28 = arith.constant 0 : index
    %c0_29 = arith.constant 0 : index
    %c0_30 = arith.constant 0 : index
    %42 = vector.load %arg11[%c0_28, %c0_29, %c0_30] : memref<1x1x128xf32, #tpu.memory_space<vmem>>, vector<1x1x128xf32>
    %43 = vector.shape_cast %42 : vector<1x1x128xf32> to vector<1x128xf32>
    %44 = vector.shape_cast %41 : vector<1x128xf32> to vector<1x1x128xf32>
    tpu.vector_store %arg11[%c0_28, %c0_29, %c0_30], %44 {strides = array<i32>} : memref<1x1x128xf32, #tpu.memory_space<vmem>>, vector<1x1x128xf32>,
    return
  }
  func.func @transform_0(%arg0: i32) -> (i32, i32, i32) {
    %c0_i32 = arith.constant 0 : i32
    %c0_i32_0 = arith.constant 0 : i32
    %c0_i32_1 = arith.constant 0 : i32
    return %arg0, %c0_i32, %c0_i32_0 : i32, i32, i32
  }
  func.func @transform_1(%arg0: i32) -> (i32, i32) {
    %c0_i32 = arith.constant 0 : i32
    %c0_i32_0 = arith.constant 0 : i32
    %c0_i32_1 = arith.constant 0 : i32
    return %c0_i32, %c0_i32_0 : i32, i32
  }
  func.func @transform_2(%arg0: i32) -> (i32, i32) {
    %c0_i32 = arith.constant 0 : i32
    %c0_i32_0 = arith.constant 0 : i32
    %c0_i32_1 = arith.constant 0 : i32
    return %c0_i32, %c0_i32_0 : i32, i32
  }
  func.func @transform_3(%arg0: i32) -> (i32, i32) {
    %c0_i32 = arith.constant 0 : i32
    %c0_i32_0 = arith.constant 0 : i32
    %c0_i32_1 = arith.constant 0 : i32
    return %c0_i32, %c0_i32_0 : i32, i32
  }
  func.func @transform_4(%arg0: i32) -> (i32, i32) {
    %c0_i32 = arith.constant 0 : i32
    %c0_i32_0 = arith.constant 0 : i32
    %c0_i32_1 = arith.constant 0 : i32
    return %c0_i32, %c0_i32_0 : i32, i32
  }
  func.func @transform_5(%arg0: i32) -> (i32, i32) {
    %c0_i32 = arith.constant 0 : i32
    %c0_i32_0 = arith.constant 0 : i32
    %c0_i32_1 = arith.constant 0 : i32
    return %c0_i32, %c0_i32_0 : i32, i32
  }
  func.func @transform_6(%arg0: i32) -> (i32, i32) {
    %c0_i32 = arith.constant 0 : i32
    %c0_i32_0 = arith.constant 0 : i32
    %c0_i32_1 = arith.constant 0 : i32
    return %c0_i32, %c0_i32_0 : i32, i32
  }
  func.func @transform_7(%arg0: i32) -> (i32, i32) {
    %c0_i32 = arith.constant 0 : i32
    %c0_i32_0 = arith.constant 0 : i32
    %c0_i32_1 = arith.constant 0 : i32
    return %c0_i32, %c0_i32_0 : i32, i32
  }
  func.func @transform_8(%arg0: i32) -> (i32, i32) {
    %c0_i32 = arith.constant 0 : i32
    %c0_i32_0 = arith.constant 0 : i32
    %c0_i32_1 = arith.constant 0 : i32
    return %c0_i32, %c0_i32_0 : i32, i32
  }
  func.func @transform_9(%arg0: i32) -> (i32, i32, i32) {
    %c0_i32 = arith.constant 0 : i32
    %c0_i32_0 = arith.constant 0 : i32
    %c0_i32_1 = arith.constant 0 : i32
    return %arg0, %c0_i32, %c0_i32_0 : i32, i32, i32
  }
  func.func @transform_10(%arg0: i32) -> (i32, i32, i32) {
    %c0_i32 = arith.constant 0 : i32
    %c0_i32_0 = arith.constant 0 : i32
    %c0_i32_1 = arith.constant 0 : i32
    return %arg0, %c0_i32, %c0_i32_0 : i32, i32, i32
  }
}

</mosaic_0001>

<bundles_post_ra>
// kernel: forward.1
= control target key start
LH: loop header
LB: loop body
LE: loop exit
PB: predicated region body
PF: predicated region fallthrough
CT: control target
= control target key end

     0   :  { %16 = vsyncpa [#allocation3], 0  ;;  %s8356_s0 = inlined_call_operand.vmem [shape: bf16[2,64,32], index: 0, kind: input, shape index: {}]   ;;  %s8357_s1 = inlined_call_operand.vmem [shape: bf16[32,32], index: 1, kind: input, shape index: {}]   ;;  %s8358_s2 = inlined_call_operand.vmem [shape: f32[1,32], index: 2, kind: input, shape index: {}]   ;;  %s8359_s3 = inlined_call_operand.vmem [shape: bf16[32,1280], index: 3, kind: input, shape index: {}]   ;;  %s8360_s4 = inlined_call_operand.vmem [shape: f32[1,1280], index: 4, kind: input, shape index: {}]   ;;  %s8361_s5 = inlined_call_operand.vmem [shape: bf16[1280,512], index: 5, kind: input, shape index: {}]   ;;  %s8362_s6 = inlined_call_operand.vmem [shape: f32[1,512], index: 6, kind: input, shape index: {}]   ;;  %s8363_s7 = inlined_call_operand.vmem [shape: bf16[512,128], index: 7, kind: input, shape index: {}]   ;;  %s8364_s8 = inlined_call_operand.vmem [shape: f32[1,128], index: 8, kind: input, shape index: {}]   ;;  %s8365_s9 = inlined_call_operand.vmem [shape: f32[2,1,512], index: 9, kind: output, shape index: {0}]   ;;  %s8366_s10 = inlined_call_operand.hbm [shape: f32[2,1,128], index: 10, kind: output, shape index: {1}]  }
   0x1   :  { %18 = vsyncpa [#allocation3 + $0x1], 0  ;;  %s6314_s13 = smov 0   ;;  %s6316_s14 = smov 0  }
   0x2   :  { %s6318_s15 = smov 0   ;;  %s6320_s16 = smov 0  }
   0x3 LB: > { %s6335_s17 = sadd.s32 4294967295, %s6254_s16   ;;  %s4647_s18 = sadd.s32 4294967294, %s6254_s16   ;;  %s6254_s16 = sphi %s6320_s16, %s8459_s16   ;;  %s6250_s15 = sphi %s6318_s15, %s8458_s15   ;;  %s6246_s14 = sphi %s6316_s14, %s8457_s14   ;;  %s6242_s13 = sphi %s6314_s13, %s8456_s13  }
   0x4   : > { %s6339_s19 = sadd.s32 1, %s6254_s16   ;;  %s251_s20 = sadd.s32 1, %s6250_s15 }
   0x5   : > { %s248_s21 = ssub.s32 %s6254_s16, %s6339_s19  ;;  %p261_p0 = scmp.ne.s32.totalorder %s6250_s15, %s6246_s14 }
   0x6   : > { %p249_p1 = scmp.eq.s32.totalorder %s248_s21, 0  ;;  %p262_p2 = scmp.eq.s32.totalorder %s6335_s17, 1 }
   0x7   : > { %p267_p3 = scmp.ne.s32.totalorder %s6246_s14, %s6242_s13  ;;  %p268_p4 = scmp.eq.s32.totalorder %s4647_s18, 1 }
   0x8   : > { %s6350_s22 = scalar_select %p249_p1, %s6250_s15, %s251_s20  }
   0x9   : > { %p6352_p5 = por %p262_p2, %p261_p0  ;;  %p6356_p6 = por %p268_p4, %p267_p3 }
   0xa   : > { %p4650_p7 = scmp.ge.s32.totalorder %s6254_s16, 1  ;;  %p318_p8 = scmp.lt.s32.totalorder %s6254_s16, 3 }
   0xc   : > { %p319_p9 = pnand %p4650_p7, %p318_p8 }
   0xe   : > { %322 = sbr.rel (%p319_p9) target bundleno = 1304 (0x518), region = 56 }
  0x15   : > { %v5292_v0 = vld [vmem:[%s8357_s1] sm:$0xff]   ;;  %p359_p10 = scmp.lt.s32.totalorder %s6335_s17, 1  ;;  %v5293_v1 = vld [vmem:[%s8357_s1 + $0x8] sm:$0xff]   ;;  %vm420_vm0 = vcmask 261120   ;;  %v5303_v8 = vld [vmem:[%s8359_s3 + $0x54] ss:$40 sps:$4 sm:$0xff]  }
  0x16   : > { %5199 = vmatprep.subr.bf16.mxu0 %v5292_v0  ;;  %v5300_v6 = vld [vmem:[%s8359_s3 + $0x4] ss:$40 sps:$4 sm:$0xff]   ;;  %v5298_v7 = vld [vmem:[%s8359_s3] ss:$40 sps:$4 sm:$0xff]   ;;  %v5301_v9 = vld [vmem:[%s8359_s3 + $0x50] ss:$40 sps:$4 sm:$0xff]  }
  0x17   : > { %s6370_s29 = scalar_select %p359_p10, %s6335_s17, 1  ;;  %5200 = vmatpush3.bf16.msra.mxu0 %v5292_v0  ;;  %5211 = vmatprep.subr.bf16.mxu1 %v5300_v6  ;;  %v6256_v10 = vmov 0   ;;  %v5306_v11 = vld [vmem:[%s8359_s3 + $0xc] ss:$40 sps:$4 sm:$0xff]   ;;  %v4654_v13 = vld [vmem:[%s8358_s2] ss:$0 sm:$0xff] }
  0x18   : > { %5201 = vmatprep.subr.bf16.mxu0 %v5293_v1  ;;  %5213 = vmatpush1.bf16.msra.mxu1 %v5298_v7  ;;  %v5312_v12 = vld [vmem:[%s8359_s3 + $0x14] ss:$40 sps:$4 sm:$0xff]   ;;  %v5304_v63 = vld [vmem:[%s8359_s3 + $0x8] ss:$40 sps:$4 sm:$0xff]  }
  0x19   : > { %s5148_s30 = sshll.u32 %s6370_s29, 5  ;;  %5212 = vmatprep.subr.bf16.mxu1 %v5303_v8  ;;  %786 = vmatprep.mubr.bf16.mxu1 %v6256_v10  ;;  %s4653_s25 = sshll.u32 %s6370_s29, 2 }
  0x1a   : > { %s363_s18 = scalar_lea.vmem %s8356_s0, %s5148_s30  ;;  %s367_s28 = scalar_lea.vmem %s8365_s9, %s4653_s25 }
  0x1b   : > { %v5294_v2 = vld [vmem:[%s363_s18] sm:$0xff]   ;;  %5202 = vmatpush3.bf16.msra.mxu0 %v5293_v1  ;;  %v5295_v3 = vld [vmem:[%s363_s18 + $0x8] sm:$0xff]   ;;  %v5296_v4 = vld [vmem:[%s363_s18 + $0x10] sm:$0xff]   ;;  %s357_s30 = sand.u32 1, %s6246_s14   ;;  %s5145_s29 = sshll.u32 %s6335_s17, 4 }
  0x1c   : > { %5203 = vmatprep.mubr.msk.bf16.mxu0 %vm420_vm0, %v5294_v2  ;;  %v5297_v5 = vld [vmem:[%s363_s18 + $0x18] sm:$0xff]   ;;  %744 = vmatprep.subr.bf16.mxu0 %v5300_v6  ;;  %s358_s18 = scalar_lea.vmem [#allocation2], %s357_s30  ;;  %s8314_s26 = scalar_lea.hbm %s8366_s10, %s5145_s29 }
  0x1d   : > { %5214 = vmatpush1.bf16.msra.mxu1 %v5301_v9  ;;  %v5309_v1 = vld [vmem:[%s8359_s3 + $0x5c] ss:$40 sps:$4 sm:$0xff]   ;;  %v5310_v2 = vld [vmem:[%s8359_s3 + $0x10] ss:$40 sps:$4 sm:$0xff]   ;;  %s4568_s20 = sshll.u32 %s358_s18, 4  ;;  %s4553_s27 = scalar_lea.sflag [#allocation3], %s357_s30  ;;  %s8316_s20 = int_to_ptr.vmem [resolvable:$true] %s4568_s20 }
  0x1e   : > { %5204 = vmatmul.mubr.msk.bf16.vlgmr.msra.gmra.mrb[0].mxu0 %vm420_vm0, %v5295_v3  ;;  %890 = vmatprep.subr.bf16.mxu1 %v5312_v12  ;;  %v5315_v3 = vld [vmem:[%s8359_s3 + $0x64] ss:$40 sps:$4 sm:$0xff]   ;;  %v5307_v6 = vld [vmem:[%s8359_s3 + $0x58] ss:$40 sps:$4 sm:$0xff]   ;;  %s6258_s17 = smov [#allocation2]  }
  0x1f   : > { %5207 = vmatprep.mubr.msk.bf16.mxu0 %vm420_vm0, %v5296_v4  ;;  %745 = vmatpush1.bf16.msra.mxu0 %v5298_v7  ;;  %s6196_s11 = sshll.u32 %s6258_s17, 4  ;;  %s6197_s11 = int_to_ptr.vmem [resolvable:$false] %s6196_s11 }
  0x20   : > { %746 = vmatprep.subr.bf16.mxu0 %v5303_v8  ;;  %v5313_v8 = vld [vmem:[%s8359_s3 + $0x60] ss:$40 sps:$4 sm:$0xff]   ;;  %s6198_s12 = scalar_lea.vmem %s6197_s11, 32  ;;  %p6199_p0 = scmp.lt.s32.totalorder %s8316_s20, %s6197_s11 }
  0x23   : > { %747 = vmatpush1.bf16.msra.mxu0 %v5301_v9  ;;  %v5318_v9 = vld [vmem:[%s8359_s3 + $0x1c] ss:$40 sps:$4 sm:$0xff]  }
  0x24   : > { %817 = vmatprep.subr.bf16.mxu0 %v5306_v11 }
  0x26   : > { %5208 = vmatmul.mubr.msk.bf16.gmra.mrb[4].mxu0 %vm420_vm0, %v5297_v5 }
  0x27   : > { %776 = vmatprep.mubr.bf16.mxu0 %v6256_v10 }
  0xf1   : > { %v5205_v14 = vpop.f32.mrb[0].mxu0 }
  0xf2   : > { %v476_v15 = vadd.f32 %v5205_v14, %v4654_v13  ;;  %v467_v16 = vpop.f32.mrb[1].mxu0  ;;  %v5324_v14 = vld [vmem:[%s8359_s3 + $0x24] ss:$40 sps:$4 sm:$0xff]  }
  0xf3   : > { %v468_v17 = vadd.f32 %v4654_v13, %v467_v16  ;;  %v5206_v18 = vpop.f32.mrb[2].mxu0 }
  0xf4   : > { %v4667_v19 = vmul.f32 -1.442695, %v476_v15  ;;  %v479_v20 = vadd.f32 %v5206_v18, %v4654_v13  ;;  %v470_v21 = vpop.f32.mrb[3].mxu0 }
  0xf5   : > { %v4665_v22 = vmul.f32 -1.442695, %v468_v17  ;;  %v471_v23 = vadd.f32 %v4654_v13, %v470_v21  ;;  %v5319_v21 = vld [vmem:[%s8359_s3 + $0x68] ss:$40 sps:$4 sm:$0xff]  }
  0xf6   : > { %5840 = vpow2.f32 %v4667_v19  ;;  %v4668_v24 = vmul.f32 -1.442695, %v479_v20  ;;  %v5316_v19 = vld [vmem:[%s8359_s3 + $0x18] ss:$40 sps:$4 sm:$0xff]  }
  0xf7   : > { %5842 = vpow2.f32 %v4665_v22  ;;  %v4666_v25 = vmul.f32 -1.442695, %v471_v23  ;;  %v5322_v22 = vld [vmem:[%s8359_s3 + $0x20] ss:$40 sps:$4 sm:$0xff]  }
  0xf8   : > { %5844 = vpow2.f32 %v4668_v24  ;;  %v5325_v24 = vld [vmem:[%s8359_s3 + $0x70] ss:$40 sps:$4 sm:$0xff]  }
  0xf9   : > { %5846 = vpow2.f32 %v4666_v25  ;;  %v5209_v26 = vpop.f32.mrb[4].mxu0  ;;  %v5330_v25 = vld [vmem:[%s8361_s5 + $0x4] ss:$16 sps:$4 sm:$0xff]  }
  0xfa   : > { %v6403_v27 = vadd.f32 %v5209_v26, %v4654_v13  ;;  %v483_v28 = vpop.f32.mrb[5].mxu0  ;;  %v5333_v26 = vld [vmem:[%s8361_s5 + $0xc] ss:$16 sps:$4 sm:$0xff]  }
  0xfb   : > { %v6405_v29 = vadd.f32 %v4654_v13, %v483_v28  ;;  %v5210_v30 = vpop.f32.mrb[6].mxu0  ;;  %v5331_v28 = vld [vmem:[%s8361_s5 + $0x8] ss:$16 sps:$4 sm:$0xff]  }
  0xfc   : > { %v4671_v31 = vmul.f32 -1.442695, %v6403_v27  ;;  %v6408_v32 = vadd.f32 %v5210_v30, %v4654_v13  ;;  %v486_v33 = vpop.f32.mrb[7].mxu0  ;;  %v5334_v30 = vld [vmem:[%s8361_s5 + $0x20] ss:$16 sps:$4 sm:$0xff]  }
  0xfd   : > { %v4669_v34 = vmul.f32 -1.442695, %v6405_v29  ;;  %v6411_v35 = vadd.f32 %v4654_v13, %v486_v33  ;;  %v5345_v33 = vld [vmem:[%s8361_s5 + $0x4c] ss:$16 sps:$4 sm:$0xff]  }
  0xfe   : > { %5848 = vpow2.f32 %v4671_v31  ;;  %v4672_v36 = vmul.f32 -1.442695, %v6408_v32  ;;  %v5337_v31 = vld [vmem:[%s8361_s5 + $0x28] ss:$16 sps:$4 sm:$0xff]  }
  0xff   : > { %5850 = vpow2.f32 %v4669_v34  ;;  %v4670_v37 = vmul.f32 -1.442695, %v6411_v35  ;;  %v5340_v34 = vld [vmem:[%s8361_s5 + $0x40] ss:$16 sps:$4 sm:$0xff]  }
 0x100   : > { %v5841_v38 = vpop.eup %5840  ;;  %5852 = vpow2.f32 %v4672_v36  ;;  %v5348_v36 = vld [vmem:[%s8361_s5 + $0x64] ss:$16 sps:$4 sm:$0xff]  }
 0x101   : > { %v5843_v39 = vpop.eup %5842  ;;  %v524_v40 = vadd.f32 1.0, %v5841_v38  ;;  %5854 = vpow2.f32 %v4670_v37  ;;  %v5351_v37 = vld [vmem:[%s8361_s5 + $0x6c] ss:$16 sps:$4 sm:$0xff]   ;;  %v5346_v38 = vld [vmem:[%s8361_s5 + $0x60] ss:$16 sps:$4 sm:$0xff]  }
 0x102   : > { %v5845_v41 = vpop.eup %5844  ;;  %v522_v42 = vadd.f32 1.0, %v5843_v39  ;;  %v5349_v39 = vld [vmem:[%s8361_s5 + $0x68] ss:$16 sps:$4 sm:$0xff]  }
 0x103   : > { %v5847_v43 = vpop.eup %5846  ;;  %5856 = vrcp.f32 %v524_v40  ;;  %v525_v44 = vadd.f32 1.0, %v5845_v41  ;;  %v5354_v40 = vld [vmem:[%s8361_s5 + $0x84] ss:$16 sps:$4 sm:$0xff]   ;;  %v5357_v41 = vld [vmem:[%s8361_s5 + $0x8c] ss:$16 sps:$4 sm:$0xff]  }
 0x104   : > { %5858 = vrcp.f32 %v522_v42  ;;  %v523_v45 = vadd.f32 1.0, %v5847_v43  ;;  %v5352_v42 = vld [vmem:[%s8361_s5 + $0x80] ss:$16 sps:$4 sm:$0xff]   ;;  %v5355_v43 = vld [vmem:[%s8361_s5 + $0x88] ss:$16 sps:$4 sm:$0xff]  }
 0x105   : > { %5860 = vrcp.f32 %v525_v44  ;;  %v5360_v44 = vld [vmem:[%s8361_s5 + $0xa4] ss:$16 sps:$4 sm:$0xff]  }
 0x106   : > { %5862 = vrcp.f32 %v523_v45  ;;  %v5363_v45 = vld [vmem:[%s8361_s5 + $0xac] ss:$16 sps:$4 sm:$0xff]  }
 0x108   : > { %v5849_v46 = vpop.eup %5848 }
 0x109   : > { %v5851_v47 = vpop.eup %5850  ;;  %v528_v48 = vadd.f32 1.0, %v5849_v46  ;;  %v5358_v46 = vld [vmem:[%s8361_s5 + $0xa0] ss:$16 sps:$4 sm:$0xff]  }
 0x10a   : > { %v5853_v49 = vpop.eup %5852  ;;  %v526_v50 = vadd.f32 1.0, %v5851_v47  ;;  %v5361_v47 = vld [vmem:[%s8361_s5 + $0xa8] ss:$16 sps:$4 sm:$0xff]  }
 0x10b   : > { %v5855_v51 = vpop.eup %5854  ;;  %5864 = vrcp.f32 %v528_v48  ;;  %v529_v52 = vadd.f32 1.0, %v5853_v49  ;;  %v5366_v48 = vld [vmem:[%s8361_s5 + $0xc4] ss:$16 sps:$4 sm:$0xff]   ;;  %v5369_v49 = vld [vmem:[%s8361_s5 + $0xcc] ss:$16 sps:$4 sm:$0xff]  }
 0x10c   : > { %5866 = vrcp.f32 %v526_v50  ;;  %v527_v53 = vadd.f32 1.0, %v5855_v51  ;;  %v5364_v50 = vld [vmem:[%s8361_s5 + $0xc0] ss:$16 sps:$4 sm:$0xff]   ;;  %v5367_v51 = vld [vmem:[%s8361_s5 + $0xc8] ss:$16 sps:$4 sm:$0xff]  }
 0x10d   : > { %v5857_v54 = vpop.eup %5856  ;;  %5868 = vrcp.f32 %v529_v52  ;;  %v5372_v52 = vld [vmem:[%s8361_s5 + $0xe4] ss:$16 sps:$4 sm:$0xff]  }
 0x10e   : > { %v5859_v55 = vpop.eup %5858  ;;  %5870 = vrcp.f32 %v527_v53  ;;  %v548_v58 = vmul.f32 %v5857_v54, %v476_v15  ;;  %v5375_v53 = vld [vmem:[%s8361_s5 + $0xec] ss:$16 sps:$4 sm:$0xff]   ;;  %v5370_v54 = vld [vmem:[%s8361_s5 + $0xe0] ss:$16 sps:$4 sm:$0xff]  }
 0x10f   : > { %v5861_v56 = vpop.eup %5860  ;;  %v546_v60 = vmul.f32 %v5859_v55, %v468_v17  ;;  %v5373_v55 = vld [vmem:[%s8361_s5 + $0xe8] ss:$16 sps:$4 sm:$0xff]  }
 0x110   : > { %v5863_v57 = vpop.eup %5862  ;;  %v549_v59 = vmul.f32 %v5861_v56, %v479_v20  ;;  %v5321_v20 = vld [vmem:[%s8359_s3 + $0x6c] ss:$40 sps:$4 sm:$0xff]  }
 0x111   : > { %v547_v61 = vmul.f32 %v5863_v57, %v471_v23  ;;  %v5327_v23 = vld [vmem:[%s8359_s3 + $0x74] ss:$40 sps:$4 sm:$0xff]  }
 0x112   : > { %v6415_v62 = vpack.c.bf16 %v549_v59, %v548_v58  ;;  %v5378_v56 = vld [vmem:[%s8361_s5 + $0x104] ss:$16 sps:$4 sm:$0xff]   ;;  %v5381_v57 = vld [vmem:[%s8361_s5 + $0x10c] ss:$16 sps:$4 sm:$0xff]   ;;  %v5376_v58 = vld [vmem:[%s8361_s5 + $0x100] ss:$16 sps:$4 sm:$0xff]  }
 0x113   : > { %v6420_v0 = vpack.c.bf16 %v547_v61, %v546_v60  ;;  %v5379_v59 = vld [vmem:[%s8361_s5 + $0x108] ss:$16 sps:$4 sm:$0xff]   ;;  %v5384_v60 = vld [vmem:[%s8361_s5 + $0x124] ss:$16 sps:$4 sm:$0xff]   ;;  %v5387_v61 = vld [vmem:[%s8361_s5 + $0x12c] ss:$16 sps:$4 sm:$0xff]  }
 0x114   : > { %4694 = vmatmul.mubr.msk.bf16.vlgmr.msra.gmra.mrb[0].mxu1 %vm420_vm0, %v6415_v62 }
 0x115   : > { %v5865_v4 = vpop.eup %5864  ;;  %4693 = vmatmul.mubr.msk.bf16.vlgmr.msra.gmra.mrb[8].mxu0 %vm420_vm0, %v6420_v0  ;;  %796 = vmatprep.mubr.bf16.mxu1 %v6256_v10 }
 0x116   : > { %v5867_v5 = vpop.eup %5866  ;;  %818 = vmatpush1.bf16.msra.mxu0 %v5304_v63  ;;  %849 = vmatprep.mubr.bf16.mxu0 %v6256_v10  ;;  %v552_v12 = vmul.f32 %v5865_v4, %v6403_v27  ;;  %v5328_v27 = vld [vmem:[%s8361_s5] ss:$16 sps:$4 sm:$0xff]   ;;  %v5385_v63 = vld [vmem:[%s8361_s5 + $0x128] ss:$16 sps:$4 sm:$0xff]   ;;  %v5396_v4 = vld [vmem:[%s8361_s5 + $0x164] ss:$16 sps:$4 sm:$0xff]  }
 0x117   : > { %v5869_v7 = vpop.eup %5868  ;;  %819 = vmatprep.subr.bf16.mxu0 %v5309_v1  ;;  %891 = vmatpush1.bf16.msra.mxu1 %v5310_v2  ;;  %v550_v15 = vmul.f32 %v5867_v5, %v6405_v29  ;;  %v5339_v29 = vld [vmem:[%s8361_s5 + $0x2c] ss:$16 sps:$4 sm:$0xff]   ;;  %v5388_v2 = vld [vmem:[%s8361_s5 + $0x140] ss:$16 sps:$4 sm:$0xff]  }
 0x118   : > { %v5871_v11 = vpop.eup %5870  ;;  %v553_v13 = vmul.f32 %v5869_v7, %v6408_v32  ;;  %892 = vmatprep.subr.bf16.mxu1 %v5315_v3  ;;  %v5342_v32 = vld [vmem:[%s8361_s5 + $0x44] ss:$16 sps:$4 sm:$0xff]   ;;  %v5393_v1 = vld [vmem:[%s8361_s5 + $0x14c] ss:$16 sps:$4 sm:$0xff]   ;;  %v5391_v3 = vld [vmem:[%s8361_s5 + $0x148] ss:$16 sps:$4 sm:$0xff]  }
 0x119   : > { %v551_v16 = vmul.f32 %v5871_v11, %v6411_v35  ;;  %v5343_v35 = vld [vmem:[%s8361_s5 + $0x48] ss:$16 sps:$4 sm:$0xff]   ;;  %v5399_v5 = vld [vmem:[%s8361_s5 + $0x16c] ss:$16 sps:$4 sm:$0xff]   ;;  %v5400_v11 = vld [vmem:[%s8361_s5 + $0x180] ss:$16 sps:$4 sm:$0xff]  }
 0x11a   : > { %v557_v17 = vpack.c.bf16 %v553_v13, %v552_v12  ;;  %820 = vmatpush1.bf16.msra.mxu0 %v5307_v6  ;;  %v5394_v6 = vld [vmem:[%s8361_s5 + $0x160] ss:$16 sps:$4 sm:$0xff]   ;;  %v5397_v7 = vld [vmem:[%s8361_s5 + $0x168] ss:$16 sps:$4 sm:$0xff]   ;;  %v5408_v13 = vld [vmem:[%s8361_s5 + $0x1a4] ss:$16 sps:$4 sm:$0xff]  }
 0x11b   : > { %v556_v18 = vpack.c.bf16 %v551_v16, %v550_v15  ;;  %893 = vmatpush1.bf16.msra.mxu1 %v5313_v8  ;;  %963 = vmatprep.subr.bf16.mxu0 %v5318_v9  ;;  %v5402_v8 = vld [vmem:[%s8361_s5 + $0x184] ss:$16 sps:$4 sm:$0xff]   ;;  %v5405_v9 = vld [vmem:[%s8361_s5 + $0x18c] ss:$16 sps:$4 sm:$0xff]   ;;  %v5403_v12 = vld [vmem:[%s8361_s5 + $0x188] ss:$16 sps:$4 sm:$0xff]  }
 0x11c   : > { %1036 = vmatprep.subr.bf16.mxu1 %v5324_v14  ;;  %v5411_v14 = vld [vmem:[%s8361_s5 + $0x1ac] ss:$16 sps:$4 sm:$0xff]   ;;  %v5406_v15 = vld [vmem:[%s8361_s5 + $0x1a0] ss:$16 sps:$4 sm:$0xff]   ;;  %v5409_v16 = vld [vmem:[%s8361_s5 + $0x1a8] ss:$16 sps:$4 sm:$0xff]  }
 0x11d   : > { %4695 = vmatmul.mubr.msk.bf16.gmra.mrb[4].mxu1 %vm420_vm0, %v556_v18  ;;  %4697 = vmatmul.mubr.msk.bf16.vlgmr.msra.gmra.mrb[12].mxu0 %vm420_vm0, %v6420_v0 }
 0x11e   : > { %806 = vmatprep.mubr.bf16.mxu1 %v6256_v10  ;;  %859 = vmatprep.mubr.bf16.mxu0 %v6256_v10 }
 0x11f   : > { %964 = vmatpush1.bf16.msra.mxu0 %v5316_v19  ;;  %v5417_v19 = vld [vmem:[%s8361_s5 + $0x1cc] ss:$16 sps:$4 sm:$0xff]  }
 0x120   : > { %965 = vmatprep.subr.bf16.mxu0 %v5321_v20  ;;  %v5412_v20 = vld [vmem:[%s8361_s5 + $0x1c0] ss:$16 sps:$4 sm:$0xff]  }
 0x123   : > { %966 = vmatpush1.bf16.msra.mxu0 %v5319_v21  ;;  %v5415_v21 = vld [vmem:[%s8361_s5 + $0x1c8] ss:$16 sps:$4 sm:$0xff]  }
 0x124   : > { %3762 = vmatprep.subr.bf16.mxu0 %v5330_v25 }
 0x125   : > { %4696 = vmatmul.mubr.msk.bf16.gmra.mrb[8].mxu1 %vm420_vm0, %v557_v17  ;;  %4698 = vmatmul.mubr.msk.bf16.gmra.mrb[16].mxu0 %vm420_vm0, %v6415_v62 }
 0x126   : > { %869 = vmatprep.mubr.bf16.mxu0 %v6256_v10  ;;  %922 = vmatprep.mubr.bf16.mxu1 %v6256_v10 }
 0x12d   : > { %4699 = vmatmul.mubr.msk.bf16.gmra.mrb[20].mxu0 %vm420_vm0, %v556_v18  ;;  %4701 = vmatmul.mubr.msk.bf16.vlgmr.msra.gmra.mrb[12].mxu1 %vm420_vm0, %v6420_v0 }
 0x12e   : > { %879 = vmatprep.mubr.bf16.mxu0 %v6256_v10  ;;  %932 = vmatprep.mubr.bf16.mxu1 %v6256_v10 }
 0x12f   : > { %1037 = vmatpush1.bf16.msra.mxu1 %v5322_v22 }
 0x130   : > { %1038 = vmatprep.subr.bf16.mxu1 %v5327_v23 }
 0x133   : > { %1039 = vmatpush1.bf16.msra.mxu1 %v5325_v24  ;;  %v6702_v24 = vld [vmem:[%s8360_s4] sm:$0xff] }
 0x134   : > { %3967 = vmatprep.subr.bf16.mxu1 %v5333_v26 }
 0x135   : > { %4700 = vmatmul.mubr.msk.bf16.gmra.mrb[24].mxu0 %vm420_vm0, %v557_v17  ;;  %4702 = vmatmul.mubr.msk.bf16.gmra.mrb[16].mxu1 %vm420_vm0, %v6415_v62 }
 0x136   : > { %942 = vmatprep.mubr.bf16.mxu1 %v6256_v10  ;;  %995 = vmatprep.mubr.bf16.mxu0 %v6256_v10 }
 0x13d   : > { %4703 = vmatmul.mubr.msk.bf16.gmra.mrb[20].mxu1 %vm420_vm0, %v556_v18  ;;  %4705 = vmatmul.mubr.msk.bf16.vlgmr.msra.gmra.mrb[28].mxu0 %vm420_vm0, %v6420_v0 }
 0x13e   : > { %952 = vmatprep.mubr.bf16.mxu1 %v6256_v10  ;;  %1005 = vmatprep.mubr.bf16.mxu0 %v6256_v10 }
 0x13f   : > { %3763 = vmatpush1.bf16.msra.mxu0 %v5328_v27 }
 0x145   : > { %4704 = vmatmul.mubr.msk.bf16.gmra.mrb[24].mxu1 %vm420_vm0, %v557_v17  ;;  %4706 = vmatmul.mubr.msk.bf16.gmra.mrb[32].mxu0 %vm420_vm0, %v6415_v62 }
 0x146   : > { %1015 = vmatprep.mubr.bf16.mxu0 %v6256_v10  ;;  %1068 = vmatprep.mubr.bf16.mxu1 %v6256_v10 }
 0x14d   : > { %4707 = vmatmul.mubr.msk.bf16.gmra.mrb[36].mxu0 %vm420_vm0, %v556_v18  ;;  %4709 = vmatmul.mubr.msk.bf16.vlgmr.msra.gmra.mrb[28].mxu1 %vm420_vm0, %v6420_v0  ;;  %v5390_v0 = vld [vmem:[%s8361_s5 + $0x144] ss:$16 sps:$4 sm:$0xff]  }
 0x14e   : > { %1025 = vmatprep.mubr.bf16.mxu0 %v6256_v10  ;;  %1078 = vmatprep.mubr.bf16.mxu1 %v6256_v10 }
 0x14f   : > { %3968 = vmatpush1.bf16.msra.mxu1 %v5331_v28 }
 0x150   : > { %3969 = vmatprep.subr.bf16.mxu1 %v5339_v29  ;;  %v5423_v29 = vld [vmem:[%s8361_s5 + $0x1ec] ss:$16 sps:$4 sm:$0xff]  }
 0x153   : > { %3970 = vmatpush1.bf16.msra.mxu1 %v5337_v31 }
 0x154   : > { %3971 = vmatprep.subr.bf16.mxu1 %v5345_v33  ;;  %v5418_v33 = vld [vmem:[%s8361_s5 + $0x1e0] ss:$16 sps:$4 sm:$0xff]  }
 0x155   : > { %4708 = vmatmul.mubr.msk.bf16.gmra.mrb[40].mxu0 %vm420_vm0, %v557_v17  ;;  %4710 = vmatmul.mubr.msk.bf16.gmra.mrb[32].mxu1 %vm420_vm0, %v6415_v62  ;;  %v5382_v62 = vld [vmem:[%s8361_s5 + $0x120] ss:$16 sps:$4 sm:$0xff]  }
 0x156   : > { %1088 = vmatprep.mubr.bf16.mxu1 %v6256_v10 }
 0x157   : > { %3972 = vmatpush1.bf16.msra.mxu1 %v5343_v35 }
 0x158   : > { %3973 = vmatprep.subr.bf16.mxu1 %v5351_v37 }
 0x15b   : > { %3974 = vmatpush1.bf16.msra.mxu1 %v5349_v39 }
 0x15c   : > { %3975 = vmatprep.subr.bf16.mxu1 %v5357_v41 }
 0x15d   : > { %4711 = vmatmul.mubr.msk.bf16.gmra.mrb[36].mxu1 %vm420_vm0, %v556_v18  ;;  %v5414_v18 = vld [vmem:[%s8361_s5 + $0x1c4] ss:$16 sps:$4 sm:$0xff]  }
 0x15e   : > { %1098 = vmatprep.mubr.bf16.mxu1 %v6256_v10  ;;  %v5336_v10 = vld [vmem:[%s8361_s5 + $0x24] ss:$16 sps:$4 sm:$0xff]  }
 0x15f   : > { %3764 = vmatprep.subr.bf16.mxu0 %v5336_v10  ;;  %3976 = vmatpush1.bf16.msra.mxu1 %v5355_v43  ;;  %v5420_v10 = vld [vmem:[%s8361_s5 + $0x1e4] ss:$16 sps:$4 sm:$0xff]  }
 0x160   : > { %3765 = vmatpush1.bf16.msra.mxu0 %v5334_v30  ;;  %3977 = vmatprep.subr.bf16.mxu1 %v5363_v45 }
 0x161   : > { %3766 = vmatprep.subr.bf16.mxu0 %v5342_v32 }
 0x163   : > { %3978 = vmatpush1.bf16.msra.mxu1 %v5361_v47 }
 0x164   : > { %3767 = vmatpush1.bf16.msra.mxu0 %v5340_v34  ;;  %3979 = vmatprep.subr.bf16.mxu1 %v5369_v49  ;;  %v5421_v34 = vld [vmem:[%s8361_s5 + $0x1e8] ss:$16 sps:$4 sm:$0xff]  }
 0x165   : > { %4712 = vmatmul.mubr.msk.bf16.gmra.mrb[40].mxu1 %vm420_vm0, %v557_v17  ;;  %3768 = vmatprep.subr.bf16.mxu0 %v5348_v36  ;;  %v8367_v17 = vlaneseq }
 0x167   : > { %3980 = vmatpush1.bf16.msra.mxu1 %v5367_v51  ;;  %v6694_v22 = vshrl.u32 %v8367_v17, 7 }
 0x168   : > { %3769 = vmatpush1.bf16.msra.mxu0 %v5346_v38  ;;  %3981 = vmatprep.subr.bf16.mxu1 %v5375_v53 }
 0x169   : > { %3770 = vmatprep.subr.bf16.mxu0 %v5354_v40  ;;  %8386 = vst [vmem:[#allocation5_spill] sm:$0xff] %v6694_v22  ;;  %v6697_v23 = vsub.s32 0, %v6694_v22  ;;  %v6705_v25 = vsub.s32 1, %v6694_v22  ;;  %v8369_v39 = vsub.s32 2, %v6694_v22  ;;  %v8368_v45 = vsub.s32 3, %v6694_v22 }
 0x16b   : > { %3982 = vmatpush1.bf16.msra.mxu1 %v5373_v55  ;;  %8387 = vst [vmem:[#allocation6_spill] sm:$0xff] %v6697_v23  ;;  %8388 = vst [vmem:[#allocation7_spill] sm:$0xff] %v6705_v25  ;;  %v6709_v26 = vrot.slane %v6702_v24, %v6697_v23  ;;  %v6713_v27 = vrot.slane %v6702_v24, %v6705_v25  ;;  %v6762_v55 = vrot.slane %v6702_v24, %v8369_v39 }
 0x16c   : > { %3771 = vmatpush1.bf16.msra.mxu0 %v5352_v42  ;;  %3983 = vmatprep.subr.bf16.mxu1 %v5381_v57  ;;  %v6768_v57 = vrot.slane %v6702_v24, %v8368_v45 }
 0x16d   : > { %3772 = vmatprep.subr.bf16.mxu0 %v5360_v44 }
 0x16f   : > { %3984 = vmatpush1.bf16.msra.mxu1 %v5379_v59 }
 0x170   : > { %3773 = vmatpush1.bf16.msra.mxu0 %v5358_v46  ;;  %3985 = vmatprep.subr.bf16.mxu1 %v5387_v61 }
 0x171   : > { %3774 = vmatprep.subr.bf16.mxu0 %v5366_v48 }
 0x173   : > { %3986 = vmatpush1.bf16.msra.mxu1 %v5385_v63 }
 0x174   : > { %3775 = vmatpush1.bf16.msra.mxu0 %v5364_v50  ;;  %3987 = vmatprep.subr.bf16.mxu1 %v5393_v1  ;;  %v5426_v1 = vld [vmem:[%s8361_s5 + $0x204] ss:$16 sps:$4 sm:$0xff]  }
 0x175   : > { %3776 = vmatprep.subr.bf16.mxu0 %v5372_v52 }
 0x177   : > { %3988 = vmatpush1.bf16.msra.mxu1 %v5391_v3 }
 0x178   : > { %3777 = vmatpush1.bf16.msra.mxu0 %v5370_v54  ;;  %3989 = vmatprep.subr.bf16.mxu1 %v5399_v5 }
 0x179   : > { %3778 = vmatprep.subr.bf16.mxu0 %v5378_v56 }
 0x17b   : > { %3990 = vmatpush1.bf16.msra.mxu1 %v5397_v7 }
 0x17c   : > { %3779 = vmatpush1.bf16.msra.mxu0 %v5376_v58  ;;  %3991 = vmatprep.subr.bf16.mxu1 %v5405_v9 }
 0x17d   : > { %3780 = vmatprep.subr.bf16.mxu0 %v5384_v60 }
 0x17f   : > { %3992 = vmatpush1.bf16.msra.mxu1 %v5403_v12 }
 0x180   : > { %3781 = vmatpush1.bf16.msra.mxu0 %v5382_v62  ;;  %3993 = vmatprep.subr.bf16.mxu1 %v5411_v14 }
 0x181   : > { %3782 = vmatprep.subr.bf16.mxu0 %v5390_v0 }
 0x183   : > { %3994 = vmatpush1.bf16.msra.mxu1 %v5409_v16 }
 0x184   : > { %3783 = vmatpush1.bf16.msra.mxu0 %v5388_v2  ;;  %3995 = vmatprep.subr.bf16.mxu1 %v5417_v19  ;;  %v5429_v2 = vld [vmem:[%s8361_s5 + $0x20c] ss:$16 sps:$4 sm:$0xff]  }
 0x185   : > { %3784 = vmatprep.subr.bf16.mxu0 %v5396_v4 }
 0x187   : > { %3996 = vmatpush1.bf16.msra.mxu1 %v5415_v21 }
 0x188   : > { %3785 = vmatpush1.bf16.msra.mxu0 %v5394_v6  ;;  %3997 = vmatprep.subr.bf16.mxu1 %v5423_v29 }
 0x189   : > { %3786 = vmatprep.subr.bf16.mxu0 %v5402_v8 }
 0x18b   : > { %3998 = vmatpush1.bf16.msra.mxu1 %v5421_v34 }
 0x18c   : > { %3787 = vmatpush1.bf16.msra.mxu0 %v5400_v11  ;;  %4008 = vmatprep.subr.bf16.mxu1 %v5429_v2 }
 0x18d   : > { %3788 = vmatprep.subr.bf16.mxu0 %v5408_v13 }
 0x190   : > { %3789 = vmatpush1.bf16.msra.mxu0 %v5406_v15 }
 0x191   : > { %3790 = vmatprep.subr.bf16.mxu0 %v5414_v18 }
 0x194   : > { %3791 = vmatpush1.bf16.msra.mxu0 %v5412_v20 }
 0x195   : > { %3792 = vmatprep.subr.bf16.mxu0 %v5420_v10 }
 0x198   : > { %3793 = vmatpush1.bf16.msra.mxu0 %v5418_v33 }
 0x199   : > { %3803 = vmatprep.subr.bf16.mxu0 %v5426_v1 }
 0x1e7   : > { %v788_v28 = vpop.f32.mrb[0].mxu1 }
 0x1e8   : > { %v6722_v30 = vadd.f32 %v788_v28, %v6709_v26  ;;  %v778_v31 = vpop.f32.mrb[8].mxu0  ;;  %v790_v32 = vpop.f32.mrb[1].mxu1 }
 0x1e9   : > { %v6731_v35 = vadd.f32 %v778_v31, %v6709_v26  ;;  %v6734_v36 = vadd.f32 %v790_v32, %v6713_v27  ;;  %v780_v37 = vpop.f32.mrb[9].mxu0  ;;  %v792_v38 = vpop.f32.mrb[2].mxu1 }
 0x1ea   : > { %v4733_v40 = vmul.f32 -1.442695, %v6722_v30  ;;  %v6739_v41 = vadd.f32 %v780_v37, %v6713_v27  ;;  %v6742_v42 = vadd.f32 %v792_v38, %v6709_v26  ;;  %v782_v43 = vpop.f32.mrb[10].mxu0  ;;  %v794_v44 = vpop.f32.mrb[3].mxu1 }
 0x1eb   : > { %v4713_v46 = vmul.f32 -1.442695, %v6731_v35  ;;  %v4734_v47 = vmul.f32 -1.442695, %v6734_v36  ;;  %v6748_v48 = vadd.f32 %v782_v43, %v6709_v26  ;;  %v6751_v49 = vadd.f32 %v794_v44, %v6713_v27  ;;  %v784_v50 = vpop.f32.mrb[11].mxu0 }
 0x1ec   : > { %5872 = vpow2.f32 %v4733_v40  ;;  %v4714_v51 = vmul.f32 -1.442695, %v6739_v41  ;;  %v4743_v52 = vmul.f32 -1.442695, %v6742_v42  ;;  %v6756_v53 = vadd.f32 %v784_v50, %v6713_v27 }
 0x1ed   : > { %5874 = vpow2.f32 %v4713_v46  ;;  %v4723_v54 = vmul.f32 -1.442695, %v6748_v48  ;;  %v4744_v56 = vmul.f32 -1.442695, %v6751_v49 }
 0x1ee   : > { %5876 = vpow2.f32 %v4734_v47  ;;  %v4724_v58 = vmul.f32 -1.442695, %v6756_v53 }
 0x1ef   : > { %5878 = vpow2.f32 %v4714_v51 }
 0x1f0   : > { %5880 = vpow2.f32 %v4743_v52  ;;  %v798_v59 = vpop.f32.mrb[4].mxu1  ;;  %v851_v60 = vpop.f32.mrb[12].mxu0 }
 0x1f1   : > { %5882 = vpow2.f32 %v4723_v54  ;;  %v6772_v61 = vadd.f32 %v798_v59, %v6709_v26  ;;  %v6775_v62 = vadd.f32 %v851_v60, %v6762_v55  ;;  %v800_v63 = vpop.f32.mrb[5].mxu1  ;;  %v853_v0 = vpop.f32.mrb[13].mxu0 }
 0x1f2   : > { %5884 = vpow2.f32 %v4744_v56  ;;  %v6784_v3 = vadd.f32 %v800_v63, %v6713_v27  ;;  %v6787_v4 = vadd.f32 %v853_v0, %v6768_v57  ;;  %v802_v5 = vpop.f32.mrb[6].mxu1  ;;  %v855_v6 = vpop.f32.mrb[14].mxu0 }
 0x1f3   : > { %5886 = vpow2.f32 %v4724_v58  ;;  %v4753_v7 = vmul.f32 -1.442695, %v6772_v61  ;;  %v4715_v8 = vmul.f32 -1.442695, %v6775_v62  ;;  %v804_v9 = vpop.f32.mrb[7].mxu1  ;;  %v857_v11 = vpop.f32.mrb[15].mxu0  ;;  %v6794_v29 = vadd.f32 %v802_v5, %v6709_v26 }
 0x1f4   : > { %v4754_v12 = vmul.f32 -1.442695, %v6784_v3  ;;  %v4716_v13 = vmul.f32 -1.442695, %v6787_v4  ;;  %v6798_v56 = vadd.f32 %v855_v6, %v6762_v55  ;;  %v6801_v59 = vadd.f32 %v804_v9, %v6713_v27 }
 0x1f5   : > { %5888 = vpow2.f32 %v4753_v7  ;;  %v4763_v54 = vmul.f32 -1.442695, %v6794_v29  ;;  %v6804_v1 = vadd.f32 %v857_v11, %v6768_v57  ;;  %v600_v5 = vsub.s32 4, %v6694_v22 }
 0x1f6   : > { %v5873_v14 = vpop.eup %5872  ;;  %5890 = vpow2.f32 %v4715_v8  ;;  %v4725_v6 = vmul.f32 -1.442695, %v6798_v56  ;;  %v4764_v11 = vmul.f32 -1.442695, %v6801_v59 }
 0x1f7   : > { %v5875_v15 = vpop.eup %5874  ;;  %v1369_v16 = vadd.f32 1.0, %v5873_v14  ;;  %5892 = vpow2.f32 %v4754_v12 }
 0x1f8   : > { %v5877_v18 = vpop.eup %5876  ;;  %v1349_v19 = vadd.f32 1.0, %v5875_v15  ;;  %5894 = vpow2.f32 %v4716_v13  ;;  %v808_v20 = vpop.f32.mrb[8].mxu1 }
 0x1f9   : > { %v861_v21 = vpop.f32.mrb[16].mxu0  ;;  %v5879_v28 = vpop.eup %5878  ;;  %5896 = vrcp.f32 %v1369_v16  ;;  %v1370_v10 = vadd.f32 1.0, %v5877_v18  ;;  %v6809_v12 = vadd.f32 %v808_v20, %v6709_v26 }
 0x1fa   : > { %v810_v31 = vpop.f32.mrb[9].mxu1  ;;  %v863_v32 = vpop.f32.mrb[17].mxu0  ;;  %5898 = vrcp.f32 %v1349_v19  ;;  %v1350_v34 = vadd.f32 1.0, %v5879_v28  ;;  %v6817_v16 = vadd.f32 %v861_v21, %v6762_v55  ;;  %v4726_v21 = vmul.f32 -1.442695, %v6804_v1 }
 0x1fb   : > { %v5881_v33 = vpop.eup %5880  ;;  %v812_v37 = vpop.f32.mrb[10].mxu1  ;;  %5900 = vrcp.f32 %v1370_v10  ;;  %v6824_v10 = vadd.f32 %v810_v31, %v6713_v27 }
 0x1fc   : > { %v865_v38 = vpop.f32.mrb[18].mxu0  ;;  %v5883_v40 = vpop.eup %5882  ;;  %v1379_v43 = vadd.f32 1.0, %v5881_v33  ;;  %5902 = vrcp.f32 %v1350_v34  ;;  %v6827_v33 = vadd.f32 %v863_v32, %v6768_v57  ;;  %v4773_v32 = vmul.f32 -1.442695, %v6809_v12 }
 0x1fd   : > { %v814_v44 = vpop.f32.mrb[11].mxu1  ;;  %v5885_v46 = vpop.eup %5884  ;;  %v1359_v47 = vadd.f32 1.0, %v5883_v40 }
 0x1fe   : > { %v867_v50 = vpop.f32.mrb[19].mxu0  ;;  %v5887_v51 = vpop.eup %5886  ;;  %5904 = vrcp.f32 %v1379_v43  ;;  %v1380_v52 = vadd.f32 1.0, %v5885_v46  ;;  %v6835_v46 = vadd.f32 %v812_v37, %v6709_v26  ;;  %v4774_v37 = vmul.f32 -1.442695, %v6824_v10 }
 0x1ff   : > { %5906 = vrcp.f32 %v1359_v47  ;;  %v1360_v58 = vadd.f32 1.0, %v5887_v51  ;;  %v5889_v60 = vpop.eup %5888  ;;  %v6838_v47 = vadd.f32 %v865_v38, %v6762_v55  ;;  %v4736_v38 = vmul.f32 -1.442695, %v6827_v33 }
 0x200   : > { %5908 = vrcp.f32 %v1380_v52  ;;  %v5891_v63 = vpop.eup %5890  ;;  %v1389_v0 = vadd.f32 1.0, %v5889_v60  ;;  %v871_v2 = vpop.f32.mrb[20].mxu0  ;;  %v6844_v52 = vadd.f32 %v814_v44, %v6713_v27  ;;  %v6848_v60 = vadd.f32 %v867_v50, %v6768_v57 }
 0x201   : > { %5910 = vrcp.f32 %v1360_v58  ;;  %v5893_v7 = vpop.eup %5892  ;;  %v1351_v8 = vadd.f32 1.0, %v5891_v63  ;;  %v6811_v9 = vpop.f32.mrb[12].mxu1  ;;  %8389 = vst [vmem:[#allocation8_spill] sm:$0xff] %v6838_v47  ;;  %v4735_v58 = vmul.f32 -1.442695, %v6817_v16  ;;  %v6855_v44 = vrot.slane %v6702_v24, %v600_v5 }
 0x202   : > { %5912 = vpow2.f32 %v4763_v54  ;;  %v6813_v13 = vpop.f32.mrb[21].mxu0  ;;  %v5895_v14 = vpop.eup %5894  ;;  %v1390_v15 = vadd.f32 1.0, %v5893_v7  ;;  %8390 = vst [vmem:[#allocation9_spill] sm:$0xff] %v6844_v52  ;;  %8391 = vst [vmem:[#allocation10_spill] sm:$0xff] %v6848_v60  ;;  %v4745_v27 = vmul.f32 -1.442695, %v6838_v47  ;;  %v6871_v45 = vadd.f32 %v871_v2, %v6762_v55 }
 0x203   : > { %5914 = vrcp.f32 %v1389_v0  ;;  %v6819_v18 = vpop.f32.mrb[13].mxu1  ;;  %v6821_v19 = vpop.f32.mrb[22].mxu0  ;;  %v1352_v20 = vadd.f32 1.0, %v5895_v14  ;;  %v4783_v0 = vmul.f32 -1.442695, %v6835_v46 }
 0x204   : > { %v5897_v28 = vpop.eup %5896  ;;  %5916 = vrcp.f32 %v1351_v8  ;;  %v6829_v34 = vpop.f32.mrb[14].mxu1  ;;  %v4746_v17 = vmul.f32 -1.442695, %v6848_v60 }
 0x205   : > { %v6831_v40 = vpop.f32.mrb[23].mxu0  ;;  %v5899_v43 = vpop.eup %5898  ;;  %5918 = vrcp.f32 %v1390_v15  ;;  %v4784_v15 = vmul.f32 -1.442695, %v6844_v52  ;;  %v1609_v5 = vmul.f32 %v5897_v28, %v6722_v30 }
 0x206   : > { %v6840_v51 = vpop.f32.mrb[15].mxu1  ;;  %v5901_v31 = vpop.eup %5900  ;;  %5920 = vrcp.f32 %v1352_v20 }
 0x207   : > { %v5903_v54 = vpop.eup %5902  ;;  %5922 = vpow2.f32 %v4725_v6  ;;  %v1589_v6 = vmul.f32 %v5899_v43, %v6731_v35 }
 0x208   : > { %v5905_v26 = vpop.eup %5904  ;;  %5924 = vpow2.f32 %v4764_v11  ;;  %v6857_v7 = vpop.f32.mrb[24].mxu0  ;;  %v1590_v43 = vmul.f32 %v5903_v54, %v6739_v41 }
 0x209   : > { %v5907_v63 = vpop.eup %5906  ;;  %5926 = vpow2.f32 %v4726_v21  ;;  %v6859_v8 = vpop.f32.mrb[16].mxu1  ;;  %v1619_v2 = vmul.f32 %v5905_v26, %v6742_v42 }
 0x20a   : > { %v5909_v50 = vpop.eup %5908  ;;  %v1599_v14 = vmul.f32 %v5907_v63, %v6748_v48  ;;  %5928 = vpow2.f32 %v4773_v32  ;;  %v6864_v11 = vpop.f32.mrb[25].mxu0 }
 0x20b   : > { %v6866_v20 = vpop.f32.mrb[17].mxu1  ;;  %v5911_v21 = vpop.eup %5910  ;;  %5930 = vpow2.f32 %v4735_v58  ;;  %v1610_v58 = vmul.f32 %v5901_v31, %v6734_v36  ;;  %v1620_v54 = vmul.f32 %v5909_v50, %v6751_v49 }
 0x20c   : > { %v6873_v39 = vpop.f32.mrb[26].mxu0  ;;  %v6875_v35 = vpop.f32.mrb[18].mxu1  ;;  %v1669_v32 = vadd.f32 %v1599_v14, %v1589_v6  ;;  %v1600_v63 = vmul.f32 %v5911_v21, %v6756_v53  ;;  %5932 = vpow2.f32 %v4774_v37  ;;  %v4755_v37 = vmul.f32 -1.442695, %v6871_v45 }
 0x20d   : > { %v5913_v48 = vpop.eup %5912  ;;  %v6879_v25 = vpop.f32.mrb[27].mxu0  ;;  %5934 = vpow2.f32 %v4736_v38  ;;  %v604_v6 = vsub.s32 5, %v6694_v22 }
 0x20e   : > { %v6881_v30 = vpop.f32.mrb[19].mxu1  ;;  %v5915_v28 = vpop.eup %5914  ;;  %v1399_v23 = vadd.f32 1.0, %v5913_v48  ;;  %v1670_v52 = vadd.f32 %v1669_v32, %v1609_v5  ;;  %v1682_v47 = vadd.f32 %v1600_v63, %v1590_v43  ;;  %5936 = vpow2.f32 %v4783_v0 }
 0x20f   : > { %v6885_v60 = vpop.eup %5916  ;;  %v1629_v41 = vmul.f32 %v5915_v28, %v6772_v61 }
 0x210   : > { %v5919_v53 = vpop.eup %5918  ;;  %5938 = vrcp.f32 %v1399_v23  ;;  %v1683_v42 = vadd.f32 %v1682_v47, %v1610_v58  ;;  %v1671_v31 = vadd.f32 %v1670_v52, %v1619_v2  ;;  %v6894_v14 = vpop.f32.mrb[20].mxu1 }
 0x211   : > { %v6891_v36 = vpop.eup %5920  ;;  %v1630_v26 = vmul.f32 %v5919_v53, %v6784_v3  ;;  %5940 = vpow2.f32 %v4745_v27  ;;  %v6896_v61 = vpop.f32.mrb[28].mxu0  ;;  %v6903_v3 = vrot.slane %v6702_v24, %v604_v6 }
 0x212   : > { %v5923_v38 = vpop.eup %5922  ;;  %5942 = vpow2.f32 %v4784_v15  ;;  %v1672_v49 = vadd.f32 %v1671_v31, %v1629_v41  ;;  %v1684_v23 = vadd.f32 %v1683_v42, %v1620_v54  ;;  %v6898_v21 = vpop.f32.mrb[21].mxu1  ;;  %v6921_v54 = vadd.f32 %v6813_v13, %v6768_v57 }
 0x213   : > { %v5925_v0 = vpop.eup %5924  ;;  %v1361_v50 = vadd.f32 1.0, %v5923_v38  ;;  %5944 = vpow2.f32 %v4746_v17  ;;  %v6900_v5 = vpop.f32.mrb[29].mxu0  ;;  %v6913_v17 = vadd.f32 %v6811_v9, %v6855_v44  ;;  %v6925_v9 = vadd.f32 %v6819_v18, %v6903_v3 }
 0x214   : > { %v5927_v47 = vpop.eup %5926  ;;  %v1400_v52 = vadd.f32 1.0, %v5925_v0  ;;  %5946 = vpow2.f32 %v4755_v37  ;;  %v6905_v27 = vpop.f32.mrb[22].mxu1  ;;  %v6909_v43 = vadd.f32 %v1684_v23, %v1630_v26  ;;  %v6931_v13 = vadd.f32 %v6821_v19, %v6762_v55 }
 0x215   : > { %v6907_v15 = vpop.f32.mrb[30].mxu0  ;;  %v5929_v48 = vpop.eup %5928  ;;  %5948 = vrcp.f32 %v1361_v50  ;;  %v1362_v32 = vadd.f32 1.0, %v5927_v47  ;;  %8392 = vst [vmem:[#allocation11_spill] sm:$0xff] %v6925_v9  ;;  %v4717_v26 = vmul.f32 -1.442695, %v6913_v17  ;;  %v6935_v50 = vadd.f32 %v6829_v34, %v6855_v44 }
 0x216   : > { %v6915_v63 = vpop.f32.mrb[23].mxu1  ;;  %v6917_v28 = vpop.f32.mrb[31].mxu0  ;;  %5950 = vrcp.f32 %v1400_v52  ;;  %v1409_v2 = vadd.f32 1.0, %v5929_v48  ;;  %v4756_v48 = vmul.f32 -1.442695, %v6921_v54 }
 0x217   : > { %v5931_v58 = vpop.eup %5930  ;;  %5952 = vrcp.f32 %v1362_v32  ;;  %v6943_v32 = vadd.f32 %v6831_v40, %v6768_v57  ;;  %v4765_v38 = vmul.f32 -1.442695, %v6931_v13 }
 0x218   : > { %v5933_v41 = vpop.eup %5932  ;;  %v1371_v53 = vadd.f32 1.0, %v5931_v58  ;;  %5954 = vrcp.f32 %v1409_v2  ;;  %v6937_v18 = vpop.f32.mrb[24].mxu1 }
 0x219   : > { %v5935_v37 = vpop.eup %5934  ;;  %v1410_v6 = vadd.f32 1.0, %v5933_v41  ;;  %v6945_v58 = vpop.f32.mrb[32].mxu0  ;;  %v4718_v41 = vmul.f32 -1.442695, %v6925_v9  ;;  %v1592_v9 = vmul.f32 %v6891_v36, %v6787_v4 }
 0x21a   : > { %v5937_v42 = vpop.eup %5936  ;;  %5956 = vrcp.f32 %v1371_v53  ;;  %v1372_v31 = vadd.f32 1.0, %v5935_v37  ;;  %v6947_v19 = vpop.f32.mrb[25].mxu1  ;;  %v6952_v53 = vadd.f32 %v6840_v51, %v6903_v3 }
 0x21b   : > { %v5939_v0 = vpop.eup %5938  ;;  %5958 = vrcp.f32 %v1410_v6  ;;  %v1419_v23 = vadd.f32 1.0, %v5937_v42  ;;  %v6956_v37 = vpop.f32.mrb[26].mxu1 }
 0x21c   : > { %v5941_v47 = vpop.eup %5940  ;;  %v1639_v52 = vmul.f32 %v5939_v0, %v6794_v29  ;;  %5960 = vrcp.f32 %v1372_v31  ;;  %v6954_v29 = vpop.f32.mrb[33].mxu0  ;;  %8394 = vst [vmem:[#allocation13_spill] sm:$0xff] %v6956_v37  ;;  %v6960_v31 = vadd.f32 %v6857_v7, %v6762_v55  ;;  %v6973_v7 = vadd.f32 %v6859_v8, %v6855_v44 }
 0x21d   : > { %v5943_v2 = vpop.eup %5942  ;;  %5962 = vrcp.f32 %v1419_v23  ;;  %v1381_v34 = vadd.f32 1.0, %v5941_v47  ;;  %8393 = vst [vmem:[#allocation12_spill] sm:$0xff] %v6954_v29  ;;  %v6962_v0 = vpop.f32.mrb[34].mxu0  ;;  %v4727_v29 = vmul.f32 -1.442695, %v6935_v50 }
 0x21e   : > { %v5945_v6 = vpop.eup %5944  ;;  %v1673_v40 = vadd.f32 %v1672_v49, %v1639_v52  ;;  %v1420_v42 = vadd.f32 1.0, %v5943_v2  ;;  %5964 = vpow2.f32 %v4717_v26  ;;  %8395 = vst [vmem:[#allocation14_spill] sm:$0xff] %v6960_v31  ;;  %8396 = vst [vmem:[#allocation15_spill] sm:$0xff] %v6962_v0  ;;  %v6964_v23 = vpop.f32.mrb[27].mxu1  ;;  %v4766_v52 = vmul.f32 -1.442695, %v6943_v32 }
 0x21f   : > { %8397 = vst [vmem:[#allocation16_spill] sm:$0xff] %v6964_v23  ;;  %v5947_v47 = vpop.eup %5946  ;;  %5966 = vrcp.f32 %v1381_v34  ;;  %v1382_v51 = vadd.f32 1.0, %v5945_v6  ;;  %v6968_v37 = vpop.f32.mrb[35].mxu0  ;;  %v1591_v34 = vmul.f32 %v6885_v60, %v6775_v62  ;;  %v4728_v23 = vmul.f32 -1.442695, %v6952_v53 }
 0x220   : > { %8398 = vst [vmem:[#allocation17_spill] sm:$0xff] %v6968_v37  ;;  %v5949_v49 = vpop.eup %5948  ;;  %5968 = vrcp.f32 %v1420_v42  ;;  %v1391_v26 = vadd.f32 1.0, %v5947_v47  ;;  %v4775_v42 = vmul.f32 -1.442695, %v6960_v31  ;;  %v6983_v47 = vadd.f32 %v6864_v11, %v6768_v57  ;;  %v6988_v60 = vpop.f32.mrb[36].mxu0 }
 0x221   : > { %v5951_v2 = vpop.eup %5950  ;;  %v1601_v6 = vmul.f32 %v5949_v49, %v6798_v56  ;;  %5970 = vrcp.f32 %v1382_v51  ;;  %v6990_v51 = vpop.f32.mrb[28].mxu1  ;;  %v4737_v11 = vmul.f32 -1.442695, %v6973_v7 }
 0x222   : > { %v5953_v0 = vpop.eup %5952  ;;  %v1640_v37 = vmul.f32 %v5951_v2, %v6801_v59  ;;  %5972 = vrcp.f32 %v1391_v26  ;;  %v6995_v2 = vpop.f32.mrb[37].mxu0 }
 0x223   : > { %v5955_v8 = vpop.eup %5954  ;;  %v1695_v62 = vadd.f32 %v1601_v6, %v1591_v34  ;;  %v1602_v56 = vmul.f32 %v5953_v0, %v6804_v1  ;;  %5974 = vpow2.f32 %v4756_v48  ;;  %v6997_v31 = vpop.f32.mrb[29].mxu1  ;;  %v7002_v48 = vadd.f32 %v6866_v20, %v6903_v3 }
 0x224   : > { %v5957_v59 = vpop.eup %5956  ;;  %v1686_v49 = vadd.f32 %v6909_v43, %v1640_v37  ;;  %v1649_v26 = vmul.f32 %v5955_v8, %v6809_v12  ;;  %5976 = vpow2.f32 %v4718_v41  ;;  %v7004_v0 = vpop.f32.mrb[38].mxu0  ;;  %v7011_v34 = vadd.f32 %v6873_v39, %v6762_v55 }
 0x225   : > { %v5959_v4 = vpop.eup %5958  ;;  %v1708_v36 = vadd.f32 %v1602_v56, %v1592_v9  ;;  %v1611_v1 = vmul.f32 %v5957_v59, %v6817_v16  ;;  %5978 = vpow2.f32 %v4765_v38  ;;  %v7006_v43 = vpop.f32.mrb[30].mxu1  ;;  %v7020_v8 = vadd.f32 %v6875_v35, %v6855_v44 }
 0x226   : > { %v5961_v12 = vpop.eup %5960  ;;  %v1674_v41 = vadd.f32 %v1673_v40, %v1649_v26  ;;  %v1650_v37 = vmul.f32 %v5959_v4, %v6824_v10  ;;  %5980 = vpow2.f32 %v4727_v29  ;;  %v7013_v9 = vpop.f32.mrb[39].mxu0  ;;  %v4776_v39 = vmul.f32 -1.442695, %v6983_v47 }
 0x227   : > { %v7015_v16 = vpop.f32.mrb[31].mxu1  ;;  %v5963_v38 = vpop.eup %5962  ;;  %v1696_v20 = vadd.f32 %v1695_v62, %v1611_v1  ;;  %v1612_v6 = vmul.f32 %v5961_v12, %v6827_v33  ;;  %5982 = vpow2.f32 %v4766_v52  ;;  %v4738_v62 = vmul.f32 -1.442695, %v7002_v48  ;;  %v8399_v52 = vld [vmem:[#allocation8_spill] sm:$0xff]  ;;  %v8400_v1 = vld [vmem:[#allocation9_spill] sm:$0xff] }
 0x228   : > { %v5965_v40 = vpop.eup %5964  ;;  %v1687_v10 = vadd.f32 %v1686_v49, %v1650_v37  ;;  %v1659_v29 = vmul.f32 %v5963_v38, %v6835_v46  ;;  %5984 = vpow2.f32 %v4728_v23  ;;  %v4785_v35 = vmul.f32 -1.442695, %v7011_v34  ;;  %v7031_v12 = vpop.f32.mrb[40].mxu0  ;;  %v8403_v38 = vld [vmem:[#allocation10_spill] sm:$0xff] }
 0x229   : > { %v5967_v55 = vpop.eup %5966  ;;  %v1709_v56 = vadd.f32 %v1708_v36, %v1612_v6  ;;  %v1353_v59 = vadd.f32 1.0, %v5965_v40  ;;  %5986 = vpow2.f32 %v4775_v42  ;;  %v4747_v23 = vmul.f32 -1.442695, %v7020_v8  ;;  %8401 = vst [vmem:[#allocation8_spill] sm:$0xff] %v7031_v12  ;;  %v7033_v36 = vpop.f32.mrb[32].mxu1 }
 0x22a   : > { %v5969_v26 = vpop.eup %5968  ;;  %v7025_v33 = vadd.f32 %v1674_v41, %v1659_v29  ;;  %v1621_v4 = vmul.f32 %v5967_v55, %v8399_v52  ;;  %5988 = vpow2.f32 %v4737_v11  ;;  %8402 = vst [vmem:[#allocation9_spill] sm:$0xff] %v7033_v36  ;;  %v7036_v6 = vpop.f32.mrb[41].mxu0 }
 0x22b   : > { %v5971_v49 = vpop.eup %5970  ;;  %v1660_v46 = vmul.f32 %v5969_v26, %v8400_v1  ;;  %5990 = vrcp.f32 %v1353_v59  ;;  %8404 = vst [vmem:[#allocation10_spill] sm:$0xff] %v7036_v6  ;;  %v7038_v11 = vpop.f32.mrb[33].mxu1  ;;  %v612_v59 = vsub.s32 7, %v6694_v22 }
 0x22c   : > { %v5973_v42 = vpop.eup %5972  ;;  %v1697_v37 = vadd.f32 %v1696_v20, %v1621_v4  ;;  %v1622_v41 = vmul.f32 %v5971_v49, %v8403_v38  ;;  %5992 = vpow2.f32 %v4776_v39  ;;  %8405 = vst [vmem:[#allocation18_spill] sm:$0xff] %v7038_v11  ;;  %v7044_v26 = vpop.f32.mrb[42].mxu0  ;;  %v8408_v49 = vsub.s32 6, %v6694_v22 }
 0x22d   : > { %v5975_v40 = vpop.eup %5974  ;;  %v7040_v29 = vadd.f32 %v1687_v10, %v1660_v46  ;;  %v1631_v55 = vmul.f32 %v5973_v42, %v6871_v45  ;;  %5994 = vpow2.f32 %v4738_v62  ;;  %8406 = vst [vmem:[#allocation19_spill] sm:$0xff] %v7044_v26  ;;  %v7046_v52 = vpop.f32.mrb[34].mxu1 }
 0x22e   : > { %8407 = vst [vmem:[#allocation20_spill] sm:$0xff] %v7046_v52  ;;  %v5977_v20 = vpop.eup %5976  ;;  %v7048_v4 = vadd.f32 %v1709_v56, %v1622_v41  ;;  %v1392_v39 = vadd.f32 1.0, %v5975_v40  ;;  %5996 = vpow2.f32 %v4785_v35  ;;  %v7053_v1 = vrot.slane %v6702_v24, %v8408_v49  ;;  %v7055_v10 = vpop.f32.mrb[43].mxu0  ;;  %v579_v35 = vld [vmem:[%s8360_s4 + $0x8] sm:$0x3] }
 0x22f   : > { %8409 = vst [vmem:[#allocation21_spill] sm:$0xff] %v7055_v10  ;;  %v7057_v45 = vpop.f32.mrb[35].mxu1  ;;  %v5979_v62 = vpop.eup %5978  ;;  %v7059_v46 = vadd.f32 %v1697_v37, %v1631_v55  ;;  %v1354_v42 = vadd.f32 1.0, %v5977_v20  ;;  %5998 = vpow2.f32 %v4747_v23  ;;  %v7063_v56 = vadd.f32 %v6879_v25, %v6768_v57 }
 0x230   : > { %8410 = vst [vmem:[#allocation22_spill] sm:$0xff] %v7057_v45  ;;  %v5981_v38 = vpop.eup %5980  ;;  %6000 = vrcp.f32 %v1392_v39  ;;  %v1401_v41 = vadd.f32 1.0, %v5979_v62  ;;  %v7070_v40 = vadd.f32 %v6881_v30, %v6903_v3  ;;  %v7074_v23 = vadd.f32 %v6894_v14, %v6855_v44  ;;  %v8411_v39 = vld [vmem:[#allocation6_spill] sm:$0xff]  ;;  %v8412_v14 = vld [vmem:[#allocation7_spill] sm:$0xff] }
 0x231   : > { %v5983_v49 = vpop.eup %5982  ;;  %6002 = vrcp.f32 %v1354_v42  ;;  %v1363_v37 = vadd.f32 1.0, %v5981_v38  ;;  %v7077_v25 = vrot.slane %v6702_v24, %v612_v59  ;;  %v7081_v20 = vadd.f32 %v6896_v61, %v7053_v1  ;;  %v7090_v24 = vpop.f32.mrb[36].mxu1 }
 0x232   : > { %v5985_v57 = vpop.eup %5984  ;;  %6004 = vrcp.f32 %v1401_v41  ;;  %v1402_v55 = vadd.f32 1.0, %v5983_v49  ;;  %v7084_v30 = vrot.slane %v579_v35, %v8411_v39  ;;  %v4786_v38 = vmul.f32 -1.442695, %v7063_v56  ;;  %8413 = vst [vmem:[#allocation23_spill] sm:$0xff] %v7090_v24  ;;  %v7097_v39 = vpop.f32.mrb[37].mxu1 }
 0x233   : > { %v5987_v62 = vpop.eup %5986  ;;  %6006 = vrcp.f32 %v1363_v37  ;;  %v1364_v42 = vadd.f32 1.0, %v5985_v57  ;;  %v7088_v22 = vrot.slane %v579_v35, %v8412_v14  ;;  %v4748_v49 = vmul.f32 -1.442695, %v7070_v40  ;;  %8414 = vst [vmem:[#allocation24_spill] sm:$0xff] %v7097_v39  ;;  %v7104_v14 = vpop.f32.mrb[38].mxu1 }
 0x234   : > { %v5989_v59 = vpop.eup %5988  ;;  %6008 = vrcp.f32 %v1402_v55  ;;  %v1411_v41 = vadd.f32 1.0, %v5987_v62  ;;  %v7095_v61 = vadd.f32 %v6898_v21, %v6903_v3  ;;  %v4757_v45 = vmul.f32 -1.442695, %v7074_v23  ;;  %8416 = vst [vmem:[#allocation26_spill] sm:$0xff] %v7104_v14 }
 0x235   : > { %v5991_v37 = vpop.eup %5990  ;;  %6010 = vrcp.f32 %v1364_v42  ;;  %v1373_v57 = vadd.f32 1.0, %v5989_v59  ;;  %v7102_v35 = vadd.f32 %v6900_v5, %v7077_v25  ;;  %v4719_v62 = vmul.f32 -1.442695, %v7081_v20  ;;  %v7115_v59 = vpop.f32.mrb[39].mxu1 }
 0x236   : > { %v5993_v55 = vpop.eup %5992  ;;  %6012 = vrcp.f32 %v1411_v41  ;;  %v7109_v21 = vadd.f32 %v6905_v27, %v6855_v44  ;;  %v7113_v42 = vadd.f32 %v6907_v15, %v7053_v1  ;;  %8417 = vst [vmem:[#allocation27_spill] sm:$0xff] %v7115_v59  ;;  %v1676_v5 = vrot.slane %v7025_v33, 4 }
 0x237   : > { %8415 = vst [vmem:[#allocation25_spill] sm:$0xff] %v7102_v35  ;;  %v5995_v39 = vpop.eup %5994  ;;  %6014 = vrcp.f32 %v1373_v57  ;;  %v1412_v24 = vadd.f32 1.0, %v5993_v55  ;;  %v7120_v41 = vadd.f32 %v6915_v63, %v6903_v3  ;;  %v4758_v27 = vmul.f32 -1.442695, %v7095_v61 }
 0x238   : > { %v5997_v14 = vpop.eup %5996  ;;  %v1374_v10 = vadd.f32 1.0, %v5995_v39  ;;  %6016 = vpow2.f32 %v4786_v38  ;;  %v7125_v15 = vadd.f32 %v6917_v28, %v7077_v25  ;;  %v4720_v26 = vmul.f32 -1.442695, %v7102_v35 }
 0x239   : > { %v5999_v52 = vpop.eup %5998  ;;  %6018 = vrcp.f32 %v1412_v24  ;;  %v1421_v59 = vadd.f32 1.0, %v5997_v14  ;;  %v7130_v57 = vadd.f32 %v6937_v18, %v6855_v44  ;;  %v4767_v39 = vmul.f32 -1.442695, %v7109_v21  ;;  %v7137_v24 = vpop.f32.mrb[40].mxu1 }
 0x23a   : > { %8418 = vst [vmem:[#allocation28_spill] sm:$0xff] %v7125_v15  ;;  %v6001_v63 = vpop.eup %6000  ;;  %6020 = vrcp.f32 %v1374_v10  ;;  %v1383_v55 = vadd.f32 1.0, %v5999_v52  ;;  %v4729_v38 = vmul.f32 -1.442695, %v7113_v42  ;;  %v1677_v28 = vadd.f32 %v1676_v5, %v7025_v33  ;;  %8420 = vst [vmem:[#allocation30_spill] sm:$0xff] %v7137_v24  ;;  %v7148_v33 = vpop.f32.mrb[41].mxu1 }
 0x23b   : > { %8419 = vst [vmem:[#allocation29_spill] sm:$0xff] %v7130_v57  ;;  %v6003_v11 = vpop.eup %6002  ;;  %v1632_v6 = vmul.f32 %v6001_v63, %v6921_v54  ;;  %6022 = vrcp.f32 %v1421_v59  ;;  %v4768_v14 = vmul.f32 -1.442695, %v7120_v41  ;;  %v4730_v18 = vmul.f32 -1.442695, %v7125_v15  ;;  %8421 = vst [vmem:[#allocation31_spill] sm:$0xff] %v7148_v33 }
 0x23c   : > { %v6005_v36 = vpop.eup %6004  ;;  %6024 = vrcp.f32 %v1383_v55  ;;  %v7142_v52 = vadd.f32 %v6945_v58, %v7053_v1  ;;  %v7146_v10 = vadd.f32 %v6947_v19, %v6903_v3  ;;  %v4777_v63 = vmul.f32 -1.442695, %v7130_v57  ;;  %v7153_v55 = vpop.f32.mrb[42].mxu1 }
 0x23d   : > { %v6007_v54 = vpop.eup %6006  ;;  %v1711_v59 = vadd.f32 %v7048_v4, %v1632_v6  ;;  %v1641_v5 = vmul.f32 %v6005_v36, %v6931_v13  ;;  %6026 = vpow2.f32 %v4748_v49  ;;  %8422 = vst [vmem:[#allocation32_spill] sm:$0xff] %v7153_v55  ;;  %v1689_v58 = vrot.slane %v7040_v29, 4  ;;  %v7158_v15 = vpop.f32.mrb[43].mxu1  ;;  %v8424_v4 = vld [vmem:[#allocation11_spill] sm:$0xff] }
 0x23e   : > { %v6009_v24 = vpop.eup %6008  ;;  %v1593_v12 = vmul.f32 %v5991_v37, %v6913_v17  ;;  %v1603_v19 = vmul.f32 %v6007_v54, %v6935_v50  ;;  %6028 = vpow2.f32 %v4757_v45  ;;  %8423 = vst [vmem:[#allocation33_spill] sm:$0xff] %v7158_v15  ;;  %v1678_v35 = vrot.slane %v1677_v28, 2  ;;  %v8425_v50 = vld [vmem:[#allocation14_spill] sm:$0xff] }
 0x23f   : > { %v6011_v33 = vpop.eup %6010  ;;  %v1699_v6 = vadd.f32 %v7059_v46, %v1641_v5  ;;  %v1642_v13 = vmul.f32 %v6009_v24, %v6943_v32  ;;  %6030 = vpow2.f32 %v4719_v62  ;;  %v1594_v49 = vmul.f32 %v6003_v11, %v8424_v4 }
 0x240   : > { %v6013_v36 = vpop.eup %6012  ;;  %v1721_v55 = vadd.f32 %v1603_v19, %v1593_v12  ;;  %v1604_v57 = vmul.f32 %v6011_v33, %v6952_v53  ;;  %6032 = vpow2.f32 %v4758_v27  ;;  %v4739_v54 = vmul.f32 -1.442695, %v7142_v52 }
 0x241   : > { %v6015_v17 = vpop.eup %6014  ;;  %v1712_v37 = vadd.f32 %v1711_v59, %v1642_v13  ;;  %v1651_v45 = vmul.f32 %v6013_v36, %v8425_v50  ;;  %6034 = vpow2.f32 %v4720_v26  ;;  %v1690_v46 = vadd.f32 %v1689_v58, %v7040_v29  ;;  %v8426_v26 = vld [vmem:[#allocation12_spill] sm:$0xff] }
 0x242   : > { %v6017_v15 = vpop.eup %6016  ;;  %v1734_v5 = vadd.f32 %v1604_v57, %v1594_v49  ;;  %v1613_v32 = vmul.f32 %v6015_v17, %v6973_v7  ;;  %6036 = vpow2.f32 %v4767_v39  ;;  %v1679_v11 = vadd.f32 %v1678_v35, %v1677_v28  ;;  %v8427_v35 = vld [vmem:[#allocation13_spill] sm:$0xff] }
 0x243   : > { %v6019_v62 = vpop.eup %6018  ;;  %v1700_v12 = vadd.f32 %v1699_v6, %v1651_v45  ;;  %v1422_v24 = vadd.f32 1.0, %v6017_v15  ;;  %6038 = vpow2.f32 %v4729_v38  ;;  %v7171_v59 = vadd.f32 %v8426_v26, %v7077_v25 }
 0x244   : > { %v6021_v53 = vpop.eup %6020  ;;  %v1722_v27 = vadd.f32 %v1721_v55, %v1613_v32  ;;  %v1652_v33 = vmul.f32 %v6019_v62, %v6983_v47  ;;  %6040 = vpow2.f32 %v4768_v14  ;;  %v4778_v7 = vmul.f32 -1.442695, %v7146_v10  ;;  %v8430_v32 = vld [vmem:[#allocation17_spill] sm:$0xff] }
 0x245   : > { %v6023_v19 = vpop.eup %6022  ;;  %v1614_v29 = vmul.f32 %v6021_v53, %v7002_v48  ;;  %6042 = vrcp.f32 %v1422_v24  ;;  %v7177_v57 = vadd.f32 %v8427_v35, %v6855_v44  ;;  %v1691_v39 = vrot.slane %v1690_v46, 2 }
 0x246   : > { %v6025_v15 = vpop.eup %6024  ;;  %v1713_v38 = vadd.f32 %v1712_v37, %v1652_v33  ;;  %v1661_v47 = vmul.f32 %v6023_v19, %v7011_v34  ;;  %6044 = vpow2.f32 %v4730_v18  ;;  %v1680_v14 = vrot.slane %v1679_v11, 1  ;;  %v8428_v34 = vld [vmem:[#allocation15_spill] sm:$0xff] }
 0x247   : > { %v6027_v28 = vpop.eup %6026  ;;  %v7180_v55 = vadd.f32 %v1734_v5, %v1614_v29  ;;  %v1623_v58 = vmul.f32 %v6025_v15, %v7020_v8  ;;  %6046 = vpow2.f32 %v4777_v63  ;;  %v4740_v44 = vmul.f32 -1.442695, %v7171_v59  ;;  %v8429_v63 = vld [vmem:[#allocation16_spill] sm:$0xff] }
 0x248   : > { %v6029_v48 = vpop.eup %6028  ;;  %v7183_v6 = vadd.f32 %v1700_v12, %v1661_v47  ;;  %v1384_v13 = vadd.f32 1.0, %v6027_v28  ;;  %6048 = vpow2.f32 %v4739_v54  ;;  %v7190_v18 = vadd.f32 %v8428_v34, %v7053_v1 }
 0x249   : > { %v6031_v36 = vpop.eup %6030  ;;  %v7186_v4 = vadd.f32 %v1722_v27, %v1623_v58  ;;  %v1393_v49 = vadd.f32 1.0, %v6029_v48  ;;  %6050 = vpow2.f32 %v4778_v7  ;;  %v7194_v37 = vadd.f32 %v8429_v63, %v6903_v3  ;;  %v5427_v63 = vld [vmem:[%s8361_s5 + $0x208] ss:$16 sps:$4 sm:$0xff]  }
 0x24a   : > { %v6033_v17 = vpop.eup %6032  ;;  %6052 = vrcp.f32 %v1384_v13  ;;  %v1355_v8 = vadd.f32 1.0, %v6031_v36  ;;  %v1692_v50 = vadd.f32 %v1691_v39, %v1690_v46  ;;  %v1681_v54 = vadd.f32 %v1680_v14, %v1679_v11 }
 0x24b   : > { %v6035_v45 = vpop.eup %6034  ;;  %6054 = vrcp.f32 %v1393_v49  ;;  %v1394_v5 = vadd.f32 1.0, %v6033_v17  ;;  %v7198_v62 = vadd.f32 %v8430_v32, %v7077_v25  ;;  %v7201_v53 = vmul.f32 -1.442695, %v7177_v57 }
 0x24c   : > { %v6037_v12 = vpop.eup %6036  ;;  %6056 = vrcp.f32 %v1355_v8  ;;  %v1356_v24 = vadd.f32 1.0, %v6035_v45  ;;  %v1693_v27 = vrot.slane %v1692_v50, 1  ;;  %v7204_v46 = vmul.f32 -1.442695, %v7190_v18 }
 0x24d   : > { %v6039_v33 = vpop.eup %6038  ;;  %6058 = vrcp.f32 %v1394_v5  ;;  %v1403_v3 = vadd.f32 1.0, %v6037_v12  ;;  %v7208_v11 = vadd.f32 %v6988_v60, %v7053_v1  ;;  %v7211_v29 = vmul.f32 -1.442695, %v7194_v37 }
 0x24e   : > { %v6041_v26 = vpop.eup %6040  ;;  %6060 = vrcp.f32 %v1356_v24  ;;  %v1365_v19 = vadd.f32 1.0, %v6039_v33  ;;  %v1694_v7 = vadd.f32 %v1693_v27, %v1692_v50  ;;  %v1800_v15 = vmul.f32 0.015625, %v1681_v54 }
 0x24f   : > { %v6043_v35 = vpop.eup %6042  ;;  %6062 = vrcp.f32 %v1403_v3  ;;  %v1404_v39 = vadd.f32 1.0, %v6041_v26  ;;  %v7214_v47 = vmul.f32 -1.442695, %v7198_v62  ;;  %v7219_v60 = vadd.f32 %v6990_v51, %v7084_v30  ;;  %v5424_v51 = vld [vmem:[%s8361_s5 + $0x200] ss:$16 sps:$4 sm:$0xff]  }
 0x250   : > { %v6045_v28 = vpop.eup %6044  ;;  %v1662_v14 = vmul.f32 %v6043_v35, %v7063_v56  ;;  %6064 = vrcp.f32 %v1365_v19  ;;  %v1801_v58 = vmul.f32 0.015625, %v1694_v7  ;;  %v7222_v36 = vmul.f32 -1.442695, %v7208_v11 }
 0x251   : > { %v6047_v48 = vpop.eup %6046  ;;  %6066 = vrcp.f32 %v1404_v39  ;;  %v1366_v13 = vadd.f32 1.0, %v6045_v28  ;;  %v7226_v49 = vadd.f32 %v6995_v2, %v7077_v25  ;;  %v1810_v45 = vpack.c.bf16 %v1800_v15, %v1800_v15  ;;  %v5438_v28 = vld [vmem:[%s8361_s5 + $0x244] ss:$16 sps:$4 sm:$0xff]  }
 0x252   : > { %v6049_v34 = vpop.eup %6048  ;;  %v1714_v17 = vadd.f32 %v1713_v38, %v1662_v14  ;;  %v1413_v8 = vadd.f32 1.0, %v6047_v48  ;;  %6068 = vpow2.f32 %v4740_v44  ;;  %v1811_v56 = vpack.c.bf16 %v1801_v58, %v1801_v58  ;;  %v5432_v38 = vld [vmem:[%s8361_s5 + $0x224] ss:$16 sps:$4 sm:$0xff]   ;;  %v5435_v44 = vld [vmem:[%s8361_s5 + $0x22c] ss:$16 sps:$4 sm:$0xff]  }
 0x253   : > { %v6051_v50 = vpop.eup %6050  ;;  %6070 = vrcp.f32 %v1366_v13  ;;  %v1375_v54 = vadd.f32 1.0, %v6049_v34  ;;  %v7236_v2 = vadd.f32 %v6997_v31, %v7088_v22  ;;  %v4721_v24 = vmul.f32 -1.442695, %v7219_v60  ;;  %v5441_v14 = vld [vmem:[%s8361_s5 + $0x24c] ss:$16 sps:$4 sm:$0xff]  }
 0x254   : > { %v6053_v5 = vpop.eup %6052  ;;  %v1715_v32 = vrot.slane %v1714_v17, 4  ;;  %6072 = vrcp.f32 %v1413_v8  ;;  %v1414_v12 = vadd.f32 1.0, %v6051_v50  ;;  %3794 = vmatprep.mubr.bf16.mxu0 %v1811_v56  ;;  %3999 = vmatprep.mubr.bf16.mxu1 %v1811_v56  ;;  %v7248_v33 = vadd.f32 %v7004_v0, %v7053_v1  ;;  %v5430_v0 = vld [vmem:[%s8361_s5 + $0x220] ss:$16 sps:$4 sm:$0xff]   ;;  %v5447_v50 = vld [vmem:[%s8361_s5 + $0x26c] ss:$16 sps:$4 sm:$0xff]  }
 0x255   : > { %v6055_v27 = vpop.eup %6054  ;;  %v1624_v31 = vmul.f32 %v6053_v5, %v7070_v40  ;;  %6074 = vrcp.f32 %v1375_v54  ;;  %v7252_v3 = vadd.f32 %v7006_v43, %v7084_v30  ;;  %3795 = vmatmul.mubr.bf16.vlgmr.msra.gmra.mrb[44].mxu0 %v1810_v45  ;;  %4000 = vmatmul.mubr.bf16.vlgmr.msra.gmra.mrb[44].mxu1 %v1810_v45  ;;  %v4760_v35 = vmul.f32 -1.442695, %v7226_v49  ;;  %v5433_v43 = vld [vmem:[%s8361_s5 + $0x228] ss:$16 sps:$4 sm:$0xff]  }
 0x256   : > { %v6057_v26 = vpop.eup %6056  ;;  %v1716_v19 = vadd.f32 %v1715_v32, %v1714_v17  ;;  %v1633_v7 = vmul.f32 %v6055_v27, %v7074_v23  ;;  %6076 = vrcp.f32 %v1414_v12  ;;  %3804 = vmatpush1.bf16.msra.mxu0 %v5424_v51  ;;  %4009 = vmatpush1.bf16.msra.mxu1 %v5427_v63  ;;  %v4722_v23 = vmul.f32 -1.442695, %v7236_v2 }
 0x257   : > { %v6059_v40 = vpop.eup %6058  ;;  %v1736_v15 = vadd.f32 %v7180_v55, %v1624_v31  ;;  %6078 = vpow2.f32 %v7201_v53  ;;  %v7267_v39 = vadd.f32 %v7013_v9, %v7077_v25  ;;  %3805 = vmatprep.subr.bf16.mxu0 %v5432_v38  ;;  %4010 = vmatprep.subr.bf16.mxu1 %v5435_v44  ;;  %v4769_v13 = vmul.f32 -1.442695, %v7248_v33  ;;  %v8432_v31 = vld [vmem:[#allocation28_spill] sm:$0xff] }
 0x258   : > { %v6061_v58 = vpop.eup %6060  ;;  %v1717_v55 = vrot.slane %v1716_v19, 2  ;;  %v1724_v53 = vadd.f32 %v7186_v4, %v1633_v7  ;;  %v1634_v48 = vmul.f32 %v6059_v40, %v7095_v61  ;;  %6080 = vpow2.f32 %v7204_v46  ;;  %v5436_v61 = vld [vmem:[%s8361_s5 + $0x240] ss:$16 sps:$4 sm:$0xff]   ;;  %v5439_v4 = vld [vmem:[%s8361_s5 + $0x248] ss:$16 sps:$4 sm:$0xff]  }
 0x259   : > { %v6063_v9 = vpop.eup %6062  ;;  %6082 = vpow2.f32 %v7211_v29  ;;  %v4731_v34 = vmul.f32 -1.442695, %v7252_v3  ;;  %v7283_v17 = vadd.f32 %v7015_v16, %v7088_v22  ;;  %v1595_v16 = vmul.f32 %v6057_v26, %v7081_v20  ;;  %v5450_v40 = vld [vmem:[%s8361_s5 + $0x284] ss:$16 sps:$4 sm:$0xff]  }
 0x25a   : > { %v6065_v8 = vpop.eup %6064  ;;  %v1737_v56 = vadd.f32 %v1736_v15, %v1634_v48  ;;  %v1643_v51 = vmul.f32 %v6063_v9, %v7109_v21  ;;  %6084 = vpow2.f32 %v7214_v47  ;;  %3806 = vmatpush1.bf16.msra.mxu0 %v5430_v0  ;;  %4011 = vmatpush1.bf16.msra.mxu1 %v5433_v43  ;;  %v1718_v46 = vadd.f32 %v1717_v55, %v1716_v19  ;;  %v5444_v47 = vld [vmem:[%s8361_s5 + $0x264] ss:$16 sps:$4 sm:$0xff]   ;;  %v5442_v19 = vld [vmem:[%s8361_s5 + $0x260] ss:$16 sps:$4 sm:$0xff]   ;;  %v5453_v15 = vld [vmem:[%s8361_s5 + $0x28c] ss:$16 sps:$4 sm:$0xff]  }
 0x25b   : > { %v6067_v29 = vpop.eup %6066  ;;  %v1605_v63 = vmul.f32 %v6065_v8, %v7113_v42  ;;  %6086 = vpow2.f32 %v7222_v36  ;;  %v4770_v21 = vmul.f32 -1.442695, %v7267_v39  ;;  %3807 = vmatprep.subr.bf16.mxu0 %v5438_v28  ;;  %4012 = vmatprep.subr.bf16.mxu1 %v5441_v14  ;;  %v8431_v36 = vld [vmem:[#allocation25_spill] sm:$0xff] }
 0x25c   : > { %v6069_v45 = vpop.eup %6068  ;;  %v1725_v54 = vadd.f32 %v1724_v53, %v1643_v51  ;;  %v1644_v20 = vmul.f32 %v6067_v29, %v7120_v41  ;;  %6088 = vpow2.f32 %v4721_v24  ;;  %v1719_v42 = vrot.slane %v1718_v46, 1  ;;  %v5445_v41 = vld [vmem:[%s8361_s5 + $0x268] ss:$16 sps:$4 sm:$0xff]   ;;  %v5448_v51 = vld [vmem:[%s8361_s5 + $0x280] ss:$16 sps:$4 sm:$0xff]  }
 0x25d   : > { %v6071_v38 = vpop.eup %6070  ;;  %v1596_v44 = vmul.f32 %v6061_v58, %v8431_v36  ;;  %v1747_v5 = vadd.f32 %v1605_v63, %v1595_v16  ;;  %v1376_v32 = vadd.f32 1.0, %v6069_v45  ;;  %6090 = vpow2.f32 %v4760_v35  ;;  %v8433_v0 = vld [vmem:[#allocation29_spill] sm:$0xff]  ;;  %v8434_v63 = vld [vmem:[#allocation8_spill] sm:$0xff] }
 0x25e   : > { %v6073_v12 = vpop.eup %6072  ;;  %v1738_v27 = vadd.f32 %v1737_v56, %v1644_v20  ;;  %v1606_v26 = vmul.f32 %v6071_v38, %v8432_v31  ;;  %6092 = vpow2.f32 %v4722_v23  ;;  %3808 = vmatpush1.bf16.msra.mxu0 %v5436_v61  ;;  %4013 = vmatpush1.bf16.msra.mxu1 %v5439_v4  ;;  %v1720_v24 = vadd.f32 %v1719_v42, %v1718_v46  ;;  %v5459_v46 = vld [vmem:[%s8361_s5 + $0x2ac] ss:$16 sps:$4 sm:$0xff]   ;;  %v5454_v20 = vld [vmem:[%s8361_s5 + $0x2a0] ss:$16 sps:$4 sm:$0xff]   ;;  %v5457_v42 = vld [vmem:[%s8361_s5 + $0x2a8] ss:$16 sps:$4 sm:$0xff]  }
 0x25f   : > { %v6075_v7 = vpop.eup %6074  ;;  %v1653_v43 = vmul.f32 %v6073_v12, %v8433_v0  ;;  %6094 = vrcp.f32 %v1376_v32  ;;  %v4732_v35 = vmul.f32 -1.442695, %v7283_v17  ;;  %3809 = vmatprep.subr.bf16.mxu0 %v5444_v47  ;;  %4014 = vmatprep.subr.bf16.mxu1 %v5447_v50  ;;  %v8436_v0 = vld [vmem:[#allocation10_spill] sm:$0xff] }
 0x260   : > { %v6077_v23 = vpop.eup %6076  ;;  %v7320_v28 = vadd.f32 %v1606_v26, %v1596_v44  ;;  %v1615_v14 = vmul.f32 %v6075_v7, %v7142_v52  ;;  %6096 = vpow2.f32 %v4769_v13  ;;  %v1803_v58 = vmul.f32 0.015625, %v1720_v24  ;;  %v5451_v13 = vld [vmem:[%s8361_s5 + $0x288] ss:$16 sps:$4 sm:$0xff]   ;;  %v5462_v44 = vld [vmem:[%s8361_s5 + $0x2c4] ss:$16 sps:$4 sm:$0xff]  }
 0x261   : > { %v6079_v55 = vpop.eup %6078  ;;  %v7323_v53 = vadd.f32 %v1725_v54, %v1653_v43  ;;  %v1654_v48 = vmul.f32 %v6077_v23, %v7146_v10  ;;  %6098 = vpow2.f32 %v4731_v34  ;;  %v5456_v34 = vld [vmem:[%s8361_s5 + $0x2a4] ss:$16 sps:$4 sm:$0xff]   ;;  %v7366_v43 = vadd.f32 %v8436_v0, %v7077_v25  ;;  %v5463_v23 = vld [vmem:[%s8361_s5 + $0x2c8] ss:$16 sps:$4 sm:$0xff]  }
 0x262   : > { %v6081_v9 = vpop.eup %6080  ;;  %v7326_v8 = vadd.f32 %v1747_v5, %v1615_v14  ;;  %v1423_v56 = vadd.f32 1.0, %v6079_v55  ;;  %6100 = vpow2.f32 %v4770_v21  ;;  %3810 = vmatpush1.bf16.msra.mxu0 %v5442_v19  ;;  %4015 = vmatpush1.bf16.msra.mxu1 %v5445_v41  ;;  %v1813_v52 = vpack.c.bf16 %v1803_v58, %v1803_v58  ;;  %v5465_v5 = vld [vmem:[%s8361_s5 + $0x2cc] ss:$16 sps:$4 sm:$0xff]   ;;  %v8435_v19 = vld [vmem:[#allocation9_spill] sm:$0xff]  ;;  %v8438_v58 = vld [vmem:[#allocation19_spill] sm:$0xff] }
 0x263   : > { %v6083_v61 = vpop.eup %6082  ;;  %v7334_v4 = vadd.f32 %v1738_v27, %v1654_v48  ;;  %v1385_v10 = vadd.f32 1.0, %v6081_v9  ;;  %6102 = vpow2.f32 %v4732_v35  ;;  %3811 = vmatprep.subr.bf16.mxu0 %v5450_v40  ;;  %4016 = vmatprep.subr.bf16.mxu1 %v5453_v15  ;;  %v7344_v21 = vadd.f32 %v8434_v63, %v7053_v1  ;;  %v8437_v35 = vld [vmem:[#allocation18_spill] sm:$0xff]  ;;  %v5468_v48 = vld [vmem:[%s8361_s5 + $0x2e4] ss:$16 sps:$4 sm:$0xff]  }
 0x264   : > { %v6085_v29 = vpop.eup %6084  ;;  %6104 = vrcp.f32 %v1423_v56  ;;  %v1424_v16 = vadd.f32 1.0, %v6083_v61  ;;  %3835 = vmatprep.mubr.bf16.mxu0 %v1813_v52  ;;  %4040 = vmatprep.mubr.bf16.mxu1 %v1813_v52  ;;  %v7361_v41 = vadd.f32 %v8435_v19, %v7084_v30  ;;  %v7370_v40 = vadd.f32 %v8437_v35, %v7088_v22  ;;  %v5460_v15 = vld [vmem:[%s8361_s5 + $0x2c0] ss:$16 sps:$4 sm:$0xff]   ;;  %v5471_v9 = vld [vmem:[%s8361_s5 + $0x2ec] ss:$16 sps:$4 sm:$0xff]  }
 0x265   : > { %v6087_v47 = vpop.eup %6086  ;;  %6106 = vrcp.f32 %v1385_v10  ;;  %v1386_v50 = vadd.f32 1.0, %v6085_v29  ;;  %v4779_v27 = vmul.f32 -1.442695, %v7344_v21  ;;  %v7380_v55 = vadd.f32 %v8438_v58, %v7053_v1  ;;  %v5466_v1 = vld [vmem:[%s8361_s5 + $0x2e0] ss:$16 sps:$4 sm:$0xff]  }
 0x266   : > { %v6089_v45 = vpop.eup %6088  ;;  %6108 = vrcp.f32 %v1424_v16  ;;  %v1395_v54 = vadd.f32 1.0, %v6087_v47  ;;  %3812 = vmatpush1.bf16.msra.mxu0 %v5448_v51  ;;  %4017 = vmatpush1.bf16.msra.mxu1 %v5451_v13  ;;  %v8439_v13 = vld [vmem:[#allocation20_spill] sm:$0xff]  ;;  %v4780_v63 = vmul.f32 -1.442695, %v7366_v43  ;;  %v4742_v47 = vmul.f32 -1.442695, %v7370_v40 }
 0x267   : > { %v6091_v38 = vpop.eup %6090  ;;  %6110 = vrcp.f32 %v1386_v50  ;;  %v1357_v36 = vadd.f32 1.0, %v6089_v45  ;;  %3813 = vmatprep.subr.bf16.mxu0 %v5456_v34  ;;  %4018 = vmatprep.subr.bf16.mxu1 %v5459_v46  ;;  %v7391_v61 = vadd.f32 %v8439_v13, %v7084_v30  ;;  %v4741_v46 = vmul.f32 -1.442695, %v7361_v41  ;;  %v5469_v29 = vld [vmem:[%s8361_s5 + $0x2e8] ss:$16 sps:$4 sm:$0xff]  }
 0x268   : > { %v6093_v32 = vpop.eup %6092  ;;  %6112 = vrcp.f32 %v1395_v54  ;;  %v1396_v12 = vadd.f32 1.0, %v6091_v38  ;;  %v4789_v54 = vmul.f32 -1.442695, %v7380_v55  ;;  %v5474_v38 = vld [vmem:[%s8361_s5 + $0x304] ss:$16 sps:$4 sm:$0xff]  }
 0x269   : > { %v6095_v31 = vpop.eup %6094  ;;  %6114 = vrcp.f32 %v1357_v36  ;;  %v1358_v26 = vadd.f32 1.0, %v6093_v32  ;;  %v5477_v36 = vld [vmem:[%s8361_s5 + $0x30c] ss:$16 sps:$4 sm:$0xff]  }
 0x26a   : > { %v6097_v24 = vpop.eup %6096  ;;  %v1616_v7 = vmul.f32 %v6095_v31, %v7171_v59  ;;  %6116 = vrcp.f32 %v1396_v12  ;;  %3814 = vmatpush1.bf16.msra.mxu0 %v5454_v20  ;;  %4019 = vmatpush1.bf16.msra.mxu1 %v5457_v42  ;;  %v8440_v20 = vld [vmem:[#allocation21_spill] sm:$0xff]  ;;  %v8441_v32 = vld [vmem:[#allocation22_spill] sm:$0xff] }
 0x26b   : > { %v6099_v59 = vpop.eup %6098  ;;  %6118 = vrcp.f32 %v1358_v26  ;;  %v1405_v14 = vadd.f32 1.0, %v6097_v24  ;;  %3815 = vmatprep.subr.bf16.mxu0 %v5462_v44  ;;  %4020 = vmatprep.subr.bf16.mxu1 %v5465_v5  ;;  %v7406_v42 = vadd.f32 %v8440_v20, %v7077_v25  ;;  %v4751_v5 = vmul.f32 -1.442695, %v7391_v61  ;;  %v8445_v20 = vld [vmem:[#allocation27_spill] sm:$0xff] }
 0x26c   : > { %v6101_v56 = vpop.eup %6100  ;;  %v1761_v51 = vadd.f32 %v7320_v28, %v1616_v7  ;;  %v1367_v52 = vadd.f32 1.0, %v6099_v59  ;;  %6120 = vpow2.f32 %v4779_v27  ;;  %v7418_v25 = vadd.f32 %v8441_v32, %v7088_v22  ;;  %v8442_v7 = vld [vmem:[#allocation23_spill] sm:$0xff] }
 0x26d   : > { %v6103_v10 = vpop.eup %6102  ;;  %6122 = vrcp.f32 %v1405_v14  ;;  %v1406_v34 = vadd.f32 1.0, %v6101_v56  ;;  %v1702_v27 = vrot.slane %v7183_v6, 4  ;;  %v7429_v0 = vadd.f32 %v8442_v7, %v7084_v30  ;;  %v5480_v59 = vld [vmem:[%s8361_s5 + $0x324] ss:$16 sps:$4 sm:$0xff]   ;;  %v5483_v14 = vld [vmem:[%s8361_s5 + $0x32c] ss:$16 sps:$4 sm:$0xff]  }
 0x26e   : > { %v6105_v28 = vpop.eup %6104  ;;  %6124 = vrcp.f32 %v1367_v52  ;;  %v1368_v16 = vadd.f32 1.0, %v6103_v10  ;;  %3816 = vmatpush1.bf16.msra.mxu0 %v5460_v15  ;;  %4021 = vmatpush1.bf16.msra.mxu1 %v5463_v23  ;;  %v8443_v15 = vld [vmem:[#allocation24_spill] sm:$0xff]  ;;  %v8444_v52 = vld [vmem:[#allocation26_spill] sm:$0xff]  ;;  %v5492_v7 = vld [vmem:[%s8361_s5 + $0x364] ss:$16 sps:$4 sm:$0xff]  }
 0x26f   : > { %v6107_v50 = vpop.eup %6106  ;;  %v1663_v45 = vmul.f32 %v6105_v28, %v7177_v57  ;;  %6126 = vrcp.f32 %v1406_v34  ;;  %3817 = vmatprep.subr.bf16.mxu0 %v5468_v48  ;;  %4022 = vmatprep.subr.bf16.mxu1 %v5471_v9  ;;  %v7441_v23 = vadd.f32 %v8443_v15, %v7088_v22  ;;  %v7453_v13 = vadd.f32 %v8444_v52, %v7084_v30  ;;  %v5481_v10 = vld [vmem:[%s8361_s5 + $0x328] ss:$16 sps:$4 sm:$0xff]  }
 0x270   : > { %v6109_v44 = vpop.eup %6108  ;;  %v1625_v57 = vmul.f32 %v6107_v50, %v7190_v18  ;;  %6128 = vrcp.f32 %v1368_v16  ;;  %v7462_v34 = vadd.f32 %v1702_v27, %v7183_v6 }
 0x271   : > { %v6111_v12 = vpop.eup %6110  ;;  %v7422_v31 = vadd.f32 %v7323_v53, %v1663_v45  ;;  %v1664_v26 = vmul.f32 %v6109_v44, %v7194_v37  ;;  %6130 = vpow2.f32 %v4741_v46  ;;  %v5472_v53 = vld [vmem:[%s8361_s5 + $0x300] ss:$16 sps:$4 sm:$0xff]   ;;  %v5475_v37 = vld [vmem:[%s8361_s5 + $0x308] ss:$16 sps:$4 sm:$0xff]   ;;  %v4752_v46 = vmul.f32 -1.442695, %v7418_v25 }
 0x272   : > { %v6113_v19 = vpop.eup %6112  ;;  %v1749_v24 = vadd.f32 %v7326_v8, %v1625_v57  ;;  %v1626_v18 = vmul.f32 %v6111_v12, %v7198_v62  ;;  %6132 = vpow2.f32 %v4780_v63  ;;  %3818 = vmatpush1.bf16.msra.mxu0 %v5466_v1  ;;  %4023 = vmatpush1.bf16.msra.mxu1 %v5469_v29  ;;  %v5478_v1 = vld [vmem:[%s8361_s5 + $0x320] ss:$16 sps:$4 sm:$0xff]   ;;  %v5489_v29 = vld [vmem:[%s8361_s5 + $0x34c] ss:$16 sps:$4 sm:$0xff]   ;;  %v4762_v6 = vmul.f32 -1.442695, %v7441_v23 }
 0x273   : > { %v6115_v35 = vpop.eup %6114  ;;  %v1740_v8 = vadd.f32 %v7334_v4, %v1664_v26  ;;  %v1635_v62 = vmul.f32 %v6113_v19, %v7208_v11  ;;  %6134 = vpow2.f32 %v4742_v47  ;;  %3819 = vmatprep.subr.bf16.mxu0 %v5474_v38  ;;  %4024 = vmatprep.subr.bf16.mxu1 %v5477_v36  ;;  %v4790_v11 = vmul.f32 -1.442695, %v7406_v42 }
 0x274   : > { %v6117_v58 = vpop.eup %6116  ;;  %v1762_v48 = vadd.f32 %v1761_v51, %v1626_v18  ;;  %6136 = vpow2.f32 %v4789_v54  ;;  %v4761_v47 = vmul.f32 -1.442695, %v7429_v0  ;;  %v7476_v38 = vadd.f32 %v8445_v20, %v7088_v22 }
 0x275   : > { %v6119_v4 = vpop.eup %6118  ;;  %v1750_v9 = vadd.f32 %v1749_v24, %v1635_v62  ;;  %v1636_v56 = vmul.f32 %v6117_v58, %v7226_v49  ;;  %6138 = vpow2.f32 %v4751_v5  ;;  %v5486_v49 = vld [vmem:[%s8361_s5 + $0x344] ss:$16 sps:$4 sm:$0xff]   ;;  %v1741_v45 = vrot.slane %v1740_v8, 4 }
 0x276   : > { %v6121_v51 = vpop.eup %6120  ;;  %3820 = vmatpush1.bf16.msra.mxu0 %v5472_v53  ;;  %4025 = vmatpush1.bf16.msra.mxu1 %v5475_v37  ;;  %6140 = vpow2.f32 %v4790_v11  ;;  %v1597_v44 = vmul.f32 %v6115_v35, %v7219_v60  ;;  %v4771_v5 = vmul.f32 -1.442695, %v7453_v13  ;;  %v5484_v60 = vld [vmem:[%s8361_s5 + $0x340] ss:$16 sps:$4 sm:$0xff]   ;;  %v1598_v24 = vmul.f32 %v6119_v4, %v7236_v2  ;;  %v5495_v53 = vld [vmem:[%s8361_s5 + $0x36c] ss:$16 sps:$4 sm:$0xff]  }
 0x277   : > { %v6123_v28 = vpop.eup %6122  ;;  %v1763_v16 = vadd.f32 %v1762_v48, %v1636_v56  ;;  %v1415_v63 = vadd.f32 1.0, %v6121_v51  ;;  %3821 = vmatprep.subr.bf16.mxu0 %v5480_v59  ;;  %4026 = vmatprep.subr.bf16.mxu1 %v5483_v14  ;;  %v1742_v35 = vadd.f32 %v1741_v45, %v1740_v8  ;;  %v5490_v14 = vld [vmem:[%s8361_s5 + $0x360] ss:$16 sps:$4 sm:$0xff]   ;;  %v4772_v11 = vmul.f32 -1.442695, %v7476_v38 }
 0x278   : > { %v6125_v50 = vpop.eup %6124  ;;  %v1645_v54 = vmul.f32 %v6123_v28, %v7248_v33  ;;  %v8446_v33 = vld [vmem:[#allocation30_spill] sm:$0xff]  ;;  %v8447_v8 = vld [vmem:[#allocation31_spill] sm:$0xff]  ;;  %v1704_v56 = vrot.slane %v7462_v34, 2 }
 0x279   : > { %v6127_v36 = vpop.eup %6126  ;;  %v1607_v57 = vmul.f32 %v6125_v50, %v7252_v3  ;;  %6142 = vrcp.f32 %v1415_v63  ;;  %v7486_v26 = vadd.f32 %v8446_v33, %v7084_v30  ;;  %v5487_v3 = vld [vmem:[%s8361_s5 + $0x348] ss:$16 sps:$4 sm:$0xff]   ;;  %v7514_v4 = vadd.f32 %v8447_v8, %v7088_v22  ;;  %v5496_v63 = vld [vmem:[%s8361_s5 + $0x380] ss:$16 sps:$4 sm:$0xff]  }
 0x27a   : > { %v6129_v32 = vpop.eup %6128  ;;  %v7481_v12 = vadd.f32 %v1750_v9, %v1645_v54  ;;  %v1646_v27 = vmul.f32 %v6127_v36, %v7267_v39  ;;  %6144 = vpow2.f32 %v4752_v46  ;;  %3822 = vmatpush1.bf16.msra.mxu0 %v5478_v1  ;;  %4027 = vmatpush1.bf16.msra.mxu1 %v5481_v10  ;;  %v5493_v9 = vld [vmem:[%s8361_s5 + $0x368] ss:$16 sps:$4 sm:$0xff]   ;;  %v5498_v1 = vld [vmem:[%s8361_s5 + $0x384] ss:$16 sps:$4 sm:$0xff]   ;;  %v5501_v10 = vld [vmem:[%s8361_s5 + $0x38c] ss:$16 sps:$4 sm:$0xff]   ;;  %v1705_v50 = vadd.f32 %v1704_v56, %v7462_v34 }
 0x27b   : > { %v6131_v19 = vpop.eup %6130  ;;  %v7495_v18 = vadd.f32 %v1607_v57, %v1597_v44  ;;  %v1608_v39 = vmul.f32 %v6129_v32, %v7283_v17  ;;  %6146 = vpow2.f32 %v4761_v47  ;;  %3823 = vmatprep.subr.bf16.mxu0 %v5486_v49  ;;  %4028 = vmatprep.subr.bf16.mxu1 %v5489_v29  ;;  %v1743_v46 = vrot.slane %v1742_v35, 2  ;;  %v5499_v47 = vld [vmem:[%s8361_s5 + $0x388] ss:$16 sps:$4 sm:$0xff]   ;;  %v5504_v36 = vld [vmem:[%s8361_s5 + $0x3a4] ss:$16 sps:$4 sm:$0xff]  }
 0x27c   : > { %v6133_v37 = vpop.eup %6132  ;;  %v7504_v62 = vadd.f32 %v1763_v16, %v1646_v27  ;;  %v1377_v2 = vadd.f32 1.0, %v6131_v19  ;;  %6148 = vpow2.f32 %v4762_v6  ;;  %v4781_v49 = vmul.f32 -1.442695, %v7486_v26  ;;  %v8448_v54 = vld [vmem:[#allocation32_spill] sm:$0xff]  ;;  %v8449_v34 = vld [vmem:[#allocation33_spill] sm:$0xff] }
 0x27d   : > { %v6135_v15 = vpop.eup %6134  ;;  %v7506_v59 = vadd.f32 %v1608_v39, %v1598_v24  ;;  %v1416_v17 = vadd.f32 1.0, %v6133_v37  ;;  %6150 = vpow2.f32 %v4771_v5  ;;  %v4782_v16 = vmul.f32 -1.442695, %v7514_v4  ;;  %v5507_v44 = vld [vmem:[%s8361_s5 + $0x3ac] ss:$16 sps:$4 sm:$0xff]  }
 0x27e   : > { %v6137_v58 = vpop.eup %6136  ;;  %6152 = vrcp.f32 %v1377_v2  ;;  %v1378_v48 = vadd.f32 1.0, %v6135_v15  ;;  %3824 = vmatpush1.bf16.msra.mxu0 %v5484_v60  ;;  %4029 = vmatpush1.bf16.msra.mxu1 %v5487_v3  ;;  %v7537_v20 = vadd.f32 %v8448_v54, %v7084_v30  ;;  %v7548_v32 = vadd.f32 %v8449_v34, %v7088_v22  ;;  %v5502_v60 = vld [vmem:[%s8361_s5 + $0x3a0] ss:$16 sps:$4 sm:$0xff]   ;;  %v5505_v22 = vld [vmem:[%s8361_s5 + $0x3a8] ss:$16 sps:$4 sm:$0xff]  }
 0x27f   : > { %6154 = vrcp.f32 %v1416_v17  ;;  %v1425_v52 = vadd.f32 1.0, %v6137_v58  ;;  %3825 = vmatprep.subr.bf16.mxu0 %v5492_v7  ;;  %4030 = vmatprep.subr.bf16.mxu1 %v5495_v53  ;;  %v6139_v51 = vpop.eup %6138  ;;  %v1744_v30 = vadd.f32 %v1743_v46, %v1742_v35  ;;  %v1706_v37 = vrot.slane %v1705_v50, 1  ;;  %v5508_v8 = vld [vmem:[%s8361_s5 + $0x3c0] ss:$16 sps:$4 sm:$0xff]  }
 0x280   : > { %6156 = vrcp.f32 %v1378_v48  ;;  %v1387_v29 = vadd.f32 1.0, %v6139_v51  ;;  %v6141_v28 = vpop.eup %6140  ;;  %v4791_v53 = vmul.f32 -1.442695, %v7537_v20  ;;  %v4792_v15 = vmul.f32 -1.442695, %v7548_v32 }
 0x281   : > { %6158 = vrcp.f32 %v1425_v52  ;;  %v1426_v45 = vadd.f32 1.0, %v6141_v28  ;;  %v1745_v17 = vrot.slane %v1744_v30, 1 }
 0x282   : > { %6160 = vpow2.f32 %v4772_v11  ;;  %3826 = vmatpush1.bf16.msra.mxu0 %v5490_v14  ;;  %4031 = vmatpush1.bf16.msra.mxu1 %v5493_v9  ;;  %v5511_v9 = vld [vmem:[%s8361_s5 + $0x3c8] ss:$16 sps:$4 sm:$0xff]  }
 0x283   : > { %v6143_v6 = vpop.eup %6142  ;;  %6162 = vrcp.f32 %v1387_v29  ;;  %3827 = vmatprep.subr.bf16.mxu0 %v5498_v1  ;;  %4032 = vmatprep.subr.bf16.mxu1 %v5501_v10  ;;  %v5519_v1 = vld [vmem:[%s8361_s5 + $0x3ec] ss:$16 sps:$4 sm:$0xff]   ;;  %v1707_v10 = vadd.f32 %v1706_v37, %v1705_v50 }
 0x284   : > { %v6145_v57 = vpop.eup %6144  ;;  %v1655_v5 = vmul.f32 %v6143_v6, %v7344_v21  ;;  %6164 = vpow2.f32 %v4781_v49  ;;  %v5510_v21 = vld [vmem:[%s8361_s5 + $0x3c4] ss:$16 sps:$4 sm:$0xff]   ;;  %v5514_v6 = vld [vmem:[%s8361_s5 + $0x3e0] ss:$16 sps:$4 sm:$0xff]  }
 0x285   : > { %v6147_v27 = vpop.eup %6146  ;;  %6166 = vrcp.f32 %v1426_v45  ;;  %v1388_v33 = vadd.f32 1.0, %v6145_v57  ;;  %v5525_v45 = vld [vmem:[%s8361_s5 + $0x40c] ss:$16 sps:$4 sm:$0xff]  }
 0x286   : > { %v6149_v3 = vpop.eup %6148  ;;  %v1752_v19 = vadd.f32 %v7481_v12, %v1655_v5  ;;  %v1397_v24 = vadd.f32 1.0, %v6147_v27  ;;  %6168 = vpow2.f32 %v4782_v16  ;;  %3828 = vmatpush1.bf16.msra.mxu0 %v5496_v63  ;;  %4033 = vmatpush1.bf16.msra.mxu1 %v5499_v47  ;;  %v5513_v12 = vld [vmem:[%s8361_s5 + $0x3cc] ss:$16 sps:$4 sm:$0xff]  }
 0x287   : > { %v6151_v39 = vpop.eup %6150  ;;  %6170 = vrcp.f32 %v1388_v33  ;;  %v1398_v7 = vadd.f32 1.0, %v6149_v3  ;;  %3829 = vmatprep.subr.bf16.mxu0 %v5504_v36  ;;  %4034 = vmatprep.subr.bf16.mxu1 %v5507_v44 }
 0x288   : > { %v6153_v35 = vpop.eup %6152  ;;  %6172 = vrcp.f32 %v1397_v24  ;;  %v1407_v2 = vadd.f32 1.0, %v6151_v39  ;;  %v5523_v24 = vld [vmem:[%s8361_s5 + $0x408] ss:$16 sps:$4 sm:$0xff]  }
 0x289   : > { %v6155_v14 = vpop.eup %6154  ;;  %v1617_v58 = vmul.f32 %v6153_v35, %v7361_v41  ;;  %6174 = vrcp.f32 %v1398_v7  ;;  %v5528_v7 = vld [vmem:[%s8361_s5 + $0x424] ss:$16 sps:$4 sm:$0xff]  }
 0x28a   : > { %v6157_v48 = vpop.eup %6156  ;;  %v1656_v11 = vmul.f32 %v6155_v14, %v7366_v43  ;;  %6176 = vrcp.f32 %v1407_v2  ;;  %3830 = vmatpush1.bf16.msra.mxu0 %v5502_v60  ;;  %4035 = vmatpush1.bf16.msra.mxu1 %v5505_v22  ;;  %v5516_v43 = vld [vmem:[%s8361_s5 + $0x3e4] ss:$16 sps:$4 sm:$0xff]   ;;  %v5520_v60 = vld [vmem:[%s8361_s5 + $0x400] ss:$16 sps:$4 sm:$0xff]  }
 0x28b   : > { %v6159_v56 = vpop.eup %6158  ;;  %v1774_v52 = vadd.f32 %v7495_v18, %v1617_v58  ;;  %v1618_v41 = vmul.f32 %v6157_v48, %v7370_v40  ;;  %6178 = vpow2.f32 %v4791_v53  ;;  %3831 = vmatprep.subr.bf16.mxu0 %v5510_v21  ;;  %4036 = vmatprep.subr.bf16.mxu1 %v5513_v12  ;;  %v1746_v18 = vadd.f32 %v1745_v17, %v1744_v30  ;;  %v5529_v58 = vld [vmem:[%s8361_s5 + $0x428] ss:$16 sps:$4 sm:$0xff]   ;;  %v5537_v48 = vld [vmem:[%s8361_s5 + $0x44c] ss:$16 sps:$4 sm:$0xff]  }
 0x28c   : > { %v6161_v51 = vpop.eup %6160  ;;  %v1765_v46 = vadd.f32 %v7504_v62, %v1656_v11  ;;  %v1665_v49 = vmul.f32 %v6159_v56, %v7380_v55  ;;  %6180 = vpow2.f32 %v4792_v15  ;;  %v5517_v55 = vld [vmem:[%s8361_s5 + $0x3e8] ss:$16 sps:$4 sm:$0xff]  }
 0x28d   : > { %v6163_v40 = vpop.eup %6162  ;;  %v1787_v29 = vadd.f32 %v7506_v59, %v1618_v41  ;;  %v1408_v28 = vadd.f32 1.0, %v6161_v51  ;;  %v1802_v59 = vmul.f32 0.015625, %v1707_v10  ;;  %v1805_v57 = vmul.f32 0.015625, %v1746_v18  ;;  %v5540_v41 = vld [vmem:[%s8361_s5 + $0x464] ss:$16 sps:$4 sm:$0xff]  }
 0x28e   : > { %v6165_v16 = vpop.eup %6164  ;;  %v7584_v63 = vadd.f32 %v1752_v19, %v1665_v49  ;;  %v1627_v47 = vmul.f32 %v6163_v40, %v7391_v61  ;;  %3832 = vmatpush1.bf16.msra.mxu0 %v5508_v8  ;;  %4037 = vmatpush1.bf16.msra.mxu1 %v5511_v9  ;;  %v5522_v61 = vld [vmem:[%s8361_s5 + $0x404] ss:$16 sps:$4 sm:$0xff]   ;;  %v5532_v9 = vld [vmem:[%s8361_s5 + $0x440] ss:$16 sps:$4 sm:$0xff]  }
 0x28f   : > { %v6167_v62 = vpop.eup %6166  ;;  %6182 = vrcp.f32 %v1408_v28  ;;  %v1417_v50 = vadd.f32 1.0, %v6165_v16  ;;  %3833 = vmatprep.subr.bf16.mxu0 %v5516_v43  ;;  %4038 = vmatprep.subr.bf16.mxu1 %v5519_v1  ;;  %v1815_v39 = vpack.c.bf16 %v1805_v57, %v1805_v57  ;;  %v5538_v49 = vld [vmem:[%s8361_s5 + $0x460] ss:$16 sps:$4 sm:$0xff]   ;;  %v5546_v18 = vld [vmem:[%s8361_s5 + $0x484] ss:$16 sps:$4 sm:$0xff]  }
 0x290   : > { %v6169_v54 = vpop.eup %6168  ;;  %v1775_v36 = vadd.f32 %v1774_v52, %v1627_v47  ;;  %v1666_v44 = vmul.f32 %v6167_v62, %v7406_v42  ;;  %v1812_v42 = vpack.c.bf16 %v1802_v59, %v1802_v59  ;;  %v5535_v52 = vld [vmem:[%s8361_s5 + $0x448] ss:$16 sps:$4 sm:$0xff]   ;;  %v5544_v28 = vld [vmem:[%s8361_s5 + $0x480] ss:$16 sps:$4 sm:$0xff]   ;;  %v5564_v57 = vld [vmem:[%s8361_s5 + $0x4e4] ss:$16 sps:$4 sm:$0xff]  }
 0x291   : > { %v6171_v5 = vpop.eup %6170  ;;  %6184 = vrcp.f32 %v1417_v50  ;;  %v1418_v34 = vadd.f32 1.0, %v6169_v54  ;;  %v5555_v50 = vld [vmem:[%s8361_s5 + $0x4ac] ss:$16 sps:$4 sm:$0xff]  }
 0x292   : > { %v6173_v30 = vpop.eup %6172  ;;  %v7600_v27 = vadd.f32 %v1765_v46, %v1666_v44  ;;  %v1628_v33 = vmul.f32 %v6171_v5, %v7418_v25  ;;  %3834 = vmatpush1.bf16.msra.mxu0 %v5514_v6  ;;  %4039 = vmatpush1.bf16.msra.mxu1 %v5517_v55  ;;  %v5547_v6 = vld [vmem:[%s8361_s5 + $0x488] ss:$16 sps:$4 sm:$0xff]   ;;  %v5552_v55 = vld [vmem:[%s8361_s5 + $0x4a4] ss:$16 sps:$4 sm:$0xff]   ;;  %v5561_v54 = vld [vmem:[%s8361_s5 + $0x4cc] ss:$16 sps:$4 sm:$0xff]  }
 0x293   : > { %v6175_v3 = vpop.eup %6174  ;;  %v1637_v19 = vmul.f32 %v6173_v30, %v7429_v0  ;;  %6186 = vrcp.f32 %v1418_v34  ;;  %3844 = vmatprep.subr.bf16.mxu0 %v5522_v61  ;;  %4049 = vmatprep.subr.bf16.mxu1 %v5525_v45  ;;  %v5531_v0 = vld [vmem:[%s8361_s5 + $0x42c] ss:$16 sps:$4 sm:$0xff]   ;;  %v5550_v61 = vld [vmem:[%s8361_s5 + $0x4a0] ss:$16 sps:$4 sm:$0xff]   ;;  %v5558_v45 = vld [vmem:[%s8361_s5 + $0x4c4] ss:$16 sps:$4 sm:$0xff]  }
 0x294   : > { %v6177_v22 = vpop.eup %6176  ;;  %v1788_v21 = vadd.f32 %v1787_v29, %v1628_v33  ;;  %v1638_v25 = vmul.f32 %v6175_v3, %v7441_v23  ;;  %v5526_v23 = vld [vmem:[%s8361_s5 + $0x420] ss:$16 sps:$4 sm:$0xff]   ;;  %v5559_v44 = vld [vmem:[%s8361_s5 + $0x4c8] ss:$16 sps:$4 sm:$0xff]   ;;  %v5567_v5 = vld [vmem:[%s8361_s5 + $0x4ec] ss:$16 sps:$4 sm:$0xff]  }
 0x295   : > { %v6179_v53 = vpop.eup %6178  ;;  %v1776_v12 = vadd.f32 %v1775_v36, %v1637_v19  ;;  %v1647_v37 = vmul.f32 %v6177_v22, %v7453_v13  ;;  %3836 = vmatmul.mubr.bf16.vlgmr.msra.gmra.mrb[44].mxu0 %v1812_v42  ;;  %4041 = vmatmul.mubr.bf16.vlgmr.msra.gmra.mrb[44].mxu1 %v1812_v42  ;;  %v5534_v13 = vld [vmem:[%s8361_s5 + $0x444] ss:$16 sps:$4 sm:$0xff]   ;;  %v5556_v36 = vld [vmem:[%s8361_s5 + $0x4c0] ss:$16 sps:$4 sm:$0xff]   ;;  %v5565_v30 = vld [vmem:[%s8361_s5 + $0x4e8] ss:$16 sps:$4 sm:$0xff]  }
 0x296   : > { %v6181_v35 = vpop.eup %6180  ;;  %v1789_v2 = vadd.f32 %v1788_v21, %v1638_v25  ;;  %v1427_v15 = vadd.f32 1.0, %v6179_v53  ;;  %3845 = vmatpush1.bf16.msra.mxu0 %v5520_v60  ;;  %3876 = vmatprep.mubr.bf16.mxu0 %v1815_v39  ;;  %v5562_v34 = vld [vmem:[%s8361_s5 + $0x4e0] ss:$16 sps:$4 sm:$0xff]   ;;  %v5570_v33 = vld [vmem:[%s8361_s5 + $0x504] ss:$16 sps:$4 sm:$0xff]   ;;  %v1728_v21 = vrot.slane %v7422_v31, 4 }
 0x297   : > { %v1777_v17 = vadd.f32 %v1776_v12, %v1647_v37  ;;  %v1428_v14 = vadd.f32 1.0, %v6181_v35  ;;  %4050 = vmatpush1.bf16.msra.mxu1 %v5523_v24  ;;  %4081 = vmatprep.mubr.bf16.mxu1 %v1815_v39  ;;  %v5573_v60 = vld [vmem:[%s8361_s5 + $0x50c] ss:$16 sps:$4 sm:$0xff]   ;;  %v5568_v3 = vld [vmem:[%s8361_s5 + $0x500] ss:$16 sps:$4 sm:$0xff]  }
 0x298   : > { %6188 = vrcp.f32 %v1427_v15  ;;  %3846 = vmatprep.subr.bf16.mxu0 %v5528_v7  ;;  %4051 = vmatprep.subr.bf16.mxu1 %v5531_v0  ;;  %v5571_v19 = vld [vmem:[%s8361_s5 + $0x508] ss:$16 sps:$4 sm:$0xff]   ;;  %v5576_v42 = vld [vmem:[%s8361_s5 + $0x524] ss:$16 sps:$4 sm:$0xff]   ;;  %v5579_v24 = vld [vmem:[%s8361_s5 + $0x52c] ss:$16 sps:$4 sm:$0xff]   ;;  %v1729_v12 = vadd.f32 %v1728_v21, %v7422_v31 }
 0x299   : > { %v6183_v11 = vpop.eup %6182  ;;  %6190 = vrcp.f32 %v1428_v14  ;;  %v5574_v22 = vld [vmem:[%s8361_s5 + $0x520] ss:$16 sps:$4 sm:$0xff]   ;;  %v5577_v25 = vld [vmem:[%s8361_s5 + $0x528] ss:$16 sps:$4 sm:$0xff]   ;;  %v5582_v39 = vld [vmem:[%s8361_s5 + $0x544] ss:$16 sps:$4 sm:$0xff]  }
 0x29a   : > { %v1648_v8 = vmul.f32 %v6183_v11, %v7476_v38  ;;  %3847 = vmatpush1.bf16.msra.mxu0 %v5526_v23  ;;  %v5543_v38 = vld [vmem:[%s8361_s5 + $0x46c] ss:$16 sps:$4 sm:$0xff]   ;;  %v1767_v0 = vrot.slane %v7600_v27, 4  ;;  %v5580_v53 = vld [vmem:[%s8361_s5 + $0x540] ss:$16 sps:$4 sm:$0xff]   ;;  %v1730_v23 = vrot.slane %v1729_v12, 2 }
 0x29b   : > { %v6185_v56 = vpop.eup %6184  ;;  %4052 = vmatpush1.bf16.msra.mxu1 %v5529_v58  ;;  %3848 = vmatprep.subr.bf16.mxu0 %v5534_v13  ;;  %v5585_v7 = vld [vmem:[%s8361_s5 + $0x54c] ss:$16 sps:$4 sm:$0xff]   ;;  %v5583_v37 = vld [vmem:[%s8361_s5 + $0x548] ss:$16 sps:$4 sm:$0xff]   ;;  %v5588_v35 = vld [vmem:[%s8361_s5 + $0x564] ss:$16 sps:$4 sm:$0xff]  }
 0x29c   : > { %v1790_v43 = vadd.f32 %v1789_v2, %v1648_v8  ;;  %v1657_v1 = vmul.f32 %v6185_v56, %v7486_v26  ;;  %4053 = vmatprep.subr.bf16.mxu1 %v5537_v48  ;;  %v5541_v26 = vld [vmem:[%s8361_s5 + $0x468] ss:$16 sps:$4 sm:$0xff]   ;;  %v5591_v2 = vld [vmem:[%s8361_s5 + $0x56c] ss:$16 sps:$4 sm:$0xff]   ;;  %v1768_v15 = vadd.f32 %v1767_v0, %v7600_v27  ;;  %v5586_v31 = vld [vmem:[%s8361_s5 + $0x560] ss:$16 sps:$4 sm:$0xff]   ;;  %v1731_v48 = vadd.f32 %v1730_v23, %v1729_v12 }
 0x29d   : > { %v6187_v10 = vpop.eup %6186  ;;  %v5594_v14 = vld [vmem:[%s8361_s5 + $0x584] ss:$16 sps:$4 sm:$0xff]   ;;  %v5597_v27 = vld [vmem:[%s8361_s5 + $0x58c] ss:$16 sps:$4 sm:$0xff]   ;;  %v5592_v13 = vld [vmem:[%s8361_s5 + $0x580] ss:$16 sps:$4 sm:$0xff]  }
 0x29e   : > { %v1778_v51 = vadd.f32 %v1777_v17, %v1657_v1  ;;  %v1658_v46 = vmul.f32 %v6187_v10, %v7514_v4  ;;  %3849 = vmatpush1.bf16.msra.mxu0 %v5532_v9  ;;  %v5549_v4 = vld [vmem:[%s8361_s5 + $0x48c] ss:$16 sps:$4 sm:$0xff]   ;;  %v5589_v17 = vld [vmem:[%s8361_s5 + $0x568] ss:$16 sps:$4 sm:$0xff]   ;;  %v1769_v58 = vrot.slane %v1768_v15, 2  ;;  %v1732_v1 = vrot.slane %v1731_v48, 1 }
 0x29f   : > { %4054 = vmatpush1.bf16.msra.mxu1 %v5535_v52  ;;  %3850 = vmatprep.subr.bf16.mxu0 %v5540_v41  ;;  %v5595_v11 = vld [vmem:[%s8361_s5 + $0x588] ss:$16 sps:$4 sm:$0xff]   ;;  %v5600_v8 = vld [vmem:[%s8361_s5 + $0x5a4] ss:$16 sps:$4 sm:$0xff]   ;;  %v5603_v9 = vld [vmem:[%s8361_s5 + $0x5ac] ss:$16 sps:$4 sm:$0xff]  }
 0x2a0   : > { %v1791_v40 = vadd.f32 %v1790_v43, %v1658_v46  ;;  %4055 = vmatprep.subr.bf16.mxu1 %v5543_v38  ;;  %v1770_v56 = vadd.f32 %v1769_v58, %v1768_v15  ;;  %v5598_v52 = vld [vmem:[%s8361_s5 + $0x5a0] ss:$16 sps:$4 sm:$0xff]   ;;  %v5601_v41 = vld [vmem:[%s8361_s5 + $0x5a8] ss:$16 sps:$4 sm:$0xff]   ;;  %v5606_v43 = vld [vmem:[%s8361_s5 + $0x5c4] ss:$16 sps:$4 sm:$0xff]  }
 0x2a1   : > { %v5609_v38 = vld [vmem:[%s8361_s5 + $0x5cc] ss:$16 sps:$4 sm:$0xff]   ;;  %v5607_v46 = vld [vmem:[%s8361_s5 + $0x5c8] ss:$16 sps:$4 sm:$0xff]   ;;  %v5648_v21 = vld [vmem:[%s8361_s5 + $0x6a4] ss:$16 sps:$4 sm:$0xff]  }
 0x2a2   : > { %v6189_v29 = vpop.eup %6188  ;;  %3851 = vmatpush1.bf16.msra.mxu0 %v5538_v49  ;;  %v1771_v10 = vrot.slane %v1770_v56, 1  ;;  %v5612_v49 = vld [vmem:[%s8361_s5 + $0x5e4] ss:$16 sps:$4 sm:$0xff]   ;;  %v5652_v12 = vld [vmem:[%s8361_s5 + $0x6c0] ss:$16 sps:$4 sm:$0xff]  }
 0x2a3   : > { %v6191_v16 = vpop.eup %6190  ;;  %v1667_v47 = vmul.f32 %v6189_v29, %v7537_v20  ;;  %4056 = vmatpush1.bf16.msra.mxu1 %v5541_v26  ;;  %3852 = vmatprep.subr.bf16.mxu0 %v5546_v18  ;;  %v1733_v26 = vadd.f32 %v1732_v1, %v1731_v48  ;;  %v5615_v18 = vld [vmem:[%s8361_s5 + $0x5ec] ss:$16 sps:$4 sm:$0xff]   ;;  %v5613_v29 = vld [vmem:[%s8361_s5 + $0x5e8] ss:$16 sps:$4 sm:$0xff]   ;;  %v5654_v0 = vld [vmem:[%s8361_s5 + $0x6c4] ss:$16 sps:$4 sm:$0xff]  }
 0x2a4   : > { %v1668_v62 = vmul.f32 %v6191_v16, %v7548_v32  ;;  %4057 = vmatprep.subr.bf16.mxu1 %v5549_v4  ;;  %v5553_v32 = vld [vmem:[%s8361_s5 + $0x4a8] ss:$16 sps:$4 sm:$0xff]   ;;  %v5610_v4 = vld [vmem:[%s8361_s5 + $0x5e0] ss:$16 sps:$4 sm:$0xff]   ;;  %v5618_v16 = vld [vmem:[%s8361_s5 + $0x604] ss:$16 sps:$4 sm:$0xff]  }
 0x2a5   : > { %v7671_v59 = vadd.f32 %v1778_v51, %v1667_v47  ;;  %v5604_v51 = vld [vmem:[%s8361_s5 + $0x5c0] ss:$16 sps:$4 sm:$0xff]   ;;  %v5621_v47 = vld [vmem:[%s8361_s5 + $0x60c] ss:$16 sps:$4 sm:$0xff]   ;;  %v5666_v23 = vld [vmem:[%s8361_s5 + $0x704] ss:$16 sps:$4 sm:$0xff]  }
 0x2a6   : > { %v7673_v20 = vadd.f32 %v1791_v40, %v1668_v62  ;;  %3853 = vmatpush1.bf16.msra.mxu0 %v5544_v28  ;;  %v1772_v40 = vadd.f32 %v1771_v10, %v1770_v56  ;;  %v1804_v28 = vmul.f32 0.015625, %v1733_v26  ;;  %v5658_v15 = vld [vmem:[%s8361_s5 + $0x6e0] ss:$16 sps:$4 sm:$0xff]   ;;  %v5672_v58 = vld [vmem:[%s8361_s5 + $0x724] ss:$16 sps:$4 sm:$0xff]  }
 0x2a7   : > { %4058 = vmatpush1.bf16.msra.mxu1 %v5547_v6  ;;  %3854 = vmatprep.subr.bf16.mxu0 %v5552_v55  ;;  %v5616_v55 = vld [vmem:[%s8361_s5 + $0x600] ss:$16 sps:$4 sm:$0xff]   ;;  %v5681_v56 = vld [vmem:[%s8361_s5 + $0x74c] ss:$16 sps:$4 sm:$0xff]   ;;  %v5679_v1 = vld [vmem:[%s8361_s5 + $0x748] ss:$16 sps:$4 sm:$0xff]  }
 0x2a8   : > { %4059 = vmatprep.subr.bf16.mxu1 %v5555_v50  ;;  %v1807_v6 = vmul.f32 0.015625, %v1772_v40  ;;  %v1814_v62 = vpack.c.bf16 %v1804_v28, %v1804_v28  ;;  %v5619_v50 = vld [vmem:[%s8361_s5 + $0x608] ss:$16 sps:$4 sm:$0xff]   ;;  %v5670_v48 = vld [vmem:[%s8361_s5 + $0x720] ss:$16 sps:$4 sm:$0xff]  }
 0x2a9   : > { %v5687_v10 = vld [vmem:[%s8361_s5 + $0x76c] ss:$16 sps:$4 sm:$0xff]   ;;  %v5690_v26 = vld [vmem:[%s8361_s5 + $0x784] ss:$16 sps:$4 sm:$0xff]   ;;  %v5688_v40 = vld [vmem:[%s8361_s5 + $0x780] ss:$16 sps:$4 sm:$0xff]  }
 0x2aa   : > { %3855 = vmatpush1.bf16.msra.mxu0 %v5550_v61  ;;  %v5624_v61 = vld [vmem:[%s8361_s5 + $0x624] ss:$16 sps:$4 sm:$0xff]  }
 0x2ab   : > { %4060 = vmatpush1.bf16.msra.mxu1 %v5553_v32  ;;  %3856 = vmatprep.subr.bf16.mxu0 %v5558_v45  ;;  %v1817_v32 = vpack.c.bf16 %v1807_v6, %v1807_v6  ;;  %v5627_v45 = vld [vmem:[%s8361_s5 + $0x62c] ss:$16 sps:$4 sm:$0xff]   ;;  %v5696_v28 = vld [vmem:[%s8361_s5 + $0x7a4] ss:$16 sps:$4 sm:$0xff]   ;;  %v5694_v6 = vld [vmem:[%s8361_s5 + $0x7a0] ss:$16 sps:$4 sm:$0xff]  }
 0x2ac   : > { %4061 = vmatprep.subr.bf16.mxu1 %v5561_v54  ;;  %v5622_v54 = vld [vmem:[%s8361_s5 + $0x620] ss:$16 sps:$4 sm:$0xff]  }
 0x2ae   : > { %3857 = vmatpush1.bf16.msra.mxu0 %v5556_v36  ;;  %v5625_v36 = vld [vmem:[%s8361_s5 + $0x628] ss:$16 sps:$4 sm:$0xff]  }
 0x2af   : > { %4062 = vmatpush1.bf16.msra.mxu1 %v5559_v44  ;;  %3858 = vmatprep.subr.bf16.mxu0 %v5564_v57  ;;  %v5630_v44 = vld [vmem:[%s8361_s5 + $0x644] ss:$16 sps:$4 sm:$0xff]   ;;  %v5633_v57 = vld [vmem:[%s8361_s5 + $0x64c] ss:$16 sps:$4 sm:$0xff]  }
 0x2b0   : > { %4063 = vmatprep.subr.bf16.mxu1 %v5567_v5  ;;  %v5628_v5 = vld [vmem:[%s8361_s5 + $0x640] ss:$16 sps:$4 sm:$0xff]  }
 0x2b2   : > { %3859 = vmatpush1.bf16.msra.mxu0 %v5562_v34  ;;  %v5631_v34 = vld [vmem:[%s8361_s5 + $0x648] ss:$16 sps:$4 sm:$0xff]  }
 0x2b3   : > { %4064 = vmatpush1.bf16.msra.mxu1 %v5565_v30  ;;  %3860 = vmatprep.subr.bf16.mxu0 %v5570_v33  ;;  %v5636_v30 = vld [vmem:[%s8361_s5 + $0x664] ss:$16 sps:$4 sm:$0xff]   ;;  %v5639_v33 = vld [vmem:[%s8361_s5 + $0x66c] ss:$16 sps:$4 sm:$0xff]  }
 0x2b4   : > { %4065 = vmatprep.subr.bf16.mxu1 %v5573_v60  ;;  %v5634_v60 = vld [vmem:[%s8361_s5 + $0x660] ss:$16 sps:$4 sm:$0xff]  }
 0x2b6   : > { %3861 = vmatpush1.bf16.msra.mxu0 %v5568_v3  ;;  %v5637_v3 = vld [vmem:[%s8361_s5 + $0x668] ss:$16 sps:$4 sm:$0xff]  }
 0x2b7   : > { %4066 = vmatpush1.bf16.msra.mxu1 %v5571_v19  ;;  %3862 = vmatprep.subr.bf16.mxu0 %v5576_v42  ;;  %v5642_v19 = vld [vmem:[%s8361_s5 + $0x684] ss:$16 sps:$4 sm:$0xff]   ;;  %v5645_v42 = vld [vmem:[%s8361_s5 + $0x68c] ss:$16 sps:$4 sm:$0xff]  }
 0x2b8   : > { %4067 = vmatprep.subr.bf16.mxu1 %v5579_v24  ;;  %v5640_v24 = vld [vmem:[%s8361_s5 + $0x680] ss:$16 sps:$4 sm:$0xff]  }
 0x2ba   : > { %3863 = vmatpush1.bf16.msra.mxu0 %v5574_v22  ;;  %v5643_v22 = vld [vmem:[%s8361_s5 + $0x688] ss:$16 sps:$4 sm:$0xff]  }
 0x2bb   : > { %4068 = vmatpush1.bf16.msra.mxu1 %v5577_v25  ;;  %3864 = vmatprep.subr.bf16.mxu0 %v5582_v39  ;;  %v5651_v25 = vld [vmem:[%s8361_s5 + $0x6ac] ss:$16 sps:$4 sm:$0xff]   ;;  %v5646_v39 = vld [vmem:[%s8361_s5 + $0x6a0] ss:$16 sps:$4 sm:$0xff]  }
 0x2bc   : > { %4069 = vmatprep.subr.bf16.mxu1 %v5585_v7  ;;  %v5649_v7 = vld [vmem:[%s8361_s5 + $0x6a8] ss:$16 sps:$4 sm:$0xff]  }
 0x2be   : > { %3865 = vmatpush1.bf16.msra.mxu0 %v5580_v53  ;;  %v5657_v53 = vld [vmem:[%s8361_s5 + $0x6cc] ss:$16 sps:$4 sm:$0xff]  }
 0x2bf   : > { %4070 = vmatpush1.bf16.msra.mxu1 %v5583_v37  ;;  %3866 = vmatprep.subr.bf16.mxu0 %v5588_v35  ;;  %v5655_v37 = vld [vmem:[%s8361_s5 + $0x6c8] ss:$16 sps:$4 sm:$0xff]   ;;  %v5660_v35 = vld [vmem:[%s8361_s5 + $0x6e4] ss:$16 sps:$4 sm:$0xff]  }
 0x2c0   : > { %4071 = vmatprep.subr.bf16.mxu1 %v5591_v2  ;;  %v5663_v2 = vld [vmem:[%s8361_s5 + $0x6ec] ss:$16 sps:$4 sm:$0xff]  }
 0x2c2   : > { %3867 = vmatpush1.bf16.msra.mxu0 %v5586_v31  ;;  %v5661_v31 = vld [vmem:[%s8361_s5 + $0x6e8] ss:$16 sps:$4 sm:$0xff]  }
 0x2c3   : > { %4072 = vmatpush1.bf16.msra.mxu1 %v5589_v17  ;;  %3868 = vmatprep.subr.bf16.mxu0 %v5594_v14  ;;  %v5669_v17 = vld [vmem:[%s8361_s5 + $0x70c] ss:$16 sps:$4 sm:$0xff]   ;;  %v5664_v14 = vld [vmem:[%s8361_s5 + $0x700] ss:$16 sps:$4 sm:$0xff]  }
 0x2c4   : > { %4073 = vmatprep.subr.bf16.mxu1 %v5597_v27  ;;  %v5667_v27 = vld [vmem:[%s8361_s5 + $0x708] ss:$16 sps:$4 sm:$0xff]  }
 0x2c6   : > { %3869 = vmatpush1.bf16.msra.mxu0 %v5592_v13  ;;  %v5675_v13 = vld [vmem:[%s8361_s5 + $0x72c] ss:$16 sps:$4 sm:$0xff]  }
 0x2c7   : > { %4074 = vmatpush1.bf16.msra.mxu1 %v5595_v11  ;;  %3870 = vmatprep.subr.bf16.mxu0 %v5600_v8  ;;  %v1754_v11 = vrot.slane %v7584_v63, 4  ;;  %v5673_v8 = vld [vmem:[%s8361_s5 + $0x728] ss:$16 sps:$4 sm:$0xff]  }
 0x2c8   : > { %4075 = vmatprep.subr.bf16.mxu1 %v5603_v9  ;;  %v5678_v9 = vld [vmem:[%s8361_s5 + $0x744] ss:$16 sps:$4 sm:$0xff]  }
 0x2ca   : > { %3871 = vmatpush1.bf16.msra.mxu0 %v5598_v52  ;;  %v1793_v52 = vrot.slane %v7673_v20, 4 }
 0x2cb   : > { %4076 = vmatpush1.bf16.msra.mxu1 %v5601_v41  ;;  %3872 = vmatprep.subr.bf16.mxu0 %v5606_v43  ;;  %v5676_v41 = vld [vmem:[%s8361_s5 + $0x740] ss:$16 sps:$4 sm:$0xff]   ;;  %v1755_v43 = vadd.f32 %v1754_v11, %v7584_v63 }
 0x2cc   : > { %4077 = vmatprep.subr.bf16.mxu1 %v5609_v38  ;;  %v5684_v38 = vld [vmem:[%s8361_s5 + $0x764] ss:$16 sps:$4 sm:$0xff]   ;;  %v5682_v63 = vld [vmem:[%s8361_s5 + $0x760] ss:$16 sps:$4 sm:$0xff]  }
 0x2cd   : > { %v5742_v11 = vld [vmem:[%s8361_s5 + $0x8a0] ss:$16 sps:$4 sm:$0xff]  }
 0x2ce   : > { %3873 = vmatpush1.bf16.msra.mxu0 %v5604_v51  ;;  %v1794_v51 = vadd.f32 %v1793_v52, %v7673_v20  ;;  %v5693_v20 = vld [vmem:[%s8361_s5 + $0x78c] ss:$16 sps:$4 sm:$0xff]   ;;  %v5748_v52 = vld [vmem:[%s8361_s5 + $0x8c0] ss:$16 sps:$4 sm:$0xff]  }
 0x2cf   : > { %4078 = vmatpush1.bf16.msra.mxu1 %v5607_v46  ;;  %3874 = vmatprep.subr.bf16.mxu0 %v5612_v49  ;;  %v1756_v46 = vrot.slane %v1755_v43, 2  ;;  %v5685_v49 = vld [vmem:[%s8361_s5 + $0x768] ss:$16 sps:$4 sm:$0xff]  }
 0x2d0   : > { %4079 = vmatprep.subr.bf16.mxu1 %v5615_v18  ;;  %v1795_v18 = vrot.slane %v1794_v51, 2 }
 0x2d2   : > { %3875 = vmatpush1.bf16.msra.mxu0 %v5610_v4  ;;  %v1757_v4 = vadd.f32 %v1756_v46, %v1755_v43  ;;  %v5756_v43 = vld [vmem:[%s8361_s5 + $0x8e4] ss:$16 sps:$4 sm:$0xff]   ;;  %v5760_v46 = vld [vmem:[%s8361_s5 + $0x900] ss:$16 sps:$4 sm:$0xff]  }
 0x2d3   : > { %4080 = vmatpush1.bf16.msra.mxu1 %v5613_v29  ;;  %3885 = vmatprep.subr.bf16.mxu0 %v5618_v16  ;;  %v5691_v29 = vld [vmem:[%s8361_s5 + $0x788] ss:$16 sps:$4 sm:$0xff]   ;;  %v5699_v16 = vld [vmem:[%s8361_s5 + $0x7ac] ss:$16 sps:$4 sm:$0xff]  }
 0x2d4   : > { %4090 = vmatprep.subr.bf16.mxu1 %v5621_v47  ;;  %v1796_v47 = vadd.f32 %v1795_v18, %v1794_v51  ;;  %v5762_v51 = vld [vmem:[%s8361_s5 + $0x904] ss:$16 sps:$4 sm:$0xff]   ;;  %v5766_v18 = vld [vmem:[%s8361_s5 + $0x920] ss:$16 sps:$4 sm:$0xff]  }
 0x2d5   : > { %3877 = vmatmul.mubr.bf16.vlgmr.msra.gmra.mrb[44].mxu0 %v1814_v62 }
 0x2d6   : > { %4082 = vmatmul.mubr.bf16.vlgmr.msra.gmra.mrb[44].mxu1 %v1814_v62  ;;  %3886 = vmatpush1.bf16.msra.mxu0 %v5616_v55  ;;  %v5697_v55 = vld [vmem:[%s8361_s5 + $0x7a8] ss:$16 sps:$4 sm:$0xff]   ;;  %v5702_v62 = vld [vmem:[%s8361_s5 + $0x7c4] ss:$16 sps:$4 sm:$0xff]  }
 0x2d7   : > { %3917 = vmatprep.mubr.bf16.mxu0 %v1817_v32  ;;  %4091 = vmatpush1.bf16.msra.mxu1 %v5619_v50  ;;  %v1758_v50 = vrot.slane %v1757_v4, 1 }
 0x2d8   : > { %4122 = vmatprep.mubr.bf16.mxu1 %v1817_v32  ;;  %3887 = vmatprep.subr.bf16.mxu0 %v5624_v61  ;;  %v5705_v61 = vld [vmem:[%s8361_s5 + $0x7cc] ss:$16 sps:$4 sm:$0xff]   ;;  %v1797_v32 = vrot.slane %v1796_v47, 1 }
 0x2d9   : > { %4092 = vmatprep.subr.bf16.mxu1 %v5627_v45  ;;  %v5700_v45 = vld [vmem:[%s8361_s5 + $0x7c0] ss:$16 sps:$4 sm:$0xff]  }
 0x2da   : > { %3888 = vmatpush1.bf16.msra.mxu0 %v5622_v54  ;;  %v5703_v54 = vld [vmem:[%s8361_s5 + $0x7c8] ss:$16 sps:$4 sm:$0xff]  }
 0x2db   : > { %4093 = vmatpush1.bf16.msra.mxu1 %v5625_v36  ;;  %3889 = vmatprep.subr.bf16.mxu0 %v5630_v44  ;;  %v5708_v36 = vld [vmem:[%s8361_s5 + $0x7e4] ss:$16 sps:$4 sm:$0xff]   ;;  %v1759_v44 = vadd.f32 %v1758_v50, %v1757_v4  ;;  %v5769_v4 = vld [vmem:[%s8361_s5 + $0x928] ss:$16 sps:$4 sm:$0xff]  }
 0x2dc   : > { %4094 = vmatprep.subr.bf16.mxu1 %v5633_v57  ;;  %v5711_v57 = vld [vmem:[%s8361_s5 + $0x7ec] ss:$16 sps:$4 sm:$0xff]  }
 0x2de   : > { %3890 = vmatpush1.bf16.msra.mxu0 %v5628_v5  ;;  %v1798_v5 = vadd.f32 %v1797_v32, %v1796_v47  ;;  %v5786_v32 = vld [vmem:[%s8361_s5 + $0x984] ss:$16 sps:$4 sm:$0xff]  }
 0x2df   : > { %4095 = vmatpush1.bf16.msra.mxu1 %v5631_v34  ;;  %3891 = vmatprep.subr.bf16.mxu0 %v5636_v30  ;;  %v5706_v34 = vld [vmem:[%s8361_s5 + $0x7e0] ss:$16 sps:$4 sm:$0xff]   ;;  %v5709_v30 = vld [vmem:[%s8361_s5 + $0x7e8] ss:$16 sps:$4 sm:$0xff]  }
 0x2e0   : > { %4096 = vmatprep.subr.bf16.mxu1 %v5639_v33  ;;  %v1806_v33 = vmul.f32 0.015625, %v1759_v44  ;;  %v5787_v44 = vld [vmem:[%s8361_s5 + $0x988] ss:$16 sps:$4 sm:$0xff]  }
 0x2e2   : > { %3892 = vmatpush1.bf16.msra.mxu0 %v5634_v60  ;;  %v5714_v60 = vld [vmem:[%s8361_s5 + $0x804] ss:$16 sps:$4 sm:$0xff]  }
 0x2e3   : > { %4097 = vmatpush1.bf16.msra.mxu1 %v5637_v3  ;;  %3893 = vmatprep.subr.bf16.mxu0 %v5642_v19  ;;  %v5717_v3 = vld [vmem:[%s8361_s5 + $0x80c] ss:$16 sps:$4 sm:$0xff]   ;;  %v1809_v19 = vmul.f32 0.015625, %v1798_v5 }
 0x2e4   : > { %4098 = vmatprep.subr.bf16.mxu1 %v5645_v42  ;;  %v5712_v42 = vld [vmem:[%s8361_s5 + $0x800] ss:$16 sps:$4 sm:$0xff]   ;;  %v5795_v5 = vld [vmem:[%s8361_s5 + $0x9ac] ss:$16 sps:$4 sm:$0xff]  }
 0x2e6   : > { %3894 = vmatpush1.bf16.msra.mxu0 %v5640_v24  ;;  %v1816_v24 = vpack.c.bf16 %v1806_v33, %v1806_v33  ;;  %v5798_v33 = vld [vmem:[%s8361_s5 + $0x9c4] ss:$16 sps:$4 sm:$0xff]  }
 0x2e7   : > { %4099 = vmatpush1.bf16.msra.mxu1 %v5643_v22  ;;  %3895 = vmatprep.subr.bf16.mxu0 %v5648_v21  ;;  %v5715_v22 = vld [vmem:[%s8361_s5 + $0x808] ss:$16 sps:$4 sm:$0xff]   ;;  %v5720_v21 = vld [vmem:[%s8361_s5 + $0x824] ss:$16 sps:$4 sm:$0xff]  }
 0x2e8   : > { %4100 = vmatprep.subr.bf16.mxu1 %v5651_v25  ;;  %v1819_v25 = vpack.c.bf16 %v1809_v19, %v1809_v19  ;;  %v5796_v19 = vld [vmem:[%s8361_s5 + $0x9c0] ss:$16 sps:$4 sm:$0xff]  }
 0x2ea   : > { %3896 = vmatpush1.bf16.msra.mxu0 %v5646_v39  ;;  %v5723_v39 = vld [vmem:[%s8361_s5 + $0x82c] ss:$16 sps:$4 sm:$0xff]  }
 0x2eb   : > { %4101 = vmatpush1.bf16.msra.mxu1 %v5649_v7  ;;  %3897 = vmatprep.subr.bf16.mxu0 %v5654_v0  ;;  %v5718_v7 = vld [vmem:[%s8361_s5 + $0x820] ss:$16 sps:$4 sm:$0xff]   ;;  %v5721_v0 = vld [vmem:[%s8361_s5 + $0x828] ss:$16 sps:$4 sm:$0xff]  }
 0x2ec   : > { %4102 = vmatprep.subr.bf16.mxu1 %v5657_v53  ;;  %v5726_v53 = vld [vmem:[%s8361_s5 + $0x844] ss:$16 sps:$4 sm:$0xff]  }
 0x2ee   : > { %3898 = vmatpush1.bf16.msra.mxu0 %v5652_v12  ;;  %v5729_v12 = vld [vmem:[%s8361_s5 + $0x84c] ss:$16 sps:$4 sm:$0xff]  }
 0x2ef   : > { %4103 = vmatpush1.bf16.msra.mxu1 %v5655_v37  ;;  %3899 = vmatprep.subr.bf16.mxu0 %v5660_v35  ;;  %v5724_v37 = vld [vmem:[%s8361_s5 + $0x840] ss:$16 sps:$4 sm:$0xff]   ;;  %v5727_v35 = vld [vmem:[%s8361_s5 + $0x848] ss:$16 sps:$4 sm:$0xff]  }
 0x2f0   : > { %4104 = vmatprep.subr.bf16.mxu1 %v5663_v2  ;;  %v5732_v2 = vld [vmem:[%s8361_s5 + $0x864] ss:$16 sps:$4 sm:$0xff]  }
 0x2f2   : > { %3900 = vmatpush1.bf16.msra.mxu0 %v5658_v15  ;;  %v5735_v15 = vld [vmem:[%s8361_s5 + $0x86c] ss:$16 sps:$4 sm:$0xff]  }
 0x2f3   : > { %4105 = vmatpush1.bf16.msra.mxu1 %v5661_v31  ;;  %3901 = vmatprep.subr.bf16.mxu0 %v5666_v23  ;;  %v5730_v31 = vld [vmem:[%s8361_s5 + $0x860] ss:$16 sps:$4 sm:$0xff]   ;;  %v5733_v23 = vld [vmem:[%s8361_s5 + $0x868] ss:$16 sps:$4 sm:$0xff]  }
 0x2f4   : > { %4106 = vmatprep.subr.bf16.mxu1 %v5669_v17  ;;  %v5738_v17 = vld [vmem:[%s8361_s5 + $0x884] ss:$16 sps:$4 sm:$0xff]  }
 0x2f6   : > { %3902 = vmatpush1.bf16.msra.mxu0 %v5664_v14  ;;  %v5741_v14 = vld [vmem:[%s8361_s5 + $0x88c] ss:$16 sps:$4 sm:$0xff]  }
 0x2f7   : > { %4107 = vmatpush1.bf16.msra.mxu1 %v5667_v27  ;;  %3903 = vmatprep.subr.bf16.mxu0 %v5672_v58  ;;  %v5736_v27 = vld [vmem:[%s8361_s5 + $0x880] ss:$16 sps:$4 sm:$0xff]   ;;  %v5739_v58 = vld [vmem:[%s8361_s5 + $0x888] ss:$16 sps:$4 sm:$0xff]  }
 0x2f8   : > { %4108 = vmatprep.subr.bf16.mxu1 %v5675_v13  ;;  %v5744_v13 = vld [vmem:[%s8361_s5 + $0x8a4] ss:$16 sps:$4 sm:$0xff]  }
 0x2fa   : > { %3904 = vmatpush1.bf16.msra.mxu0 %v5670_v48  ;;  %v5747_v48 = vld [vmem:[%s8361_s5 + $0x8ac] ss:$16 sps:$4 sm:$0xff]  }
 0x2fb   : > { %4109 = vmatpush1.bf16.msra.mxu1 %v5673_v8  ;;  %3905 = vmatprep.subr.bf16.mxu0 %v5678_v9  ;;  %v5745_v8 = vld [vmem:[%s8361_s5 + $0x8a8] ss:$16 sps:$4 sm:$0xff]   ;;  %v5750_v9 = vld [vmem:[%s8361_s5 + $0x8c4] ss:$16 sps:$4 sm:$0xff]  }
 0x2fc   : > { %4110 = vmatprep.subr.bf16.mxu1 %v5681_v56  ;;  %v5753_v56 = vld [vmem:[%s8361_s5 + $0x8cc] ss:$16 sps:$4 sm:$0xff]  }
 0x2fe   : > { %3906 = vmatpush1.bf16.msra.mxu0 %v5676_v41  ;;  %v5751_v41 = vld [vmem:[%s8361_s5 + $0x8c8] ss:$16 sps:$4 sm:$0xff]  }
 0x2ff   : > { %4111 = vmatpush1.bf16.msra.mxu1 %v5679_v1  ;;  %3907 = vmatprep.subr.bf16.mxu0 %v5684_v38  ;;  %v5759_v1 = vld [vmem:[%s8361_s5 + $0x8ec] ss:$16 sps:$4 sm:$0xff]   ;;  %v5754_v38 = vld [vmem:[%s8361_s5 + $0x8e0] ss:$16 sps:$4 sm:$0xff]  }
 0x300   : > { %4112 = vmatprep.subr.bf16.mxu1 %v5687_v10  ;;  %v5757_v10 = vld [vmem:[%s8361_s5 + $0x8e8] ss:$16 sps:$4 sm:$0xff]  }
 0x302   : > { %3908 = vmatpush1.bf16.msra.mxu0 %v5682_v63  ;;  %v5765_v63 = vld [vmem:[%s8361_s5 + $0x90c] ss:$16 sps:$4 sm:$0xff]  }
 0x303   : > { %4113 = vmatpush1.bf16.msra.mxu1 %v5685_v49  ;;  %3909 = vmatprep.subr.bf16.mxu0 %v5690_v26  ;;  %v5763_v49 = vld [vmem:[%s8361_s5 + $0x908] ss:$16 sps:$4 sm:$0xff]   ;;  %v5768_v26 = vld [vmem:[%s8361_s5 + $0x924] ss:$16 sps:$4 sm:$0xff]  }
 0x304   : > { %4114 = vmatprep.subr.bf16.mxu1 %v5693_v20  ;;  %v5771_v20 = vld [vmem:[%s8361_s5 + $0x92c] ss:$16 sps:$4 sm:$0xff]  }
 0x306   : > { %3910 = vmatpush1.bf16.msra.mxu0 %v5688_v40  ;;  %v1780_v40 = vrot.slane %v7671_v59, 4 }
 0x307   : > { %4115 = vmatpush1.bf16.msra.mxu1 %v5691_v29  ;;  %3911 = vmatprep.subr.bf16.mxu0 %v5696_v28  ;;  %v5774_v29 = vld [vmem:[%s8361_s5 + $0x944] ss:$16 sps:$4 sm:$0xff]   ;;  %v5777_v28 = vld [vmem:[%s8361_s5 + $0x94c] ss:$16 sps:$4 sm:$0xff]  }
 0x308   : > { %4116 = vmatprep.subr.bf16.mxu1 %v5699_v16  ;;  %v5772_v16 = vld [vmem:[%s8361_s5 + $0x940] ss:$16 sps:$4 sm:$0xff]   ;;  %v1781_v47 = vadd.f32 %v1780_v40, %v7671_v59  ;;  %v5839_v40 = vld [vmem:[%s8363_s7 + $0xb8] sm:$0xff]  }
 0x309   : > { %v5778_v59 = vld [vmem:[%s8361_s5 + $0x960] ss:$16 sps:$4 sm:$0xff]  }
 0x30a   : > { %3912 = vmatpush1.bf16.msra.mxu0 %v5694_v6  ;;  %v5775_v6 = vld [vmem:[%s8361_s5 + $0x948] ss:$16 sps:$4 sm:$0xff]   ;;  %v1782_v50 = vrot.slane %v1781_v47, 2 }
 0x30b   : > { %4117 = vmatpush1.bf16.msra.mxu1 %v5697_v55  ;;  %3913 = vmatprep.subr.bf16.mxu0 %v5702_v62  ;;  %v5780_v55 = vld [vmem:[%s8361_s5 + $0x964] ss:$16 sps:$4 sm:$0xff]   ;;  %v5783_v62 = vld [vmem:[%s8361_s5 + $0x96c] ss:$16 sps:$4 sm:$0xff]  }
 0x30c   : > { %4118 = vmatprep.subr.bf16.mxu1 %v5705_v61  ;;  %v5781_v61 = vld [vmem:[%s8361_s5 + $0x968] ss:$16 sps:$4 sm:$0xff]  }
 0x30e   : > { %3914 = vmatpush1.bf16.msra.mxu0 %v5700_v45  ;;  %v5789_v45 = vld [vmem:[%s8361_s5 + $0x98c] ss:$16 sps:$4 sm:$0xff]  }
 0x30f   : > { %4119 = vmatpush1.bf16.msra.mxu1 %v5703_v54  ;;  %3915 = vmatprep.subr.bf16.mxu0 %v5708_v36  ;;  %v5784_v54 = vld [vmem:[%s8361_s5 + $0x980] ss:$16 sps:$4 sm:$0xff]   ;;  %v1783_v36 = vadd.f32 %v1782_v50, %v1781_v47 }
 0x310   : > { %4120 = vmatprep.subr.bf16.mxu1 %v5711_v57  ;;  %v5792_v57 = vld [vmem:[%s8361_s5 + $0x9a4] ss:$16 sps:$4 sm:$0xff]  }
 0x312   : > { %3916 = vmatpush1.bf16.msra.mxu0 %v5706_v34  ;;  %v5790_v34 = vld [vmem:[%s8361_s5 + $0x9a0] ss:$16 sps:$4 sm:$0xff]  }
 0x313   : > { %4121 = vmatpush1.bf16.msra.mxu1 %v5709_v30  ;;  %3926 = vmatprep.subr.bf16.mxu0 %v5714_v60  ;;  %v5793_v30 = vld [vmem:[%s8361_s5 + $0x9a8] ss:$16 sps:$4 sm:$0xff]   ;;  %v1784_v60 = vrot.slane %v1783_v36, 1 }
 0x314   : > { %4131 = vmatprep.subr.bf16.mxu1 %v5717_v3  ;;  %v5801_v3 = vld [vmem:[%s8361_s5 + $0x9cc] ss:$16 sps:$4 sm:$0xff]  }
 0x315   : > { %3918 = vmatmul.mubr.bf16.vlgmr.msra.gmra.mrb[44].mxu0 %v1816_v24 }
 0x316   : > { %4123 = vmatmul.mubr.bf16.vlgmr.msra.gmra.mrb[44].mxu1 %v1816_v24  ;;  %3927 = vmatpush1.bf16.msra.mxu0 %v5712_v42  ;;  %v5799_v42 = vld [vmem:[%s8361_s5 + $0x9c8] ss:$16 sps:$4 sm:$0xff]   ;;  %v5804_v24 = vld [vmem:[%s8361_s5 + $0x9e4] ss:$16 sps:$4 sm:$0xff]  }
 0x317   : > { %3958 = vmatprep.mubr.bf16.mxu0 %v1819_v25  ;;  %4132 = vmatpush1.bf16.msra.mxu1 %v5715_v22  ;;  %v1785_v22 = vadd.f32 %v1784_v60, %v1783_v36 }
 0x318   : > { %4163 = vmatprep.mubr.bf16.mxu1 %v1819_v25  ;;  %3928 = vmatprep.subr.bf16.mxu0 %v5720_v21  ;;  %v5807_v21 = vld [vmem:[%s8361_s5 + $0x9ec] ss:$16 sps:$4 sm:$0xff]   ;;  %v5802_v25 = vld [vmem:[%s8361_s5 + $0x9e0] ss:$16 sps:$4 sm:$0xff]  }
 0x319   : > { %4133 = vmatprep.subr.bf16.mxu1 %v5723_v39  ;;  %v5805_v39 = vld [vmem:[%s8361_s5 + $0x9e8] ss:$16 sps:$4 sm:$0xff]  }
 0x31a   : > { %3929 = vmatpush1.bf16.msra.mxu0 %v5718_v7  ;;  %v1808_v7 = vmul.f32 0.015625, %v1785_v22 }
 0x31b   : > { %4134 = vmatpush1.bf16.msra.mxu1 %v5721_v0  ;;  %3930 = vmatprep.subr.bf16.mxu0 %v5726_v53  ;;  %v5808_v0 = vld [vmem:[%s8363_s7 + $0x40] sm:$0xff]  }
 0x31c   : > { %4135 = vmatprep.subr.bf16.mxu1 %v5729_v12  ;;  %v5809_v53 = vld [vmem:[%s8363_s7 + $0xc0] sm:$0xff]  }
 0x31d   : > { %v5810_v12 = vld [vmem:[%s8363_s7] sm:$0xff]  }
 0x31e   : > { %3931 = vmatpush1.bf16.msra.mxu0 %v5724_v37  ;;  %v1818_v37 = vpack.c.bf16 %v1808_v7, %v1808_v7 }
 0x31f   : > { %4136 = vmatpush1.bf16.msra.mxu1 %v5727_v35  ;;  %3932 = vmatprep.subr.bf16.mxu0 %v5732_v2  ;;  %v5811_v35 = vld [vmem:[%s8363_s7 + $0x80] sm:$0xff]   ;;  %v5812_v2 = vld [vmem:[%s8363_s7 + $0x48] sm:$0xff]  }
 0x320   : > { %4137 = vmatprep.subr.bf16.mxu1 %v5735_v15  ;;  %v5813_v15 = vld [vmem:[%s8363_s7 + $0xc8] sm:$0xff]  }
 0x322   : > { %3933 = vmatpush1.bf16.msra.mxu0 %v5730_v31  ;;  %v5814_v31 = vld [vmem:[%s8363_s7 + $0x8] sm:$0xff]  }
 0x323   : > { %4138 = vmatpush1.bf16.msra.mxu1 %v5733_v23  ;;  %3934 = vmatprep.subr.bf16.mxu0 %v5738_v17  ;;  %v5815_v23 = vld [vmem:[%s8363_s7 + $0x88] sm:$0xff]   ;;  %v5816_v17 = vld [vmem:[%s8363_s7 + $0x50] sm:$0xff]  }
 0x324   : > { %4139 = vmatprep.subr.bf16.mxu1 %v5741_v14  ;;  %v5817_v14 = vld [vmem:[%s8363_s7 + $0xd0] sm:$0xff]  }
 0x326   : > { %3935 = vmatpush1.bf16.msra.mxu0 %v5736_v27  ;;  %v5818_v27 = vld [vmem:[%s8363_s7 + $0x10] sm:$0xff]  }
 0x327   : > { %4140 = vmatpush1.bf16.msra.mxu1 %v5739_v58  ;;  %3936 = vmatprep.subr.bf16.mxu0 %v5744_v13  ;;  %v5819_v58 = vld [vmem:[%s8363_s7 + $0x90] sm:$0xff]   ;;  %v5820_v13 = vld [vmem:[%s8363_s7 + $0x58] sm:$0xff]  }
 0x328   : > { %4141 = vmatprep.subr.bf16.mxu1 %v5747_v48  ;;  %v5821_v48 = vld [vmem:[%s8363_s7 + $0xd8] sm:$0xff]  }
 0x32a   : > { %3937 = vmatpush1.bf16.msra.mxu0 %v5742_v11  ;;  %v5822_v11 = vld [vmem:[%s8363_s7 + $0x18] sm:$0xff]  }
 0x32b   : > { %4142 = vmatpush1.bf16.msra.mxu1 %v5745_v8  ;;  %3938 = vmatprep.subr.bf16.mxu0 %v5750_v9  ;;  %v5823_v8 = vld [vmem:[%s8363_s7 + $0x98] sm:$0xff]   ;;  %v5824_v9 = vld [vmem:[%s8363_s7 + $0x60] sm:$0xff]  }
 0x32c   : > { %4143 = vmatprep.subr.bf16.mxu1 %v5753_v56  ;;  %v5825_v56 = vld [vmem:[%s8363_s7 + $0xe0] sm:$0xff]  }
 0x32e   : > { %3939 = vmatpush1.bf16.msra.mxu0 %v5748_v52  ;;  %v5826_v52 = vld [vmem:[%s8363_s7 + $0x20] sm:$0xff]  }
 0x32f   : > { %4144 = vmatpush1.bf16.msra.mxu1 %v5751_v41  ;;  %3940 = vmatprep.subr.bf16.mxu0 %v5756_v43  ;;  %v5827_v41 = vld [vmem:[%s8363_s7 + $0xa0] sm:$0xff]   ;;  %v5828_v43 = vld [vmem:[%s8363_s7 + $0x68] sm:$0xff]  }
 0x330   : > { %4145 = vmatprep.subr.bf16.mxu1 %v5759_v1  ;;  %v5829_v1 = vld [vmem:[%s8363_s7 + $0xe8] sm:$0xff]  }
 0x332   : > { %3941 = vmatpush1.bf16.msra.mxu0 %v5754_v38  ;;  %v5830_v38 = vld [vmem:[%s8363_s7 + $0x28] sm:$0xff]  }
 0x333   : > { %4146 = vmatpush1.bf16.msra.mxu1 %v5757_v10  ;;  %3942 = vmatprep.subr.bf16.mxu0 %v5762_v51  ;;  %v5831_v10 = vld [vmem:[%s8363_s7 + $0xa8] sm:$0xff]   ;;  %v5832_v51 = vld [vmem:[%s8363_s7 + $0x70] sm:$0xff]  }
 0x334   : > { %4147 = vmatprep.subr.bf16.mxu1 %v5765_v63  ;;  %v5833_v63 = vld [vmem:[%s8363_s7 + $0xf0] sm:$0xff]  }
 0x336   : > { %3943 = vmatpush1.bf16.msra.mxu0 %v5760_v46  ;;  %v5834_v46 = vld [vmem:[%s8363_s7 + $0x30] sm:$0xff]  }
 0x337   : > { %4148 = vmatpush1.bf16.msra.mxu1 %v5763_v49  ;;  %3944 = vmatprep.subr.bf16.mxu0 %v5768_v26  ;;  %v5835_v49 = vld [vmem:[%s8363_s7 + $0xb0] sm:$0xff]   ;;  %v5836_v26 = vld [vmem:[%s8363_s7 + $0x78] sm:$0xff]  }
 0x338   : > { %4149 = vmatprep.subr.bf16.mxu1 %v5771_v20  ;;  %v5837_v20 = vld [vmem:[%s8363_s7 + $0xf8] sm:$0xff]  }
 0x33a   : > { %3945 = vmatpush1.bf16.msra.mxu0 %v5766_v18  ;;  %v5838_v18 = vld [vmem:[%s8363_s7 + $0x38] sm:$0xff]  }
 0x33b   : > { %4150 = vmatpush1.bf16.msra.mxu1 %v5769_v4  ;;  %3946 = vmatprep.subr.bf16.mxu0 %v5774_v29  ;;  %v2140_v4 = vld [vmem:[%s8362_s6] sm:$0xf]  ;;  %v6257_v29 = vmov 1966171168  }
 0x33c   : > { %4151 = vmatprep.subr.bf16.mxu1 %v5777_v28  ;;  %v4179_v28 = vunpack.c.l.s4 %v6257_v29 }
 0x33e   : > { %3947 = vmatpush1.bf16.msra.mxu0 %v5772_v16  ;;  %v8450_v16 = vld [vmem:[#allocation6_spill] sm:$0xff] }
 0x33f   : > { %4152 = vmatpush1.bf16.msra.mxu1 %v5775_v6  ;;  %3948 = vmatprep.subr.bf16.mxu0 %v5780_v55  ;;  %v3745_v47 = vrot.slane %v2140_v4, %v8450_v16  ;;  %v8451_v6 = vld [vmem:[#allocation5_spill] sm:$0xff] }
 0x340   : > { %4153 = vmatprep.subr.bf16.mxu1 %v5783_v62  ;;  %v8452_v55 = vsub.s32 2, %v8451_v6 }
 0x342   : > { %3949 = vmatpush1.bf16.msra.mxu0 %v5778_v59  ;;  %v3753_v62 = vrot.slane %v2140_v4, %v8452_v55  ;;  %v8453_v59 = vld [vmem:[#allocation7_spill] sm:$0xff] }
 0x343   : > { %4154 = vmatpush1.bf16.msra.mxu1 %v5781_v61  ;;  %3950 = vmatprep.subr.bf16.mxu0 %v5786_v32  ;;  %v3749_v50 = vrot.slane %v2140_v4, %v8453_v59  ;;  %v4180_v61 = vunpack.c.0.s8 %v4179_v28  ;;  %v8454_v32 = vsub.s32 3, %v8451_v6 }
 0x344   : > { %4155 = vmatprep.subr.bf16.mxu1 %v5789_v45 }
 0x345   : > { %v3757_v45 = vrot.slane %v2140_v4, %v8454_v32 }
 0x346   : > { %3951 = vmatpush1.bf16.msra.mxu0 %v5784_v54 }
 0x347   : > { %4156 = vmatpush1.bf16.msra.mxu1 %v5787_v44  ;;  %3952 = vmatprep.subr.bf16.mxu0 %v5792_v57 }
 0x348   : > { %4157 = vmatprep.subr.bf16.mxu1 %v5795_v5 }
 0x34a   : > { %3953 = vmatpush1.bf16.msra.mxu0 %v5790_v34 }
 0x34b   : > { %4158 = vmatpush1.bf16.msra.mxu1 %v5793_v30  ;;  %3954 = vmatprep.subr.bf16.mxu0 %v5798_v33  ;;  %v4183_v30 = vsub.s32 %v4180_v61, %v8451_v6 }
 0x34c   : > { %4159 = vmatprep.subr.bf16.mxu1 %v5801_v3 }
 0x34e   : > { %3955 = vmatpush1.bf16.msra.mxu0 %v5796_v19 }
 0x34f   : > { %4160 = vmatpush1.bf16.msra.mxu1 %v5799_v42  ;;  %3956 = vmatprep.subr.bf16.mxu0 %v5804_v24 }
 0x350   : > { %4161 = vmatprep.subr.bf16.mxu1 %v5807_v21 }
 0x352   : > { %3957 = vmatpush1.bf16.msra.mxu0 %v5802_v25 }
 0x353   : > { %4162 = vmatpush1.bf16.msra.mxu1 %v5805_v39  ;;  %5155 = vmatprep.subr.bf16.mxu0 %v5808_v0 }
 0x354   : > { %5177 = vmatprep.subr.bf16.mxu1 %v5809_v53 }
 0x355   : > { %3959 = vmatmul.mubr.bf16.vlgmr.msra.gmra.mrb[44].mxu0 %v1818_v37 }
 0x356   : > { %4164 = vmatmul.mubr.bf16.vlgmr.msra.gmra.mrb[44].mxu1 %v1818_v37  ;;  %5156 = vmatpush3.bf16.msra.mxu0 %v5810_v12 }
 0x357   : > { %5178 = vmatpush3.bf16.msra.mxu1 %v5811_v35  ;;  %5157 = vmatprep.subr.bf16.mxu0 %v5812_v2  ;;  %v8455_v35 = vlaneseq }
 0x358   : > { %5179 = vmatprep.subr.bf16.mxu1 %v5813_v15 }
 0x359   : > { %vm4203_vm1 = vcmp.lt.s32.totalorder %v8455_v35, 512 }
 0x35a   : > { %5158 = vmatpush3.bf16.msra.mxu0 %v5814_v31 }
 0x35b   : > { %5180 = vmatpush3.bf16.msra.mxu1 %v5815_v23  ;;  %5159 = vmatprep.subr.bf16.mxu0 %v5816_v17  ;;  %v4274_v23 = vld [vmem:[%s8364_s8] sm:$0x1] }
 0x35c   : > { %5181 = vmatprep.subr.bf16.mxu1 %v5817_v14 }
 0x35e   : > { %5160 = vmatpush3.bf16.msra.mxu0 %v5818_v27 }
 0x35f   : > { %5182 = vmatpush3.bf16.msra.mxu1 %v5819_v58  ;;  %5161 = vmatprep.subr.bf16.mxu0 %v5820_v13 }
 0x360   : > { %5183 = vmatprep.subr.bf16.mxu1 %v5821_v48 }
 0x362   : > { %5162 = vmatpush3.bf16.msra.mxu0 %v5822_v11 }
 0x363   : > { %5184 = vmatpush3.bf16.msra.mxu1 %v5823_v8  ;;  %5163 = vmatprep.subr.bf16.mxu0 %v5824_v9 }
 0x364   : > { %5185 = vmatprep.subr.bf16.mxu1 %v5825_v56 }
 0x366   : > { %5164 = vmatpush3.bf16.msra.mxu0 %v5826_v52 }
 0x367   : > { %5186 = vmatpush3.bf16.msra.mxu1 %v5827_v41  ;;  %5165 = vmatprep.subr.bf16.mxu0 %v5828_v43 }
 0x368   : > { %5187 = vmatprep.subr.bf16.mxu1 %v5829_v1 }
 0x36a   : > { %5166 = vmatpush3.bf16.msra.mxu0 %v5830_v38 }
 0x36b   : > { %5188 = vmatpush3.bf16.msra.mxu1 %v5831_v10  ;;  %5167 = vmatprep.subr.bf16.mxu0 %v5832_v51 }
 0x36c   : > { %5189 = vmatprep.subr.bf16.mxu1 %v5833_v63 }
 0x36e   : > { %5168 = vmatpush3.bf16.msra.mxu0 %v5834_v46 }
 0x36f   : > { %5190 = vmatpush3.bf16.msra.mxu1 %v5835_v49  ;;  %5169 = vmatprep.subr.bf16.mxu0 %v5836_v26 }
 0x370   : > { %5191 = vmatprep.subr.bf16.mxu1 %v5837_v20 }
 0x372   : > { %5170 = vmatpush3.bf16.msra.mxu0 %v5838_v18 }
 0x373   : > { %5192 = vmatpush3.bf16.msra.mxu1 %v5839_v40 }
 0x428   : > { %v3960_v54 = vpop.f32.mrb[44].mxu0 }
 0x429   : > { %v5215_v36 = vadd.f32 %v3960_v54, %v3745_v47  ;;  %v4165_v44 = vpop.f32.mrb[44].mxu1  ;;  %v3962_v57 = vpop.f32.mrb[45].mxu0 }
 0x42a   : > { %v5217_v5 = vadd.f32 %v4165_v44, %v3753_v62  ;;  %v5216_v34 = vadd.f32 %v3962_v57, %v3749_v50  ;;  %v4167_v33 = vpop.f32.mrb[45].mxu1  ;;  %v3964_v60 = vpop.f32.mrb[46].mxu0 }
 0x42b   : > { %v5218_v3 = vadd.f32 %v4167_v33, %v3757_v45  ;;  %v4169_v19 = vpop.f32.mrb[46].mxu1  ;;  %v3965_v42 = vpop.f32.mrb[47].mxu0  ;;  %v4206_v25 = vpack.c.bf16 %v5215_v36, %v5215_v36 }
 0x42c   : > { %v4176_v24 = vcombine.low %v5215_v36, %v5216_v34  ;;  %v4207_v22 = vpack.c.bf16 %v5216_v34, %v5216_v34  ;;  %v4170_v21 = vpop.f32.mrb[47].mxu1  ;;  %v4208_v0 = vpack.c.bf16 %v5217_v5, %v5217_v5 }
 0x42d   : > { %v4177_v39 = vcombine.low %v5217_v5, %v5218_v3  ;;  %v4209_v7 = vpack.c.bf16 %v5218_v3, %v5218_v3 }
 0x42e   : > { %v4184_v53 = vrot.slane %v4176_v24, %v4183_v30  ;;  %4499 = vmatprep.mubr.bf16.mxu0 %v4207_v22 }
 0x42f   : > { %v4191_v12 = vrot.slane %v4177_v39, %v4183_v30  ;;  %4539 = vmatprep.mubr.bf16.mxu1 %v4209_v7  ;;  %4500 = vmatmul.mubr.bf16.vlgmr.msra.gmra.mrb[48].mxu0 %v4206_v25 }
 0x430   : > { %4540 = vmatmul.mubr.bf16.vlgmr.msra.gmra.mrb[48].mxu1 %v4208_v0 }
 0x431   : > { %v4192_v37 = vcombine.low %v4184_v53, %v4191_v12 }
 0x433   : > { %v4199_v2 = vrot.slane %v4192_v37, %v4183_v30 }
 0x435   : > { %4205 = vst.msk [vmem:[%s367_s28] sm:$0xf] %vm4203_vm1, %v4199_v2  ;;  %s6192_s28 = scalar_lea.vmem %s8316_s20, 16 }
 0x436   : > { %p6193_p11 = scmp.ne.s32.totalorder %s8316_s20, %s6192_s28  ;;  %p6200_p1 = scmp.lt.s32.totalorder %s6198_s12, %s6192_s28 }
 0x438   : > { %p6194_p12 = pnand %p6193_p11, %p6352_p5  ;;  %p6201_p2 = por %p6200_p1, %p6199_p0 }
 0x43a   : > { %p6195_p13 = pneg %p6194_p12 }
 0x43c   : > { %p6202_p3 = pnand %p6201_p2, %p6195_p13 }
 0x502   : > { %v5171_v15 = vpop.f32.mrb[48].mxu0 }
 0x503   : > { %v5193_v31 = vpop.f32.mrb[48].mxu1  ;;  %v5172_v17 = vpop.f32.mrb[49].mxu0 }
 0x504   : > { %v5173_v14 = vadd.f32 %v5172_v17, %v5171_v15  ;;  %v5194_v27 = vpop.f32.mrb[49].mxu1  ;;  %v5174_v58 = vpop.f32.mrb[50].mxu0 }
 0x505   : > { %v5195_v13 = vadd.f32 %v5194_v27, %v5193_v31  ;;  %v5196_v48 = vpop.f32.mrb[50].mxu1  ;;  %v5175_v11 = vpop.f32.mrb[51].mxu0 }
 0x506   : > { %v4502_v8 = vadd.f32 %v5173_v14, %v4274_v23  ;;  %v5197_v9 = vpop.f32.mrb[51].mxu1 }
 0x508   : > { %v4542_v56 = vadd.f32 %v5195_v13, %v4502_v8 }
 0x50a   : > { %4547 = vst [vmem:[%s358_s18] sm:$0x1] %v4542_v56 }
 0x50b   : > { %6205 = shalt.err (!%p6202_p3)
}
 0x50c   : > { %s6206_s30 = scalar_lea.hbm %s8314_s26, 16  ;;  %s6210_s21 = scalar_lea.hbm %s8366_s10, 32 }
 0x50d   : > { %p6207_p4 = scmp.ne.s32.totalorder %s8314_s26, %s6206_s30  ;;  %p6211_p9 = scmp.lt.u32.totalorder %s8314_s26, %s8366_s10 }
 0x50e   : > { %p6212_p10 = scmp.lt.u32.totalorder %s6210_s21, %s6206_s30  ;;  %p6214_p12 = scmp.lt.u32.totalorder %s6206_s30, %s8314_s26 }
 0x50f   : > { %p6208_p7 = pnand %p6207_p4, %p6352_p5 }
 0x510   : > { %p6213_p11 = por %p6212_p10, %p6211_p9 }
 0x511   : > { %p6209_p8 = pneg %p6208_p7 }
 0x512   : > { %p6215_p13 = por %p6214_p12, %p6213_p11 }
 0x514   : > { %p6216_p0 = pnand %p6215_p13, %p6209_p8 }
 0x516   : > { %6219 = shalt.err (!%p6216_p0)
}
 0x517   : > { %5251 = dma.vmem_to_hbm [thread:$0]  (%p6352_p5), %s8316_s20, 16, %s8314_s26, %s4553_s27  }
 0x518 PF: > { %p5257_p1 = scmp.ge.s32.totalorder %s6254_s16, 2  ;;  %s4587_s28 = sand.u32 1, %s6242_s13  }
 0x519   : > { %s4588_s11 = scalar_lea.sflag [#allocation3], %s4587_s28 }
 0x51a   : > { %p5254_p2 = pnand %p5257_p1, %p6356_p6 }
 0x51c   : > { %6237 = dma.done.wait (!%p5254_p2), %s4588_s11, 16  }
 0x51d   : > { %6239 = vsyncadd (!%p5254_p2), %s4588_s11, 4294967280  ;;  %p21_p3 = scmp.ge.s32.totalorder %s6339_s19, 4   ;;  %s8456_s13 = smov %s6246_s14 }
 0x51e   : > { %s8457_s14 = smov %s6250_s15  ;;  %s8458_s15 = smov %s6350_s22 }
 0x51f   : > { %s8459_s16 = smov %s6339_s19  ;;  %23 = sbr.rel (!%p21_p3) target bundleno = 3 (0x3), region = 103 }
 0x526   :  { %4592 = vsyncpa [#allocation3], 1 }
 0x527   :  { %4594 = vsyncpa [#allocation3 + $0x1], 1 }

</bundles_post_ra>
